<compile_context>
chip_gen: v7x
topology: tpu7x:2x2x1
jax: 0.10.0
libtpu: 0.0.40
codegen_flags: <defaults>
</compile_context>

<pallas_src>
import functools

import jax
import jax.numpy as jnp
import numpy as np
from jax import lax
from jax.experimental import pallas as pl
from jax.experimental.pallas import tpu as pltpu

LN_EPS = 1e-5           # nn.LayerNorm default
SOFTPLUS_THRESH = 20.0  # PyTorch F.softplus threshold


def _mish(x):
    # Exact Mish: x * tanh(softplus(x)); softplus uses the PyTorch threshold.
    sp = jnp.where(x > SOFTPLUS_THRESH, x,
                   jnp.log1p(jnp.exp(jnp.minimum(x, SOFTPLUS_THRESH))))
    return x * jnp.tanh(sp)


def _layernorm(x, g, b):
    mu = jnp.mean(x, axis=-1, keepdims=True)
    xc = x - mu
    var = jnp.mean(xc * xc, axis=-1, keepdims=True)
    return xc * lax.rsqrt(var + LN_EPS) * g + b


def _transblock_kernel(x_ref, ln1g_ref, ln1b_ref, wr_ref, wq_ref, wk_ref, wv_ref,
                       wp_ref, bp_ref, ln2g_ref, ln2b_ref, w1_ref, b1_ref,
                       w2_ref, b2_ref, out_ref, *, num_heads, head_dim,
                       chunks_per_step, chunk_len):
    f32, bf16 = jnp.float32, jnp.bfloat16
    rows = chunks_per_step * chunk_len

    x = x_ref[...].astype(f32)                                   # (R, D) residual stream, f32

    # ---- LayerNorm 1 ----
    y = _layernorm(x, ln1g_ref[...], ln1b_ref[...])

    # ---- EffAttention: fused full-width weight matmuls (bf16 MXU, f32 acc) ----
    r = jnp.dot(y.astype(bf16), wr_ref[...], preferred_element_type=f32)     # (R, C2)
    rb = r.astype(bf16)
    q = jnp.dot(rb, wq_ref[...], preferred_element_type=f32).astype(bf16)    # scale folded into wq
    k = jnp.dot(rb, wk_ref[...], preferred_element_type=f32).astype(bf16)
    v = jnp.dot(rb, wv_ref[...], preferred_element_type=f32).astype(bf16)

    # Chunk-local multi-head attention.  Only the tiny (T, T) score / softmax /
    # P@V math is per-head (small static loop, tiny temporaries); all weight
    # matmuls above/below are single full-width MXU calls.
    head_outs = []
    for h in range(num_heads):
        lo = h * head_dim
        qh = q[:, lo:lo + head_dim].reshape(chunks_per_step, chunk_len, head_dim)
        kh = k[:, lo:lo + head_dim].reshape(chunks_per_step, chunk_len, head_dim)
        vh = v[:, lo:lo + head_dim].reshape(chunks_per_step, chunk_len, head_dim)
        s = jnp.einsum('cqd,ckd->cqk', qh, kh, preferred_element_type=f32)   # (C, T, T)
        s = s - jnp.max(s, axis=-1, keepdims=True)
        p = jnp.exp(s)
        p = p / jnp.sum(p, axis=-1, keepdims=True)                            # exact divide
        oh = jnp.einsum('cqk,ckd->cqd', p.astype(bf16), vh,
                        preferred_element_type=f32)                           # (C, T, hd)
        head_outs.append(oh.reshape(rows, head_dim))
    o = jnp.concatenate(head_outs, axis=-1).astype(bf16)                      # (R, C2), head-major

    attn = jnp.dot(o, wp_ref[...], preferred_element_type=f32) + bp_ref[...]  # single proj matmul
    x1 = x + attn                                                             # residual 1

    # ---- LayerNorm 2 + MLP (fc1 -> Mish -> fc2); dropout p=0 is identity ----
    y2 = _layernorm(x1, ln2g_ref[...], ln2b_ref[...])
    h1 = jnp.dot(y2.astype(bf16), w1_ref[...], preferred_element_type=f32) + b1_ref[...]
    h1 = _mish(h1)
    mlp = jnp.dot(h1.astype(bf16), w2_ref[...], preferred_element_type=f32) + b2_ref[...]

    out_ref[...] = (x1 + mlp).astype(out_ref.dtype)                           # residual 2


def _extract_patches(x_img):
    """SAME-padded 3x3/stride-1 patches with nn.Unfold (C, kh, kw) channel order.

    Built channel-last so the 9x-duplicated patch tensor is written directly in
    its final (B, N, 9C) layout -- the only transpose is on the raw (9x smaller)
    image.  TODO(synk): fuse into the kernel with halo DMAs to cut HBM traffic.
    """
    B, C, H, W = x_img.shape
    x_nhwc = jnp.transpose(x_img, (0, 2, 3, 1))                  # (B, H, W, C)
    xp = jnp.pad(x_nhwc, ((0, 0), (1, 1), (1, 1), (0, 0)))
    cols = [xp[:, kh:kh + H, kw:kw + W, :] for kh in range(3) for kw in range(3)]
    p = jnp.stack(cols, axis=-1)                                 # (B, H, W, C, 9)
    return p.reshape(B, H * W, C * 9)                            # channel index = c*9 + kh*3 + kw


def _resident(arr):
    """Full-array BlockSpec with constant index_map: fetched once, stays in VMEM."""
    zeros = (0,) * arr.ndim
    return pl.BlockSpec(arr.shape, lambda i, _z=zeros: _z)


def _pick_chunks_per_step(total_chunks, chunk_len, target_rows=512):
    """Largest chunks-per-step s.t. rows/step <= target, grid stays even and
    (when possible) has >= 4 steps so v7x's 2 TensorCores are balanced."""
    min_steps = 4 if total_chunks >= 8 else 2
    best = 1
    for cps in range(1, total_chunks + 1):
        if total_chunks % cps:
            continue
        steps = total_chunks // cps
        if cps > 1 and (steps < min_steps or steps % 2):
            continue
        if cps * chunk_len <= target_rows:
            best = cps
    return best


def trans_block(x_img, params, *, dim, num_heads=8):
    """Forward of TransBlock. x_img: (B, C, H, W) with 9*C == dim. Returns (B, N, dim)."""
    B, C, H, W = x_img.shape
    assert 9 * C == dim
    N = H * W
    assert N % 4 == 0, "token count must be divisible by 4 (chunked attention)"
    T = N // 4                                   # attention chunk length
    assert T % 8 == 0, "chunk length must be a multiple of 8 (sublane tiling)"
    C2 = dim // 2
    assert C2 % num_heads == 0
    hd = C2 // num_heads
    hidden = dim // 4
    # NOTE: the PyTorch module computes scale from the *original* dim, not dim//2.
    scale = (dim // num_heads) ** -0.5

    total_chunks = B * 4
    cps = _pick_chunks_per_step(total_chunks, T)
    rows = cps * T                               # rows per grid step
    num_steps = total_chunks // cps

    tokens = _extract_patches(x_img.astype(jnp.float32)).reshape(B * N, dim)

    # ---- weight plumbing (host-side layout + bf16 cast, done once) ----
    bf16 = jnp.bfloat16
    w_qkv = params["w_qkv"].astype(jnp.float32)                          # (C2, 3*C2), cols = (q|k|v), (h, d) within
    w_reduce = params["w_reduce"].astype(bf16)                           # (D, C2)
    wq = (w_qkv[:, :C2] * scale).astype(bf16)                            # scale folded in
    wk = w_qkv[:, C2:2 * C2].astype(bf16)
    wv = w_qkv[:, 2 * C2:].astype(bf16)
    w_proj = params["w_proj"].astype(bf16)                               # (C2, D)
    b_proj = params["b_proj"].astype(jnp.float32).reshape(1, dim)
    ln1_g = params["ln1_g"].astype(jnp.float32).reshape(1, dim)
    ln1_b = params["ln1_b"].astype(jnp.float32).reshape(1, dim)
    ln2_g = params["ln2_g"].astype(jnp.float32).reshape(1, dim)
    ln2_b = params["ln2_b"].astype(jnp.float32).reshape(1, dim)
    w1 = params["w1"].astype(bf16)                                       # (D, D/4)
    b1 = params["b1"].astype(jnp.float32).reshape(1, hidden)
    w2 = params["w2"].astype(bf16)                                       # (D/4, D)
    b2 = params["b2"].astype(jnp.float32).reshape(1, dim)

    weights = (ln1_g, ln1_b, w_reduce, wq, wk, wv, w_proj, b_proj,
               ln2_g, ln2_b, w1, b1, w2, b2)

    kernel = functools.partial(_transblock_kernel, num_heads=num_heads, head_dim=hd,
                               chunks_per_step=cps, chunk_len=T)

    token_spec = pl.BlockSpec((rows, dim), lambda i: (i, 0))

    # Cost hint so XLA can overlap the wrapper-side im2col with the kernel.
    tokens_total = B * N
    flops = tokens_total * (2 * dim * C2 + 3 * 2 * C2 * C2 + 2 * 2 * T * C2
                            + 2 * C2 * dim + 2 * dim * hidden + 2 * hidden * dim)
    transcendentals = tokens_total * (num_heads * T + 3 * hidden + 2)
    weight_bytes = int(sum(int(w.size) * w.dtype.itemsize for w in weights))
    bytes_accessed = 2 * tokens_total * dim * 4 + weight_bytes

    # VMEM budget re-derived from the tile; cap at 56 MiB (headroom inside v7x's
    # 64 MiB/TC), allow > 32 MiB on v5e/v6e when tiles are large.
    tile_bytes = rows * dim * 4
    vmem_limit = int(min(56 * 2 ** 20, max(32 * 2 ** 20, 12 * tile_bytes + 4 * 2 ** 20)))

    out = pl.pallas_call(
        kernel,
        out_shape=jax.ShapeDtypeStruct((B * N, dim), jnp.float32),
        grid=(num_steps,),                        # independent multi-chunk tiles
        in_specs=[token_spec] + [_resident(w) for w in weights],
        out_specs=token_spec,
        compiler_params=pltpu.CompilerParams(
            dimension_semantics=("parallel",),    # shard steps across v7x's 2 TCs
            vmem_limit_bytes=vmem_limit,
        ),
        cost_estimate=pl.CostEstimate(flops=int(flops),
                                      transcendentals=int(transcendentals),
                                      bytes_accessed=int(bytes_accessed)),
    )(tokens, *weights)

    return out.reshape(B, N, dim)


# ----------------------------- pure-JAX f32 reference -----------------------------
def _reference(x_img, params, *, dim, num_heads=8):
    B, C, H, W = x_img.shape
    N = H * W
    C2 = dim // 2
    hd = C2 // num_heads
    scale = (dim // num_heads) ** -0.5
    chunk = N // 4

    x = _extract_patches(x_img.astype(jnp.float32))                      # (B, N, D)

    def layernorm(t, g, b):
        mu = jnp.mean(t, axis=-1, keepdims=True)
        var = jnp.mean(jnp.square(t - mu), axis=-1, keepdims=True)
        return (t - mu) / jnp.sqrt(var + LN_EPS) * g.reshape(1, 1, -1) + b.reshape(1, 1, -1)

    def mish(t):
        sp = jnp.where(t > SOFTPLUS_THRESH, t,
                       jnp.log1p(jnp.exp(jnp.minimum(t, SOFTPLUS_THRESH))))
        return t * jnp.tanh(sp)

    # EffAttention
    y = layernorm(x, params["ln1_g"], params["ln1_b"])
    r = y @ params["w_reduce"]                                           # (B, N, D/2)
    qkv = (r @ params["w_qkv"]).reshape(B, N, 3, num_heads, hd).transpose(2, 0, 3, 1, 4)
    q, k, v = qkv[0], qkv[1], qkv[2]                                     # (B, H, N, hd)
    outs = []
    for c in range(4):
        sl = slice(c * chunk, (c + 1) * chunk)
        attn = jnp.einsum("bhqd,bhkd->bhqk", q[:, :, sl], k[:, :, sl]) * scale
        attn = jax.nn.softmax(attn, axis=-1)
        oc = jnp.einsum("bhqk,bhkd->bhqd", attn, v[:, :, sl])
        outs.append(oc.transpose(0, 2, 1, 3))                            # (B, chunk, H, hd)
    a = jnp.concatenate(outs, axis=1).reshape(B, N, C2)
    a = a @ params["w_proj"] + params["b_proj"].reshape(1, 1, -1)
    x = x + a

    # MLP
    y2 = layernorm(x, params["ln2_g"], params["ln2_b"])
    h1 = mish(y2 @ params["w1"] + params["b1"].reshape(1, 1, -1))
    return x + h1 @ params["w2"] + params["b2"].reshape(1, 1, -1)


if __name__ == "__main__":
    key = jax.random.PRNGKey(0)
    B, C, H, W = 2, 32, 8, 8            # dim = 9*C = 288, N = 64, chunk = 16
    dim = 9 * C
    num_heads = 8
    C2 = dim // 2
    hidden = dim // 4

    keys = jax.random.split(key, 14)
    x = jax.random.normal(keys[0], (B, C, H, W), jnp.float32)

    def init(k, shape, fan_in):
        return jax.random.normal(k, shape, jnp.float32) * (fan_in ** -0.5)

    params = {
        "w_reduce": init(keys[1], (dim, C2), dim),
        "w_qkv":    init(keys[2], (C2, 3 * C2), C2),
        "w_proj":   init(keys[3], (C2, dim), C2),
        "b_proj":   0.1 * jax.random.normal(keys[4], (dim,), jnp.float32),
        "w1":       init(keys[5], (dim, hidden), dim),
        "b1":       0.1 * jax.random.normal(keys[6], (hidden,), jnp.float32),
        "w2":       init(keys[7], (hidden, dim), hidden),
        "b2":       0.1 * jax.random.normal(keys[8], (dim,), jnp.float32),
        "ln1_g":    1.0 + 0.1 * jax.random.normal(keys[9], (dim,), jnp.float32),
        "ln1_b":    0.1 * jax.random.normal(keys[10], (dim,), jnp.float32),
        "ln2_g":    1.0 + 0.1 * jax.random.normal(keys[11], (dim,), jnp.float32),
        "ln2_b":    0.1 * jax.random.normal(keys[12], (dim,), jnp.float32),
    }

    out = trans_block(x, params, dim=dim, num_heads=num_heads)
    out = jax.block_until_ready(out)
    assert out.shape == (B, H * W, dim)

    ref = _reference(x, params, dim=dim, num_heads=num_heads)
    # Kernel feeds the MXU bf16 operands (per perf review) against an f32
    # reference, so the tolerance is the bf16-matmul level, not f32 round-off.
    np.testing.assert_allclose(np.asarray(out), np.asarray(ref), rtol=3e-2, atol=3e-2)
    print("KERNEL_OK")
</pallas_src>

<mosaic_0001>
module attributes {stable_mosaic.version = 11 : i64} {
  func.func @_transblock_kernel(%arg0: i32, %arg1: memref<32x288xf32, #tpu.memory_space<vmem>>, %arg2: memref<1x288xf32, #tpu.memory_space<vmem>>, %arg3: memref<1x288xf32, #tpu.memory_space<vmem>>, %arg4: memref<288x144xbf16, #tpu.memory_space<vmem>>, %arg5: memref<144x144xbf16, #tpu.memory_space<vmem>>, %arg6: memref<144x144xbf16, #tpu.memory_space<vmem>>, %arg7: memref<144x144xbf16, #tpu.memory_space<vmem>>, %arg8: memref<144x288xbf16, #tpu.memory_space<vmem>>, %arg9: memref<1x288xf32, #tpu.memory_space<vmem>>, %arg10: memref<1x288xf32, #tpu.memory_space<vmem>>, %arg11: memref<1x288xf32, #tpu.memory_space<vmem>>, %arg12: memref<288x72xbf16, #tpu.memory_space<vmem>>, %arg13: memref<1x72xf32, #tpu.memory_space<vmem>>, %arg14: memref<72x288xbf16, #tpu.memory_space<vmem>>, %arg15: memref<1x288xf32, #tpu.memory_space<vmem>>, %arg16: memref<32x288xf32, #tpu.memory_space<vmem>>) attributes {dimension_semantics = [#tpu.dimension_semantics<parallel>], iteration_bounds = array<i64: 4>, scalar_prefetch = 0 : i64, scratch_operands = 0 : i64, tpu.core_type = #tpu.core_type<tc>, window_params = [{transform_indices = @transform_0, window_bounds = array<i64: 32, 288>}, {pipeline_mode = #tpu.pipeline_mode<synchronous>, transform_indices = @transform_1, window_bounds = array<i64: 1, 288>}, {pipeline_mode = #tpu.pipeline_mode<synchronous>, transform_indices = @transform_2, window_bounds = array<i64: 1, 288>}, {pipeline_mode = #tpu.pipeline_mode<synchronous>, transform_indices = @transform_3, window_bounds = array<i64: 288, 144>}, {pipeline_mode = #tpu.pipeline_mode<synchronous>, transform_indices = @transform_4, window_bounds = array<i64: 144, 144>}, {pipeline_mode = #tpu.pipeline_mode<synchronous>, transform_indices = @transform_5, window_bounds = array<i64: 144, 144>}, {pipeline_mode = #tpu.pipeline_mode<synchronous>, transform_indices = @transform_6, window_bounds = array<i64: 144, 144>}, {pipeline_mode = #tpu.pipeline_mode<synchronous>, transform_indices = @transform_7, window_bounds = array<i64: 144, 288>}, {pipeline_mode = #tpu.pipeline_mode<synchronous>, transform_indices = @transform_8, window_bounds = array<i64: 1, 288>}, {pipeline_mode = #tpu.pipeline_mode<synchronous>, transform_indices = @transform_9, window_bounds = array<i64: 1, 288>}, {pipeline_mode = #tpu.pipeline_mode<synchronous>, transform_indices = @transform_10, window_bounds = array<i64: 1, 288>}, {pipeline_mode = #tpu.pipeline_mode<synchronous>, transform_indices = @transform_11, window_bounds = array<i64: 288, 72>}, {pipeline_mode = #tpu.pipeline_mode<synchronous>, transform_indices = @transform_12, window_bounds = array<i64: 1, 72>}, {pipeline_mode = #tpu.pipeline_mode<synchronous>, transform_indices = @transform_13, window_bounds = array<i64: 72, 288>}, {pipeline_mode = #tpu.pipeline_mode<synchronous>, transform_indices = @transform_14, window_bounds = array<i64: 1, 288>}, {transform_indices = @transform_15, window_bounds = array<i64: 32, 288>}]} {
    %c0 = arith.constant 0 : index
    %c0_0 = arith.constant 0 : index
    %0 = vector.load %arg1[%c0, %c0_0] : memref<32x288xf32, #tpu.memory_space<vmem>>, vector<32x288xf32>
    %c0_1 = arith.constant 0 : index
    %c0_2 = arith.constant 0 : index
    %1 = vector.load %arg2[%c0_1, %c0_2] : memref<1x288xf32, #tpu.memory_space<vmem>>, vector<1x288xf32>
    %c0_3 = arith.constant 0 : index
    %c0_4 = arith.constant 0 : index
    %2 = vector.load %arg3[%c0_3, %c0_4] : memref<1x288xf32, #tpu.memory_space<vmem>>, vector<1x288xf32>
    %cst = arith.constant dense<0.000000e+00> : vector<32xf32>
    %3 = vector.multi_reduction <add>, %0, %cst [1] : vector<32x288xf32> to vector<32xf32>
    %4 = vector.shape_cast %3 : vector<32xf32> to vector<32x1xf32>
    %cst_5 = arith.constant 2.880000e+02 : f32
    %5 = vector.broadcast %cst_5 : f32 to vector<32x1xf32>
    %6 = arith.divf %4, %5 : vector<32x1xf32>
    %7 = vector.broadcast %6 : vector<32x1xf32> to vector<32x288xf32>
    %8 = arith.subf %0, %7 : vector<32x288xf32>
    %9 = arith.mulf %8, %8 : vector<32x288xf32>
    %cst_6 = arith.constant dense<0.000000e+00> : vector<32xf32>
    %10 = vector.multi_reduction <add>, %9, %cst_6 [1] : vector<32x288xf32> to vector<32xf32>
    %11 = vector.shape_cast %10 : vector<32xf32> to vector<32x1xf32>
    %cst_7 = arith.constant 2.880000e+02 : f32
    %12 = vector.broadcast %cst_7 : f32 to vector<32x1xf32>
    %13 = arith.divf %11, %12 : vector<32x1xf32>
    %cst_8 = arith.constant 9.99999974E-6 : f32
    %14 = vector.broadcast %cst_8 : f32 to vector<32x1xf32>
    %15 = arith.addf %13, %14 : vector<32x1xf32>
    %16 = math.rsqrt %15 : vector<32x1xf32>
    %17 = vector.broadcast %16 : vector<32x1xf32> to vector<32x288xf32>
    %18 = arith.mulf %8, %17 : vector<32x288xf32>
    %19 = vector.broadcast %1 : vector<1x288xf32> to vector<32x288xf32>
    %20 = arith.mulf %18, %19 : vector<32x288xf32>
    %21 = vector.broadcast %2 : vector<1x288xf32> to vector<32x288xf32>
    %22 = arith.addf %20, %21 : vector<32x288xf32>
    %23 = arith.truncf %22 : vector<32x288xf32> to vector<32x288xbf16>
    %c0_9 = arith.constant 0 : index
    %c0_10 = arith.constant 0 : index
    %24 = vector.load %arg4[%c0_9, %c0_10] : memref<288x144xbf16, #tpu.memory_space<vmem>>, vector<288x144xbf16>
    %cst_11 = arith.constant dense<0.000000e+00> : vector<32x144xf32>
    %25 = tpu.matmul %23, %24, %cst_11 {dimension_numbers = #tpu.dot_dimension_numbers<[1], [0], [0], [1], [0, 0, 1, 1], [], []>} : vector<32x288xbf16>, vector<288x144xbf16>, vector<32x144xf32> -> vector<32x144xf32>
    %26 = arith.truncf %25 : vector<32x144xf32> to vector<32x144xbf16>
    %c0_12 = arith.constant 0 : index
    %c0_13 = arith.constant 0 : index
    %27 = vector.load %arg5[%c0_12, %c0_13] : memref<144x144xbf16, #tpu.memory_space<vmem>>, vector<144x144xbf16>
    %cst_14 = arith.constant dense<0.000000e+00> : vector<32x144xf32>
    %28 = tpu.matmul %26, %27, %cst_14 {dimension_numbers = #tpu.dot_dimension_numbers<[1], [0], [0], [1], [0, 0, 1, 1], [], []>} : vector<32x144xbf16>, vector<144x144xbf16>, vector<32x144xf32> -> vector<32x144xf32>
    %29 = arith.truncf %28 : vector<32x144xf32> to vector<32x144xbf16>
    %c0_15 = arith.constant 0 : index
    %c0_16 = arith.constant 0 : index
    %30 = vector.load %arg6[%c0_15, %c0_16] : memref<144x144xbf16, #tpu.memory_space<vmem>>, vector<144x144xbf16>
    %cst_17 = arith.constant dense<0.000000e+00> : vector<32x144xf32>
    %31 = tpu.matmul %26, %30, %cst_17 {dimension_numbers = #tpu.dot_dimension_numbers<[1], [0], [0], [1], [0, 0, 1, 1], [], []>} : vector<32x144xbf16>, vector<144x144xbf16>, vector<32x144xf32> -> vector<32x144xf32>
    %32 = arith.truncf %31 : vector<32x144xf32> to vector<32x144xbf16>
    %c0_18 = arith.constant 0 : index
    %c0_19 = arith.constant 0 : index
    %33 = vector.load %arg7[%c0_18, %c0_19] : memref<144x144xbf16, #tpu.memory_space<vmem>>, vector<144x144xbf16>
    %cst_20 = arith.constant dense<0.000000e+00> : vector<32x144xf32>
    %34 = tpu.matmul %26, %33, %cst_20 {dimension_numbers = #tpu.dot_dimension_numbers<[1], [0], [0], [1], [0, 0, 1, 1], [], []>} : vector<32x144xbf16>, vector<144x144xbf16>, vector<32x144xf32> -> vector<32x144xf32>
    %35 = arith.truncf %34 : vector<32x144xf32> to vector<32x144xbf16>
    %36 = vector.extract_strided_slice %29 {offsets = [0, 0], sizes = [32, 18], strides = [1, 1]} : vector<32x144xbf16> to vector<32x18xbf16>
    %37 = vector.shape_cast %36 : vector<32x18xbf16> to vector<2x16x18xbf16>
    %38 = vector.extract_strided_slice %32 {offsets = [0, 0], sizes = [32, 18], strides = [1, 1]} : vector<32x144xbf16> to vector<32x18xbf16>
    %39 = vector.shape_cast %38 : vector<32x18xbf16> to vector<2x16x18xbf16>
    %40 = vector.extract_strided_slice %35 {offsets = [0, 0], sizes = [32, 18], strides = [1, 1]} : vector<32x144xbf16> to vector<32x18xbf16>
    %41 = vector.shape_cast %40 : vector<32x18xbf16> to vector<2x16x18xbf16>
    "tpu.trace_start"() <{level = 10 : i32, message = "cqd,ckd->cqk"}> : () -> ()
    %cst_21 = arith.constant dense<0.000000e+00> : vector<2x16x16xf32>
    %42 = tpu.matmul %37, %39, %cst_21 {dimension_numbers = #tpu.dot_dimension_numbers<[2], [2], [1], [1], [0, 0, 0, 1, 1, 1], [0], [0]>} : vector<2x16x18xbf16>, vector<2x16x18xbf16>, vector<2x16x16xf32> -> vector<2x16x16xf32>
    "tpu.trace_stop"() : () -> ()
    %cst_22 = arith.constant dense<0xFF800000> : vector<2x16xf32>
    %43 = vector.multi_reduction <maximumf>, %42, %cst_22 [2] : vector<2x16x16xf32> to vector<2x16xf32>
    %44 = vector.shape_cast %43 : vector<2x16xf32> to vector<2x16x1xf32>
    %45 = vector.broadcast %44 : vector<2x16x1xf32> to vector<2x16x16xf32>
    %46 = arith.subf %42, %45 : vector<2x16x16xf32>
    %47 = math.exp %46 : vector<2x16x16xf32>
    %cst_23 = arith.constant dense<0.000000e+00> : vector<2x16xf32>
    %48 = vector.multi_reduction <add>, %47, %cst_23 [2] : vector<2x16x16xf32> to vector<2x16xf32>
    %49 = vector.shape_cast %48 : vector<2x16xf32> to vector<2x16x1xf32>
    %50 = vector.broadcast %49 : vector<2x16x1xf32> to vector<2x16x16xf32>
    %51 = arith.divf %47, %50 : vector<2x16x16xf32>
    %52 = arith.truncf %51 : vector<2x16x16xf32> to vector<2x16x16xbf16>
    "tpu.trace_start"() <{level = 10 : i32, message = "cqk,ckd->cqd"}> : () -> ()
    %cst_24 = arith.constant dense<0.000000e+00> : vector<2x16x18xf32>
    %53 = tpu.matmul %52, %41, %cst_24 {dimension_numbers = #tpu.dot_dimension_numbers<[2], [1], [1], [2], [0, 0, 0, 1, 1, 2], [0], [0]>} : vector<2x16x16xbf16>, vector<2x16x18xbf16>, vector<2x16x18xf32> -> vector<2x16x18xf32>
    "tpu.trace_stop"() : () -> ()
    %54 = vector.shape_cast %53 : vector<2x16x18xf32> to vector<32x18xf32>
    %55 = vector.extract_strided_slice %29 {offsets = [0, 18], sizes = [32, 18], strides = [1, 1]} : vector<32x144xbf16> to vector<32x18xbf16>
    %56 = vector.shape_cast %55 : vector<32x18xbf16> to vector<2x16x18xbf16>
    %57 = vector.extract_strided_slice %32 {offsets = [0, 18], sizes = [32, 18], strides = [1, 1]} : vector<32x144xbf16> to vector<32x18xbf16>
    %58 = vector.shape_cast %57 : vector<32x18xbf16> to vector<2x16x18xbf16>
    %59 = vector.extract_strided_slice %35 {offsets = [0, 18], sizes = [32, 18], strides = [1, 1]} : vector<32x144xbf16> to vector<32x18xbf16>
    %60 = vector.shape_cast %59 : vector<32x18xbf16> to vector<2x16x18xbf16>
    "tpu.trace_start"() <{level = 10 : i32, message = "cqd,ckd->cqk"}> : () -> ()
    %cst_25 = arith.constant dense<0.000000e+00> : vector<2x16x16xf32>
    %61 = tpu.matmul %56, %58, %cst_25 {dimension_numbers = #tpu.dot_dimension_numbers<[2], [2], [1], [1], [0, 0, 0, 1, 1, 1], [0], [0]>} : vector<2x16x18xbf16>, vector<2x16x18xbf16>, vector<2x16x16xf32> -> vector<2x16x16xf32>
    "tpu.trace_stop"() : () -> ()
    %cst_26 = arith.constant dense<0xFF800000> : vector<2x16xf32>
    %62 = vector.multi_reduction <maximumf>, %61, %cst_26 [2] : vector<2x16x16xf32> to vector<2x16xf32>
    %63 = vector.shape_cast %62 : vector<2x16xf32> to vector<2x16x1xf32>
    %64 = vector.broadcast %63 : vector<2x16x1xf32> to vector<2x16x16xf32>
    %65 = arith.subf %61, %64 : vector<2x16x16xf32>
    %66 = math.exp %65 : vector<2x16x16xf32>
    %cst_27 = arith.constant dense<0.000000e+00> : vector<2x16xf32>
    %67 = vector.multi_reduction <add>, %66, %cst_27 [2] : vector<2x16x16xf32> to vector<2x16xf32>
    %68 = vector.shape_cast %67 : vector<2x16xf32> to vector<2x16x1xf32>
    %69 = vector.broadcast %68 : vector<2x16x1xf32> to vector<2x16x16xf32>
    %70 = arith.divf %66, %69 : vector<2x16x16xf32>
    %71 = arith.truncf %70 : vector<2x16x16xf32> to vector<2x16x16xbf16>
    "tpu.trace_start"() <{level = 10 : i32, message = "cqk,ckd->cqd"}> : () -> ()
    %cst_28 = arith.constant dense<0.000000e+00> : vector<2x16x18xf32>
    %72 = tpu.matmul %71, %60, %cst_28 {dimension_numbers = #tpu.dot_dimension_numbers<[2], [1], [1], [2], [0, 0, 0, 1, 1, 2], [0], [0]>} : vector<2x16x16xbf16>, vector<2x16x18xbf16>, vector<2x16x18xf32> -> vector<2x16x18xf32>
    "tpu.trace_stop"() : () -> ()
    %73 = vector.shape_cast %72 : vector<2x16x18xf32> to vector<32x18xf32>
    %74 = vector.extract_strided_slice %29 {offsets = [0, 36], sizes = [32, 18], strides = [1, 1]} : vector<32x144xbf16> to vector<32x18xbf16>
    %75 = vector.shape_cast %74 : vector<32x18xbf16> to vector<2x16x18xbf16>
    %76 = vector.extract_strided_slice %32 {offsets = [0, 36], sizes = [32, 18], strides = [1, 1]} : vector<32x144xbf16> to vector<32x18xbf16>
    %77 = vector.shape_cast %76 : vector<32x18xbf16> to vector<2x16x18xbf16>
    %78 = vector.extract_strided_slice %35 {offsets = [0, 36], sizes = [32, 18], strides = [1, 1]} : vector<32x144xbf16> to vector<32x18xbf16>
    %79 = vector.shape_cast %78 : vector<32x18xbf16> to vector<2x16x18xbf16>
    "tpu.trace_start"() <{level = 10 : i32, message = "cqd,ckd->cqk"}> : () -> ()
    %cst_29 = arith.constant dense<0.000000e+00> : vector<2x16x16xf32>
    %80 = tpu.matmul %75, %77, %cst_29 {dimension_numbers = #tpu.dot_dimension_numbers<[2], [2], [1], [1], [0, 0, 0, 1, 1, 1], [0], [0]>} : vector<2x16x18xbf16>, vector<2x16x18xbf16>, vector<2x16x16xf32> -> vector<2x16x16xf32>
    "tpu.trace_stop"() : () -> ()
    %cst_30 = arith.constant dense<0xFF800000> : vector<2x16xf32>
    %81 = vector.multi_reduction <maximumf>, %80, %cst_30 [2] : vector<2x16x16xf32> to vector<2x16xf32>
    %82 = vector.shape_cast %81 : vector<2x16xf32> to vector<2x16x1xf32>
    %83 = vector.broadcast %82 : vector<2x16x1xf32> to vector<2x16x16xf32>
    %84 = arith.subf %80, %83 : vector<2x16x16xf32>
    %85 = math.exp %84 : vector<2x16x16xf32>
    %cst_31 = arith.constant dense<0.000000e+00> : vector<2x16xf32>
    %86 = vector.multi_reduction <add>, %85, %cst_31 [2] : vector<2x16x16xf32> to vector<2x16xf32>
    %87 = vector.shape_cast %86 : vector<2x16xf32> to vector<2x16x1xf32>
    %88 = vector.broadcast %87 : vector<2x16x1xf32> to vector<2x16x16xf32>
    %89 = arith.divf %85, %88 : vector<2x16x16xf32>
    %90 = arith.truncf %89 : vector<2x16x16xf32> to vector<2x16x16xbf16>
    "tpu.trace_start"() <{level = 10 : i32, message = "cqk,ckd->cqd"}> : () -> ()
    %cst_32 = arith.constant dense<0.000000e+00> : vector<2x16x18xf32>
    %91 = tpu.matmul %90, %79, %cst_32 {dimension_numbers = #tpu.dot_dimension_numbers<[2], [1], [1], [2], [0, 0, 0, 1, 1, 2], [0], [0]>} : vector<2x16x16xbf16>, vector<2x16x18xbf16>, vector<2x16x18xf32> -> vector<2x16x18xf32>
    "tpu.trace_stop"() : () -> ()
    %92 = vector.shape_cast %91 : vector<2x16x18xf32> to vector<32x18xf32>
    %93 = vector.extract_strided_slice %29 {offsets = [0, 54], sizes = [32, 18], strides = [1, 1]} : vector<32x144xbf16> to vector<32x18xbf16>
    %94 = vector.shape_cast %93 : vector<32x18xbf16> to vector<2x16x18xbf16>
    %95 = vector.extract_strided_slice %32 {offsets = [0, 54], sizes = [32, 18], strides = [1, 1]} : vector<32x144xbf16> to vector<32x18xbf16>
    %96 = vector.shape_cast %95 : vector<32x18xbf16> to vector<2x16x18xbf16>
    %97 = vector.extract_strided_slice %35 {offsets = [0, 54], sizes = [32, 18], strides = [1, 1]} : vector<32x144xbf16> to vector<32x18xbf16>
    %98 = vector.shape_cast %97 : vector<32x18xbf16> to vector<2x16x18xbf16>
    "tpu.trace_start"() <{level = 10 : i32, message = "cqd,ckd->cqk"}> : () -> ()
    %cst_33 = arith.constant dense<0.000000e+00> : vector<2x16x16xf32>
    %99 = tpu.matmul %94, %96, %cst_33 {dimension_numbers = #tpu.dot_dimension_numbers<[2], [2], [1], [1], [0, 0, 0, 1, 1, 1], [0], [0]>} : vector<2x16x18xbf16>, vector<2x16x18xbf16>, vector<2x16x16xf32> -> vector<2x16x16xf32>
    "tpu.trace_stop"() : () -> ()
    %cst_34 = arith.constant dense<0xFF800000> : vector<2x16xf32>
    %100 = vector.multi_reduction <maximumf>, %99, %cst_34 [2] : vector<2x16x16xf32> to vector<2x16xf32>
    %101 = vector.shape_cast %100 : vector<2x16xf32> to vector<2x16x1xf32>
    %102 = vector.broadcast %101 : vector<2x16x1xf32> to vector<2x16x16xf32>
    %103 = arith.subf %99, %102 : vector<2x16x16xf32>
    %104 = math.exp %103 : vector<2x16x16xf32>
    %cst_35 = arith.constant dense<0.000000e+00> : vector<2x16xf32>
    %105 = vector.multi_reduction <add>, %104, %cst_35 [2] : vector<2x16x16xf32> to vector<2x16xf32>
    %106 = vector.shape_cast %105 : vector<2x16xf32> to vector<2x16x1xf32>
    %107 = vector.broadcast %106 : vector<2x16x1xf32> to vector<2x16x16xf32>
    %108 = arith.divf %104, %107 : vector<2x16x16xf32>
    %109 = arith.truncf %108 : vector<2x16x16xf32> to vector<2x16x16xbf16>
    "tpu.trace_start"() <{level = 10 : i32, message = "cqk,ckd->cqd"}> : () -> ()
    %cst_36 = arith.constant dense<0.000000e+00> : vector<2x16x18xf32>
    %110 = tpu.matmul %109, %98, %cst_36 {dimension_numbers = #tpu.dot_dimension_numbers<[2], [1], [1], [2], [0, 0, 0, 1, 1, 2], [0], [0]>} : vector<2x16x16xbf16>, vector<2x16x18xbf16>, vector<2x16x18xf32> -> vector<2x16x18xf32>
    "tpu.trace_stop"() : () -> ()
    %111 = vector.shape_cast %110 : vector<2x16x18xf32> to vector<32x18xf32>
    %112 = vector.extract_strided_slice %29 {offsets = [0, 72], sizes = [32, 18], strides = [1, 1]} : vector<32x144xbf16> to vector<32x18xbf16>
    %113 = vector.shape_cast %112 : vector<32x18xbf16> to vector<2x16x18xbf16>
    %114 = vector.extract_strided_slice %32 {offsets = [0, 72], sizes = [32, 18], strides = [1, 1]} : vector<32x144xbf16> to vector<32x18xbf16>
    %115 = vector.shape_cast %114 : vector<32x18xbf16> to vector<2x16x18xbf16>
    %116 = vector.extract_strided_slice %35 {offsets = [0, 72], sizes = [32, 18], strides = [1, 1]} : vector<32x144xbf16> to vector<32x18xbf16>
    %117 = vector.shape_cast %116 : vector<32x18xbf16> to vector<2x16x18xbf16>
    "tpu.trace_start"() <{level = 10 : i32, message = "cqd,ckd->cqk"}> : () -> ()
    %cst_37 = arith.constant dense<0.000000e+00> : vector<2x16x16xf32>
    %118 = tpu.matmul %113, %115, %cst_37 {dimension_numbers = #tpu.dot_dimension_numbers<[2], [2], [1], [1], [0, 0, 0, 1, 1, 1], [0], [0]>} : vector<2x16x18xbf16>, vector<2x16x18xbf16>, vector<2x16x16xf32> -> vector<2x16x16xf32>
    "tpu.trace_stop"() : () -> ()
    %cst_38 = arith.constant dense<0xFF800000> : vector<2x16xf32>
    %119 = vector.multi_reduction <maximumf>, %118, %cst_38 [2] : vector<2x16x16xf32> to vector<2x16xf32>
    %120 = vector.shape_cast %119 : vector<2x16xf32> to vector<2x16x1xf32>
    %121 = vector.broadcast %120 : vector<2x16x1xf32> to vector<2x16x16xf32>
    %122 = arith.subf %118, %121 : vector<2x16x16xf32>
    %123 = math.exp %122 : vector<2x16x16xf32>
    %cst_39 = arith.constant dense<0.000000e+00> : vector<2x16xf32>
    %124 = vector.multi_reduction <add>, %123, %cst_39 [2] : vector<2x16x16xf32> to vector<2x16xf32>
    %125 = vector.shape_cast %124 : vector<2x16xf32> to vector<2x16x1xf32>
    %126 = vector.broadcast %125 : vector<2x16x1xf32> to vector<2x16x16xf32>
    %127 = arith.divf %123, %126 : vector<2x16x16xf32>
    %128 = arith.truncf %127 : vector<2x16x16xf32> to vector<2x16x16xbf16>
    "tpu.trace_start"() <{level = 10 : i32, message = "cqk,ckd->cqd"}> : () -> ()
    %cst_40 = arith.constant dense<0.000000e+00> : vector<2x16x18xf32>
    %129 = tpu.matmul %128, %117, %cst_40 {dimension_numbers = #tpu.dot_dimension_numbers<[2], [1], [1], [2], [0, 0, 0, 1, 1, 2], [0], [0]>} : vector<2x16x16xbf16>, vector<2x16x18xbf16>, vector<2x16x18xf32> -> vector<2x16x18xf32>
    "tpu.trace_stop"() : () -> ()
    %130 = vector.shape_cast %129 : vector<2x16x18xf32> to vector<32x18xf32>
    %131 = vector.extract_strided_slice %29 {offsets = [0, 90], sizes = [32, 18], strides = [1, 1]} : vector<32x144xbf16> to vector<32x18xbf16>
    %132 = vector.shape_cast %131 : vector<32x18xbf16> to vector<2x16x18xbf16>
    %133 = vector.extract_strided_slice %32 {offsets = [0, 90], sizes = [32, 18], strides = [1, 1]} : vector<32x144xbf16> to vector<32x18xbf16>
    %134 = vector.shape_cast %133 : vector<32x18xbf16> to vector<2x16x18xbf16>
    %135 = vector.extract_strided_slice %35 {offsets = [0, 90], sizes = [32, 18], strides = [1, 1]} : vector<32x144xbf16> to vector<32x18xbf16>
    %136 = vector.shape_cast %135 : vector<32x18xbf16> to vector<2x16x18xbf16>
    "tpu.trace_start"() <{level = 10 : i32, message = "cqd,ckd->cqk"}> : () -> ()
    %cst_41 = arith.constant dense<0.000000e+00> : vector<2x16x16xf32>
    %137 = tpu.matmul %132, %134, %cst_41 {dimension_numbers = #tpu.dot_dimension_numbers<[2], [2], [1], [1], [0, 0, 0, 1, 1, 1], [0], [0]>} : vector<2x16x18xbf16>, vector<2x16x18xbf16>, vector<2x16x16xf32> -> vector<2x16x16xf32>
    "tpu.trace_stop"() : () -> ()
    %cst_42 = arith.constant dense<0xFF800000> : vector<2x16xf32>
    %138 = vector.multi_reduction <maximumf>, %137, %cst_42 [2] : vector<2x16x16xf32> to vector<2x16xf32>
    %139 = vector.shape_cast %138 : vector<2x16xf32> to vector<2x16x1xf32>
    %140 = vector.broadcast %139 : vector<2x16x1xf32> to vector<2x16x16xf32>
    %141 = arith.subf %137, %140 : vector<2x16x16xf32>
    %142 = math.exp %141 : vector<2x16x16xf32>
    %cst_43 = arith.constant dense<0.000000e+00> : vector<2x16xf32>
    %143 = vector.multi_reduction <add>, %142, %cst_43 [2] : vector<2x16x16xf32> to vector<2x16xf32>
    %144 = vector.shape_cast %143 : vector<2x16xf32> to vector<2x16x1xf32>
    %145 = vector.broadcast %144 : vector<2x16x1xf32> to vector<2x16x16xf32>
    %146 = arith.divf %142, %145 : vector<2x16x16xf32>
    %147 = arith.truncf %146 : vector<2x16x16xf32> to vector<2x16x16xbf16>
    "tpu.trace_start"() <{level = 10 : i32, message = "cqk,ckd->cqd"}> : () -> ()
    %cst_44 = arith.constant dense<0.000000e+00> : vector<2x16x18xf32>
    %148 = tpu.matmul %147, %136, %cst_44 {dimension_numbers = #tpu.dot_dimension_numbers<[2], [1], [1], [2], [0, 0, 0, 1, 1, 2], [0], [0]>} : vector<2x16x16xbf16>, vector<2x16x18xbf16>, vector<2x16x18xf32> -> vector<2x16x18xf32>
    "tpu.trace_stop"() : () -> ()
    %149 = vector.shape_cast %148 : vector<2x16x18xf32> to vector<32x18xf32>
    %150 = vector.extract_strided_slice %29 {offsets = [0, 108], sizes = [32, 18], strides = [1, 1]} : vector<32x144xbf16> to vector<32x18xbf16>
    %151 = vector.shape_cast %150 : vector<32x18xbf16> to vector<2x16x18xbf16>
    %152 = vector.extract_strided_slice %32 {offsets = [0, 108], sizes = [32, 18], strides = [1, 1]} : vector<32x144xbf16> to vector<32x18xbf16>
    %153 = vector.shape_cast %152 : vector<32x18xbf16> to vector<2x16x18xbf16>
    %154 = vector.extract_strided_slice %35 {offsets = [0, 108], sizes = [32, 18], strides = [1, 1]} : vector<32x144xbf16> to vector<32x18xbf16>
    %155 = vector.shape_cast %154 : vector<32x18xbf16> to vector<2x16x18xbf16>
    "tpu.trace_start"() <{level = 10 : i32, message = "cqd,ckd->cqk"}> : () -> ()
    %cst_45 = arith.constant dense<0.000000e+00> : vector<2x16x16xf32>
    %156 = tpu.matmul %151, %153, %cst_45 {dimension_numbers = #tpu.dot_dimension_numbers<[2], [2], [1], [1], [0, 0, 0, 1, 1, 1], [0], [0]>} : vector<2x16x18xbf16>, vector<2x16x18xbf16>, vector<2x16x16xf32> -> vector<2x16x16xf32>
    "tpu.trace_stop"() : () -> ()
    %cst_46 = arith.constant dense<0xFF800000> : vector<2x16xf32>
    %157 = vector.multi_reduction <maximumf>, %156, %cst_46 [2] : vector<2x16x16xf32> to vector<2x16xf32>
    %158 = vector.shape_cast %157 : vector<2x16xf32> to vector<2x16x1xf32>
    %159 = vector.broadcast %158 : vector<2x16x1xf32> to vector<2x16x16xf32>
    %160 = arith.subf %156, %159 : vector<2x16x16xf32>
    %161 = math.exp %160 : vector<2x16x16xf32>
    %cst_47 = arith.constant dense<0.000000e+00> : vector<2x16xf32>
    %162 = vector.multi_reduction <add>, %161, %cst_47 [2] : vector<2x16x16xf32> to vector<2x16xf32>
    %163 = vector.shape_cast %162 : vector<2x16xf32> to vector<2x16x1xf32>
    %164 = vector.broadcast %163 : vector<2x16x1xf32> to vector<2x16x16xf32>
    %165 = arith.divf %161, %164 : vector<2x16x16xf32>
    %166 = arith.truncf %165 : vector<2x16x16xf32> to vector<2x16x16xbf16>
    "tpu.trace_start"() <{level = 10 : i32, message = "cqk,ckd->cqd"}> : () -> ()
    %cst_48 = arith.constant dense<0.000000e+00> : vector<2x16x18xf32>
    %167 = tpu.matmul %166, %155, %cst_48 {dimension_numbers = #tpu.dot_dimension_numbers<[2], [1], [1], [2], [0, 0, 0, 1, 1, 2], [0], [0]>} : vector<2x16x16xbf16>, vector<2x16x18xbf16>, vector<2x16x18xf32> -> vector<2x16x18xf32>
    "tpu.trace_stop"() : () -> ()
    %168 = vector.shape_cast %167 : vector<2x16x18xf32> to vector<32x18xf32>
    %169 = vector.extract_strided_slice %29 {offsets = [0, 126], sizes = [32, 18], strides = [1, 1]} : vector<32x144xbf16> to vector<32x18xbf16>
    %170 = vector.shape_cast %169 : vector<32x18xbf16> to vector<2x16x18xbf16>
    %171 = vector.extract_strided_slice %32 {offsets = [0, 126], sizes = [32, 18], strides = [1, 1]} : vector<32x144xbf16> to vector<32x18xbf16>
    %172 = vector.shape_cast %171 : vector<32x18xbf16> to vector<2x16x18xbf16>
    %173 = vector.extract_strided_slice %35 {offsets = [0, 126], sizes = [32, 18], strides = [1, 1]} : vector<32x144xbf16> to vector<32x18xbf16>
    %174 = vector.shape_cast %173 : vector<32x18xbf16> to vector<2x16x18xbf16>
    "tpu.trace_start"() <{level = 10 : i32, message = "cqd,ckd->cqk"}> : () -> ()
    %cst_49 = arith.constant dense<0.000000e+00> : vector<2x16x16xf32>
    %175 = tpu.matmul %170, %172, %cst_49 {dimension_numbers = #tpu.dot_dimension_numbers<[2], [2], [1], [1], [0, 0, 0, 1, 1, 1], [0], [0]>} : vector<2x16x18xbf16>, vector<2x16x18xbf16>, vector<2x16x16xf32> -> vector<2x16x16xf32>
    "tpu.trace_stop"() : () -> ()
    %cst_50 = arith.constant dense<0xFF800000> : vector<2x16xf32>
    %176 = vector.multi_reduction <maximumf>, %175, %cst_50 [2] : vector<2x16x16xf32> to vector<2x16xf32>
    %177 = vector.shape_cast %176 : vector<2x16xf32> to vector<2x16x1xf32>
    %178 = vector.broadcast %177 : vector<2x16x1xf32> to vector<2x16x16xf32>
    %179 = arith.subf %175, %178 : vector<2x16x16xf32>
    %180 = math.exp %179 : vector<2x16x16xf32>
    %cst_51 = arith.constant dense<0.000000e+00> : vector<2x16xf32>
    %181 = vector.multi_reduction <add>, %180, %cst_51 [2] : vector<2x16x16xf32> to vector<2x16xf32>
    %182 = vector.shape_cast %181 : vector<2x16xf32> to vector<2x16x1xf32>
    %183 = vector.broadcast %182 : vector<2x16x1xf32> to vector<2x16x16xf32>
    %184 = arith.divf %180, %183 : vector<2x16x16xf32>
    %185 = arith.truncf %184 : vector<2x16x16xf32> to vector<2x16x16xbf16>
    "tpu.trace_start"() <{level = 10 : i32, message = "cqk,ckd->cqd"}> : () -> ()
    %cst_52 = arith.constant dense<0.000000e+00> : vector<2x16x18xf32>
    %186 = tpu.matmul %185, %174, %cst_52 {dimension_numbers = #tpu.dot_dimension_numbers<[2], [1], [1], [2], [0, 0, 0, 1, 1, 2], [0], [0]>} : vector<2x16x16xbf16>, vector<2x16x18xbf16>, vector<2x16x18xf32> -> vector<2x16x18xf32>
    "tpu.trace_stop"() : () -> ()
    %187 = vector.shape_cast %186 : vector<2x16x18xf32> to vector<32x18xf32>
    %188 = tpu.concatenate %54, %73, %92, %111, %130, %149, %168, %187 in 1 : vector<32x18xf32>, vector<32x18xf32>, vector<32x18xf32>, vector<32x18xf32>, vector<32x18xf32>, vector<32x18xf32>, vector<32x18xf32>, vector<32x18xf32> -> vector<32x144xf32>
    %189 = arith.truncf %188 : vector<32x144xf32> to vector<32x144xbf16>
    %c0_53 = arith.constant 0 : index
    %c0_54 = arith.constant 0 : index
    %190 = vector.load %arg8[%c0_53, %c0_54] : memref<144x288xbf16, #tpu.memory_space<vmem>>, vector<144x288xbf16>
    %cst_55 = arith.constant dense<0.000000e+00> : vector<32x288xf32>
    %191 = tpu.matmul %189, %190, %cst_55 {dimension_numbers = #tpu.dot_dimension_numbers<[1], [0], [0], [1], [0, 0, 1, 1], [], []>} : vector<32x144xbf16>, vector<144x288xbf16>, vector<32x288xf32> -> vector<32x288xf32>
    %c0_56 = arith.constant 0 : index
    %c0_57 = arith.constant 0 : index
    %192 = vector.load %arg9[%c0_56, %c0_57] : memref<1x288xf32, #tpu.memory_space<vmem>>, vector<1x288xf32>
    %193 = vector.broadcast %192 : vector<1x288xf32> to vector<32x288xf32>
    %194 = arith.addf %191, %193 : vector<32x288xf32>
    %195 = arith.addf %0, %194 : vector<32x288xf32>
    %c0_58 = arith.constant 0 : index
    %c0_59 = arith.constant 0 : index
    %196 = vector.load %arg10[%c0_58, %c0_59] : memref<1x288xf32, #tpu.memory_space<vmem>>, vector<1x288xf32>
    %c0_60 = arith.constant 0 : index
    %c0_61 = arith.constant 0 : index
    %197 = vector.load %arg11[%c0_60, %c0_61] : memref<1x288xf32, #tpu.memory_space<vmem>>, vector<1x288xf32>
    %cst_62 = arith.constant dense<0.000000e+00> : vector<32xf32>
    %198 = vector.multi_reduction <add>, %195, %cst_62 [1] : vector<32x288xf32> to vector<32xf32>
    %199 = vector.shape_cast %198 : vector<32xf32> to vector<32x1xf32>
    %cst_63 = arith.constant 2.880000e+02 : f32
    %200 = vector.broadcast %cst_63 : f32 to vector<32x1xf32>
    %201 = arith.divf %199, %200 : vector<32x1xf32>
    %202 = vector.broadcast %201 : vector<32x1xf32> to vector<32x288xf32>
    %203 = arith.subf %195, %202 : vector<32x288xf32>
    %204 = arith.mulf %203, %203 : vector<32x288xf32>
    %cst_64 = arith.constant dense<0.000000e+00> : vector<32xf32>
    %205 = vector.multi_reduction <add>, %204, %cst_64 [1] : vector<32x288xf32> to vector<32xf32>
    %206 = vector.shape_cast %205 : vector<32xf32> to vector<32x1xf32>
    %cst_65 = arith.constant 2.880000e+02 : f32
    %207 = vector.broadcast %cst_65 : f32 to vector<32x1xf32>
    %208 = arith.divf %206, %207 : vector<32x1xf32>
    %cst_66 = arith.constant 9.99999974E-6 : f32
    %209 = vector.broadcast %cst_66 : f32 to vector<32x1xf32>
    %210 = arith.addf %208, %209 : vector<32x1xf32>
    %211 = math.rsqrt %210 : vector<32x1xf32>
    %212 = vector.broadcast %211 : vector<32x1xf32> to vector<32x288xf32>
    %213 = arith.mulf %203, %212 : vector<32x288xf32>
    %214 = vector.broadcast %196 : vector<1x288xf32> to vector<32x288xf32>
    %215 = arith.mulf %213, %214 : vector<32x288xf32>
    %216 = vector.broadcast %197 : vector<1x288xf32> to vector<32x288xf32>
    %217 = arith.addf %215, %216 : vector<32x288xf32>
    %218 = arith.truncf %217 : vector<32x288xf32> to vector<32x288xbf16>
    %c0_67 = arith.constant 0 : index
    %c0_68 = arith.constant 0 : index
    %219 = vector.load %arg12[%c0_67, %c0_68] : memref<288x72xbf16, #tpu.memory_space<vmem>>, vector<288x72xbf16>
    %cst_69 = arith.constant dense<0.000000e+00> : vector<32x72xf32>
    %220 = tpu.matmul %218, %219, %cst_69 {dimension_numbers = #tpu.dot_dimension_numbers<[1], [0], [0], [1], [0, 0, 1, 1], [], []>} : vector<32x288xbf16>, vector<288x72xbf16>, vector<32x72xf32> -> vector<32x72xf32>
    %c0_70 = arith.constant 0 : index
    %c0_71 = arith.constant 0 : index
    %221 = vector.load %arg13[%c0_70, %c0_71] : memref<1x72xf32, #tpu.memory_space<vmem>>, vector<1x72xf32>
    %222 = vector.broadcast %221 : vector<1x72xf32> to vector<32x72xf32>
    %223 = arith.addf %220, %222 : vector<32x72xf32>
    %cst_72 = arith.constant 2.000000e+01 : f32
    %224 = vector.broadcast %cst_72 : f32 to vector<32x72xf32>
    %225 = arith.cmpf ogt, %223, %224 : vector<32x72xf32>
    %cst_73 = arith.constant 2.000000e+01 : f32
    %226 = vector.broadcast %cst_73 : f32 to vector<32x72xf32>
    %227 = arith.minimumf %223, %226 : vector<32x72xf32>
    %228 = math.exp %227 : vector<32x72xf32>
    %229 = math.log1p %228 : vector<32x72xf32>
    %230 = arith.select %225, %223, %229 : vector<32x72xi1>, vector<32x72xf32>
    %231 = math.tanh %230 : vector<32x72xf32>
    %232 = arith.mulf %223, %231 : vector<32x72xf32>
    %233 = arith.truncf %232 : vector<32x72xf32> to vector<32x72xbf16>
    %c0_74 = arith.constant 0 : index
    %c0_75 = arith.constant 0 : index
    %234 = vector.load %arg14[%c0_74, %c0_75] : memref<72x288xbf16, #tpu.memory_space<vmem>>, vector<72x288xbf16>
    %cst_76 = arith.constant dense<0.000000e+00> : vector<32x288xf32>
    %235 = tpu.matmul %233, %234, %cst_76 {dimension_numbers = #tpu.dot_dimension_numbers<[1], [0], [0], [1], [0, 0, 1, 1], [], []>} : vector<32x72xbf16>, vector<72x288xbf16>, vector<32x288xf32> -> vector<32x288xf32>
    %c0_77 = arith.constant 0 : index
    %c0_78 = arith.constant 0 : index
    %236 = vector.load %arg15[%c0_77, %c0_78] : memref<1x288xf32, #tpu.memory_space<vmem>>, vector<1x288xf32>
    %237 = vector.broadcast %236 : vector<1x288xf32> to vector<32x288xf32>
    %238 = arith.addf %235, %237 : vector<32x288xf32>
    %239 = arith.addf %195, %238 : vector<32x288xf32>
    %c0_79 = arith.constant 0 : index
    %c0_80 = arith.constant 0 : index
    %240 = vector.load %arg16[%c0_79, %c0_80] : memref<32x288xf32, #tpu.memory_space<vmem>>, vector<32x288xf32>
    tpu.vector_store %arg16[%c0_79, %c0_80], %239 {strides = array<i32>} : memref<32x288xf32, #tpu.memory_space<vmem>>, vector<32x288xf32>,
    return
  }
  func.func @transform_0(%arg0: i32) -> (i32, i32) {
    %c0_i32 = arith.constant 0 : i32
    %c0_i32_0 = arith.constant 0 : i32
    return %arg0, %c0_i32 : i32, i32
  }
  func.func @transform_1(%arg0: i32) -> (i32, i32) {
    %c0_i32 = arith.constant 0 : i32
    %c0_i32_0 = arith.constant 0 : i32
    %c0_i32_1 = arith.constant 0 : i32
    return %c0_i32, %c0_i32_0 : i32, i32
  }
  func.func @transform_2(%arg0: i32) -> (i32, i32) {
    %c0_i32 = arith.constant 0 : i32
    %c0_i32_0 = arith.constant 0 : i32
    %c0_i32_1 = arith.constant 0 : i32
    return %c0_i32, %c0_i32_0 : i32, i32
  }
  func.func @transform_3(%arg0: i32) -> (i32, i32) {
    %c0_i32 = arith.constant 0 : i32
    %c0_i32_0 = arith.constant 0 : i32
    %c0_i32_1 = arith.constant 0 : i32
    return %c0_i32, %c0_i32_0 : i32, i32
  }
  func.func @transform_4(%arg0: i32) -> (i32, i32) {
    %c0_i32 = arith.constant 0 : i32
    %c0_i32_0 = arith.constant 0 : i32
    %c0_i32_1 = arith.constant 0 : i32
    return %c0_i32, %c0_i32_0 : i32, i32
  }
  func.func @transform_5(%arg0: i32) -> (i32, i32) {
    %c0_i32 = arith.constant 0 : i32
    %c0_i32_0 = arith.constant 0 : i32
    %c0_i32_1 = arith.constant 0 : i32
    return %c0_i32, %c0_i32_0 : i32, i32
  }
  func.func @transform_6(%arg0: i32) -> (i32, i32) {
    %c0_i32 = arith.constant 0 : i32
    %c0_i32_0 = arith.constant 0 : i32
    %c0_i32_1 = arith.constant 0 : i32
    return %c0_i32, %c0_i32_0 : i32, i32
  }
  func.func @transform_7(%arg0: i32) -> (i32, i32) {
    %c0_i32 = arith.constant 0 : i32
    %c0_i32_0 = arith.constant 0 : i32
    %c0_i32_1 = arith.constant 0 : i32
    return %c0_i32, %c0_i32_0 : i32, i32
  }
  func.func @transform_8(%arg0: i32) -> (i32, i32) {
    %c0_i32 = arith.constant 0 : i32
    %c0_i32_0 = arith.constant 0 : i32
    %c0_i32_1 = arith.constant 0 : i32
    return %c0_i32, %c0_i32_0 : i32, i32
  }
  func.func @transform_9(%arg0: i32) -> (i32, i32) {
    %c0_i32 = arith.constant 0 : i32
    %c0_i32_0 = arith.constant 0 : i32
    %c0_i32_1 = arith.constant 0 : i32
    return %c0_i32, %c0_i32_0 : i32, i32
  }
  func.func @transform_10(%arg0: i32) -> (i32, i32) {
    %c0_i32 = arith.constant 0 : i32
    %c0_i32_0 = arith.constant 0 : i32
    %c0_i32_1 = arith.constant 0 : i32
    return %c0_i32, %c0_i32_0 : i32, i32
  }
  func.func @transform_11(%arg0: i32) -> (i32, i32) {
    %c0_i32 = arith.constant 0 : i32
    %c0_i32_0 = arith.constant 0 : i32
    %c0_i32_1 = arith.constant 0 : i32
    return %c0_i32, %c0_i32_0 : i32, i32
  }
  func.func @transform_12(%arg0: i32) -> (i32, i32) {
    %c0_i32 = arith.constant 0 : i32
    %c0_i32_0 = arith.constant 0 : i32
    %c0_i32_1 = arith.constant 0 : i32
    return %c0_i32, %c0_i32_0 : i32, i32
  }
  func.func @transform_13(%arg0: i32) -> (i32, i32) {
    %c0_i32 = arith.constant 0 : i32
    %c0_i32_0 = arith.constant 0 : i32
    %c0_i32_1 = arith.constant 0 : i32
    return %c0_i32, %c0_i32_0 : i32, i32
  }
  func.func @transform_14(%arg0: i32) -> (i32, i32) {
    %c0_i32 = arith.constant 0 : i32
    %c0_i32_0 = arith.constant 0 : i32
    %c0_i32_1 = arith.constant 0 : i32
    return %c0_i32, %c0_i32_0 : i32, i32
  }
  func.func @transform_15(%arg0: i32) -> (i32, i32) {
    %c0_i32 = arith.constant 0 : i32
    %c0_i32_0 = arith.constant 0 : i32
    return %arg0, %c0_i32 : i32, i32
  }
}

</mosaic_0001>

<bundles_post_ra>
// kernel: tpu_custom_call.1
= control target key start
LH: loop header
LB: loop body
LE: loop exit
PB: predicated region body
PF: predicated region fallthrough
CT: control target
= control target key end

     0   :  { %s5841_s18 = smov 0   ;;  %s7245_s0 = inlined_call_operand.vmem [shape: f32[128,288], index: 0, kind: input, shape index: {}]   ;;  %s7246_s1 = inlined_call_operand.vmem [shape: f32[1,288], index: 1, kind: input, shape index: {}]   ;;  %s7247_s2 = inlined_call_operand.vmem [shape: f32[1,288], index: 2, kind: input, shape index: {}]   ;;  %s7248_s3 = inlined_call_operand.vmem [shape: bf16[288,144], index: 3, kind: input, shape index: {}]   ;;  %s7249_s4 = inlined_call_operand.vmem [shape: bf16[144,144], index: 4, kind: input, shape index: {}]   ;;  %s7250_s5 = inlined_call_operand.vmem [shape: bf16[144,144], index: 5, kind: input, shape index: {}]   ;;  %s7251_s6 = inlined_call_operand.vmem [shape: bf16[144,144], index: 6, kind: input, shape index: {}]   ;;  %s7252_s7 = inlined_call_operand.vmem [shape: bf16[144,288], index: 7, kind: input, shape index: {}]   ;;  %s7253_s8 = inlined_call_operand.vmem [shape: f32[1,288], index: 8, kind: input, shape index: {}]   ;;  %s7254_s9 = inlined_call_operand.vmem [shape: f32[1,288], index: 9, kind: input, shape index: {}]   ;;  %s7255_s10 = inlined_call_operand.vmem [shape: f32[1,288], index: 10, kind: input, shape index: {}]   ;;  %s7256_s11 = inlined_call_operand.vmem [shape: bf16[288,72], index: 11, kind: input, shape index: {}]   ;;  %s7257_s12 = inlined_call_operand.vmem [shape: f32[1,72], index: 12, kind: input, shape index: {}]   ;;  %s7258_s13 = inlined_call_operand.vmem [shape: bf16[72,288], index: 13, kind: input, shape index: {}]   ;;  %s7259_s14 = inlined_call_operand.vmem [shape: f32[1,288], index: 14, kind: input, shape index: {}]   ;;  %s7260_s15 = inlined_call_operand.vmem [shape: f32[128,288], index: 15, kind: output, shape index: {}]  }
   0x1 LB: > { %s4713_s19 = sadd.s32 4294967295, %s5742_s18   ;;  %p4717_p0 = scmp.ge.s32.totalorder %s5742_s18, 1  ;;  %s5742_s18 = sphi %s5841_s18, %s25_s18  }
   0x2   : > { %p439_p1 = scmp.lt.s32.totalorder %s5742_s18, 5 }
   0x4   : > { %p440_p2 = pnand %p4717_p0, %p439_p1 }
   0x5   : > { %s4718_s20 = sshll.u32 (!%p440_p2), %s4713_s19, 2  ;;  %vm519_vm0 = vcmask (!%p440_p2), 261120   ;;  %v5348_v24 = vld [vmem:[%s7248_s3 + $0x4] ss:$8 sps:$4 sm:$0xff] (!%p440_p2)   ;;  %v5350_v25 = vld [vmem:[%s7248_s3] ss:$8 sps:$4 sm:$0xff] (!%p440_p2)  }
   0x6   : > { %443 = sbr.rel (%p440_p2) target bundleno = 6766 (0x1a6e), region = 80  ;;  %p490_p3 = scmp.lt.s32.totalorder (!%p440_p2), %s4718_s20, 15  ;;  %v5351_v26 = vld [vmem:[%s7248_s3 + $0x14] ss:$8 sps:$4 sm:$0xff] (!%p440_p2)   ;;  %896 = vmatprep.subr.bf16.mxu0 (!%p440_p2), %v5348_v24  ;;  %v5353_v27 = vld [vmem:[%s7248_s3 + $0x10] ss:$8 sps:$4 sm:$0xff] (!%p440_p2)  }
   0x7   : > { %897 = vmatpush1.bf16.msra.mxu0 (!%p440_p2), %v5350_v25  ;;  %v5354_v28 = vld [vmem:[%s7248_s3 + $0x24] ss:$8 sps:$4 sm:$0xff] (!%p440_p2)   ;;  %v5356_v29 = vld [vmem:[%s7248_s3 + $0x20] ss:$8 sps:$4 sm:$0xff] (!%p440_p2)   ;;  %v5357_v30 = vld [vmem:[%s7248_s3 + $0x34] ss:$8 sps:$4 sm:$0xff] (!%p440_p2)  }
   0x8   : > { %898 = vmatprep.subr.bf16.mxu0 (!%p440_p2), %v5351_v26  ;;  %v5359_v31 = vld [vmem:[%s7248_s3 + $0x30] ss:$8 sps:$4 sm:$0xff] (!%p440_p2)   ;;  %v5360_v32 = vld [vmem:[%s7248_s3 + $0x44] ss:$8 sps:$4 sm:$0xff] (!%p440_p2)   ;;  %v5362_v33 = vld [vmem:[%s7248_s3 + $0x40] ss:$8 sps:$4 sm:$0xff] (!%p440_p2)  }
   0x9   : > { %v5363_v34 = vld [vmem:[%s7248_s3 + $0x54] ss:$8 sps:$4 sm:$0xff] (!%p440_p2)   ;;  %v5365_v35 = vld [vmem:[%s7248_s3 + $0x50] ss:$8 sps:$4 sm:$0xff] (!%p440_p2)   ;;  %v5366_v36 = vld [vmem:[%s7248_s3 + $0x64] ss:$8 sps:$4 sm:$0xff] (!%p440_p2)  }
   0xa   : > { %v5368_v37 = vld [vmem:[%s7248_s3 + $0x60] ss:$8 sps:$4 sm:$0xff] (!%p440_p2)   ;;  %v5369_v38 = vld [vmem:[%s7248_s3 + $0x74] ss:$8 sps:$4 sm:$0xff] (!%p440_p2)   ;;  %v5371_v39 = vld [vmem:[%s7248_s3 + $0x70] ss:$8 sps:$4 sm:$0xff] (!%p440_p2)  }
   0xb   : > { %899 = vmatpush1.bf16.msra.mxu0 (!%p440_p2), %v5353_v27  ;;  %v5372_v40 = vld [vmem:[%s7248_s3 + $0x84] ss:$8 sps:$4 sm:$0xff] (!%p440_p2)   ;;  %v5374_v41 = vld [vmem:[%s7248_s3 + $0x80] ss:$8 sps:$4 sm:$0xff] (!%p440_p2)   ;;  %v5381_v26 = vld [vmem:[%s7248_s3 + $0xb4] ss:$8 sps:$4 sm:$0xff] (!%p440_p2)  }
   0xc   : > { %900 = vmatprep.subr.bf16.mxu0 (!%p440_p2), %v5354_v28  ;;  %v5378_v24 = vld [vmem:[%s7248_s3 + $0xa4] ss:$8 sps:$4 sm:$0xff] (!%p440_p2)   ;;  %v5380_v25 = vld [vmem:[%s7248_s3 + $0xa0] ss:$8 sps:$4 sm:$0xff] (!%p440_p2)   ;;  %v5383_v27 = vld [vmem:[%s7248_s3 + $0xb0] ss:$8 sps:$4 sm:$0xff] (!%p440_p2)  }
   0xd   : > { %s7286_s20 = smov (!%p490_p3, %s4718_s20), 15  ;;  %v5384_v28 = vld [vmem:[%s7248_s3 + $0xc4] ss:$8 sps:$4 sm:$0xff]   ;;  %vm1114_vm1 = vcmask 130048   ;;  %vm5746_vm2 = vmmov 0   ;;  %vm1508_vm3 = vcmask 146432  }
   0xe   : > { %s7265_s21 = smul.u32 24, %s7286_s20  ;;  %s5747_s19 = smov 110   ;;  %vm3200_vm4 = vcmask 15360   ;;  %vm3578_vm5 = vcmask 293888   ;;  %vm3583_vm6 = vcmask 441344   ;;  %vm3588_vm7 = vcmask 588800  }
   0xf   : > { %901 = vmatpush1.bf16.msra.mxu0 %v5356_v29  ;;  %v5386_v29 = vld [vmem:[%s7248_s3 + $0xc0] ss:$8 sps:$4 sm:$0xff]   ;;  %s5748_s22 = smov 92   ;;  %s5749_s23 = smov 74   ;;  %vm3593_vm8 = vcmask 736256   ;;  %vm3598_vm9 = vcmask 883712  }
  0x10   : > { %s5857_s24 = scalar_lea.vmem %s7245_s0, %s7265_s21  ;;  %902 = vmatprep.subr.bf16.mxu0 %v5357_v30  ;;  %v5387_v30 = vld [vmem:[%s7248_s3 + $0xd4] ss:$8 sps:$4 sm:$0xff]   ;;  %s5750_s25 = smov 56   ;;  %vm3603_vm10 = vcmask 1031168   ;;  %vm4519_vm11 = vcmask 1043456  }
  0x11   : > { %v5860_v0 = vld [vmem:[%s5857_s24] sm:$0xff]  ;;  %v5863_v1 = vld [vmem:[%s5857_s24 + $0x8] sm:$0xff]  ;;  %v5866_v2 = vld [vmem:[%s5857_s24 + $0x10] sm:$0xff]  ;;  %s5751_s26 = smov 38   ;;  %s5752_s27 = smov 20  }
  0x12   : > { %v518_v3 = vadd.f32 %v5863_v1, %v5860_v0  ;;  %v520_v4 = vsel %vm519_vm0, %v5866_v2, 0.0  ;;  %v5873_v5 = vld [vmem:[%s5857_s24 + $0x30] sm:$0xff]  ;;  %v5876_v6 = vld [vmem:[%s5857_s24 + $0x38] sm:$0xff]  ;;  %v5879_v7 = vld [vmem:[%s5857_s24 + $0x40] sm:$0xff]  ;;  %s5753_s28 = smov 2   ;;  %s5754_s29 = smov 36  }
  0x13   : > { %v529_v8 = vadd.f32 %v5876_v6, %v5873_v5  ;;  %v530_v9 = vsel %vm519_vm0, %v5879_v7, 0.0  ;;  %v5886_v10 = vld [vmem:[%s5857_s24 + $0x18] sm:$0xff]  ;;  %v5889_v11 = vld [vmem:[%s5857_s24 + $0x20] sm:$0xff]  ;;  %v5892_v12 = vld [vmem:[%s5857_s24 + $0x28] sm:$0xff]  ;;  %903 = vmatpush1.bf16.msra.mxu0 %v5359_v31  ;;  %s5755_s30 = smov 18   ;;  %s5756_s16 = smov 72  }
  0x14   : > { %v521_v13 = vadd.f32 %v520_v4, %v518_v3  ;;  %v524_v14 = vadd.f32 %v5889_v11, %v5886_v10  ;;  %v525_v15 = vsel %vm519_vm0, %v5892_v12, 0.0  ;;  %v5899_v16 = vld [vmem:[%s5857_s24 + $0x48] sm:$0xff]  ;;  %v5902_v17 = vld [vmem:[%s5857_s24 + $0x50] sm:$0xff]  ;;  %v5905_v18 = vld [vmem:[%s5857_s24 + $0x58] sm:$0xff]  ;;  %904 = vmatprep.subr.bf16.mxu0 %v5360_v32  ;;  %s5757_s17 = smov 54  }
  0x15   : > { %v531_v19 = vadd.f32 %v530_v9, %v529_v8  ;;  %v534_v20 = vadd.f32 %v5902_v17, %v5899_v16  ;;  %v535_v21 = vsel %vm519_vm0, %v5905_v18, 0.0  ;;  %v5389_v31 = vld [vmem:[%s7248_s3 + $0xd0] ss:$8 sps:$4 sm:$0xff]   ;;  %v5390_v32 = vld [vmem:[%s7248_s3 + $0xe4] ss:$8 sps:$4 sm:$0xff]  }
  0x16   : > { %522 = vadd.xlane.f32.xlu0 %v521_v13  ;;  %v526_v22 = vadd.f32 %v525_v15, %v524_v14 }
  0x17   : > { %532 = vadd.xlane.f32.xlu1 %v531_v19  ;;  %v536_v23 = vadd.f32 %v535_v21, %v534_v20  ;;  %905 = vmatpush1.bf16.msra.mxu0 %v5362_v33  ;;  %v5392_v33 = vld [vmem:[%s7248_s3 + $0xe0] ss:$8 sps:$4 sm:$0xff]  }
  0x18   : > { %906 = vmatprep.subr.bf16.mxu0 %v5363_v34  ;;  %v5393_v34 = vld [vmem:[%s7248_s3 + $0xf4] ss:$8 sps:$4 sm:$0xff]  }
  0x1a   : > { %527 = vadd.xlane.f32.xlu0 %v526_v22  ;;  %v5375_v22 = vld [vmem:[%s7248_s3 + $0x94] ss:$8 sps:$4 sm:$0xff]  }
  0x1b   : > { %537 = vadd.xlane.f32.xlu1 %v536_v23  ;;  %907 = vmatpush1.bf16.msra.mxu0 %v5365_v35  ;;  %v5377_v23 = vld [vmem:[%s7248_s3 + $0x90] ss:$8 sps:$4 sm:$0xff]  }
  0x1c   : > { %908 = vmatprep.subr.bf16.mxu0 %v5366_v36  ;;  %v5395_v35 = vld [vmem:[%s7248_s3 + $0xf0] ss:$8 sps:$4 sm:$0xff]   ;;  %v5398_v36 = vld [vmem:[%s7248_s3 + $0x104] ss:$8 sps:$4 sm:$0xff]  }
  0x1f   : > { %909 = vmatpush1.bf16.msra.mxu0 %v5368_v37  ;;  %v5402_v37 = vld [vmem:[%s7249_s4 + $0x4] ss:$8 sps:$4 sm:$0xff]  }
  0x20   : > { %910 = vmatprep.subr.bf16.mxu0 %v5369_v38  ;;  %v5404_v38 = vld [vmem:[%s7249_s4] ss:$8 sps:$4 sm:$0xff]   ;;  %1121 = vmatprep.subr.bf16.mxu1 %v5402_v37 }
  0x21   : > { %1122 = vmatpush1.bf16.msra.mxu1 %v5404_v38 }
  0x23   : > { %911 = vmatpush1.bf16.msra.mxu0 %v5371_v39  ;;  %v5405_v39 = vld [vmem:[%s7249_s4 + $0x14] ss:$8 sps:$4 sm:$0xff]  }
  0x24   : > { %912 = vmatprep.subr.bf16.mxu0 %v5372_v40  ;;  %v5407_v40 = vld [vmem:[%s7249_s4 + $0x10] ss:$8 sps:$4 sm:$0xff]   ;;  %1123 = vmatprep.subr.bf16.mxu1 %v5405_v39 }
  0x25   : > { %1124 = vmatpush1.bf16.msra.mxu1 %v5407_v40 }
  0x27   : > { %913 = vmatpush1.bf16.msra.mxu0 %v5374_v41  ;;  %v5408_v41 = vld [vmem:[%s7249_s4 + $0x24] ss:$8 sps:$4 sm:$0xff]  }
  0x28   : > { %914 = vmatprep.subr.bf16.mxu0 %v5375_v22  ;;  %1125 = vmatprep.subr.bf16.mxu1 %v5408_v41 }
  0x2b   : > { %915 = vmatpush1.bf16.msra.mxu0 %v5377_v23 }
  0x2c   : > { %916 = vmatprep.subr.bf16.mxu0 %v5378_v24 }
  0x2f   : > { %917 = vmatpush1.bf16.msra.mxu0 %v5380_v25 }
  0x30   : > { %918 = vmatprep.subr.bf16.mxu0 %v5381_v26 }
  0x33   : > { %919 = vmatpush1.bf16.msra.mxu0 %v5383_v27 }
  0x34   : > { %920 = vmatprep.subr.bf16.mxu0 %v5384_v28 }
  0x37   : > { %921 = vmatpush1.bf16.msra.mxu0 %v5386_v29 }
  0x38   : > { %922 = vmatprep.subr.bf16.mxu0 %v5387_v30 }
  0x3b   : > { %923 = vmatpush1.bf16.msra.mxu0 %v5389_v31 }
  0x3c   : > { %924 = vmatprep.subr.bf16.mxu0 %v5390_v32 }
  0x3f   : > { %925 = vmatpush1.bf16.msra.mxu0 %v5392_v33 }
  0x40   : > { %926 = vmatprep.subr.bf16.mxu0 %v5393_v34 }
  0x43   : > { %927 = vmatpush1.bf16.msra.mxu0 %v5395_v35 }
  0x44   : > { %949 = vmatprep.subr.bf16.mxu0 %v5398_v36 }
  0xa3   : > { %v523_v42 = vpop.xlane.xlu0 %522 }
  0xa4   : > { %v540_v43 = vmul.f32 0.0034722222, %v523_v42  ;;  %v533_v44 = vpop.xlane.xlu1 %532  ;;  %v5410_v42 = vld [vmem:[%s7249_s4 + $0x20] ss:$8 sps:$4 sm:$0xff]  }
  0xa5   : > { %v542_v45 = vmul.f32 0.0034722222, %v533_v44  ;;  %1126 = vmatpush1.bf16.msra.mxu1 %v5410_v42  ;;  %v5413_v44 = vld [vmem:[%s7249_s4 + $0x30] ss:$8 sps:$4 sm:$0xff]  }
  0xa6   : > { %v5966_v46 = vsub.f32 %v5860_v0, %v540_v43  ;;  %v5969_v47 = vsub.f32 %v5863_v1, %v540_v43  ;;  %v5972_v48 = vsub.f32 %v5866_v2, %v540_v43  ;;  %v5411_v43 = vld [vmem:[%s7249_s4 + $0x34] ss:$8 sps:$4 sm:$0xff]  }
  0xa7   : > { %v5975_v49 = vsub.f32 %v5873_v5, %v542_v45  ;;  %v5978_v50 = vsub.f32 %v5876_v6, %v542_v45  ;;  %v5981_v51 = vsub.f32 %v5879_v7, %v542_v45  ;;  %v528_v52 = vpop.xlane.xlu0 %527  ;;  %1127 = vmatprep.subr.bf16.mxu1 %v5411_v43  ;;  %v5414_v45 = vld [vmem:[%s7249_s4 + $0x44] ss:$8 sps:$4 sm:$0xff]  }
  0xa8   : > { %v541_v53 = vmul.f32 0.0034722222, %v528_v52  ;;  %v538_v54 = vpop.xlane.xlu1 %537  ;;  %v556_v55 = vmul.f32 %v5966_v46, %v5966_v46  ;;  %v557_v56 = vmul.f32 %v5969_v47, %v5969_v47  ;;  %v558_v57 = vmul.f32 %v5972_v48, %v5972_v48  ;;  %v5416_v52 = vld [vmem:[%s7249_s4 + $0x40] ss:$8 sps:$4 sm:$0xff]  }
  0xa9   : > { %v543_v58 = vmul.f32 0.0034722222, %v538_v54  ;;  %v562_v59 = vmul.f32 %v5975_v49, %v5975_v49  ;;  %v563_v60 = vmul.f32 %v5978_v50, %v5978_v50  ;;  %v564_v61 = vmul.f32 %v5981_v51, %v5981_v51  ;;  %1128 = vmatpush1.bf16.msra.mxu1 %v5413_v44  ;;  %v5419_v54 = vld [vmem:[%s7249_s4 + $0x50] ss:$8 sps:$4 sm:$0xff]   ;;  %v5401_v44 = vld [vmem:[%s7248_s3 + $0x114] ss:$8 sps:$4 sm:$0xff]  }
  0xaa   : > { %v5996_v62 = vsub.f32 %v5886_v10, %v541_v53  ;;  %v5999_v63 = vsub.f32 %v5889_v11, %v541_v53  ;;  %v6002_v0 = vsub.f32 %v5892_v12, %v541_v53  ;;  %v568_v1 = vadd.f32 %v557_v56, %v556_v55  ;;  %1129 = vmatprep.subr.bf16.mxu1 %v5414_v45  ;;  %v5417_v53 = vld [vmem:[%s7249_s4 + $0x54] ss:$8 sps:$4 sm:$0xff]   ;;  %v5420_v55 = vld [vmem:[%s7249_s4 + $0x64] ss:$8 sps:$4 sm:$0xff]   ;;  %v5422_v56 = vld [vmem:[%s7249_s4 + $0x60] ss:$8 sps:$4 sm:$0xff]  }
  0xab   : > { %v6005_v2 = vsub.f32 %v5899_v16, %v543_v58  ;;  %v6008_v3 = vsub.f32 %v5902_v17, %v543_v58  ;;  %v6011_v4 = vsub.f32 %v5905_v18, %v543_v58  ;;  %v569_v5 = vsel %vm519_vm0, %v558_v57, 0.0  ;;  %v5423_v57 = vld [vmem:[%s7249_s4 + $0x74] ss:$8 sps:$4 sm:$0xff]   ;;  %v5425_v58 = vld [vmem:[%s7249_s4 + $0x70] ss:$8 sps:$4 sm:$0xff]  }
  0xac   : > { %v570_v6 = vadd.f32 %v569_v5, %v568_v1  ;;  %v578_v7 = vadd.f32 %v563_v60, %v562_v59  ;;  %v579_v8 = vsel %vm519_vm0, %v564_v61, 0.0  ;;  %v559_v9 = vmul.f32 %v5996_v62, %v5996_v62 }
  0xad   : > { %v560_v10 = vmul.f32 %v5999_v63, %v5999_v63  ;;  %v561_v11 = vmul.f32 %v6002_v0, %v6002_v0  ;;  %v565_v12 = vmul.f32 %v6005_v2, %v6005_v2  ;;  %v566_v13 = vmul.f32 %v6008_v3, %v6008_v3  ;;  %1130 = vmatpush1.bf16.msra.mxu1 %v5416_v52 }
  0xae   : > { %571 = vadd.xlane.f32.xlu0 %v570_v6  ;;  %v580_v14 = vadd.f32 %v579_v8, %v578_v7  ;;  %v567_v15 = vmul.f32 %v6011_v4, %v6011_v4  ;;  %1131 = vmatprep.subr.bf16.mxu1 %v5417_v53  ;;  %v613_v5 = vlaneseq  ;;  %v5399_v53 = vld [vmem:[%s7248_s3 + $0x110] ss:$8 sps:$4 sm:$0xff]  }
  0xaf   : > { %v573_v16 = vadd.f32 %v560_v10, %v559_v9  ;;  %v574_v17 = vsel %vm519_vm0, %v561_v11, 0.0  ;;  %v583_v18 = vadd.f32 %v566_v13, %v565_v12 }
  0xb0   : > { %v584_v19 = vsel %vm519_vm0, %v567_v15, 0.0  ;;  %v614_v11 = vshrl.u32 %v613_v5, 7  ;;  %v7261_v5 = vmov 0  }
  0xb1   : > { %v575_v20 = vadd.f32 %v574_v17, %v573_v16  ;;  %v585_v21 = vadd.f32 %v584_v19, %v583_v18  ;;  %1132 = vmatpush1.bf16.msra.mxu1 %v5419_v54  ;;  %v516_v17 = vld [vmem:[%s7246_s1] sm:$0x7] }
  0xb2   : > { %581 = vadd.xlane.f32.xlu0 %v580_v14  ;;  %1133 = vmatprep.subr.bf16.mxu1 %v5420_v55  ;;  %v6122_v15 = vsub.s32 1, %v614_v11  ;;  %v6124_v16 = vsub.s32 0, %v614_v11  ;;  %v517_v19 = vld [vmem:[%s7247_s2] sm:$0x7] }
  0xb3   : > { %576 = vadd.xlane.f32.xlu1 %v575_v20 }
  0xb4   : > { %v616_v23 = vrot.slane %v516_v17, %v6124_v16  ;;  %v648_v25 = vrot.slane %v517_v19, %v6122_v15  ;;  %v644_v29 = vrot.slane %v517_v19, %v6124_v16 }
  0xb5   : > { %1134 = vmatpush1.bf16.msra.mxu1 %v5422_v56 }
  0xb6   : > { %1135 = vmatprep.subr.bf16.mxu1 %v5423_v57 }
  0xb7   : > { %586 = vadd.xlane.f32.xlu1 %v585_v21  ;;  %v620_v21 = vrot.slane %v516_v17, %v6122_v15 }
  0xb9   : > { %1136 = vmatpush1.bf16.msra.mxu1 %v5425_v58 }
 0x13b   : > { %v572_v59 = vpop.xlane.xlu0 %571 }
 0x13c   : > { %v588_v60 = vmul.f32 0.0034722222, %v572_v59 }
 0x13e   : > { %v592_v61 = vadd.f32 1e-05, %v588_v60 }
 0x13f   : > { %v582_v1 = vpop.xlane.xlu0 %581 }
 0x140   : > { %5556 = vrsqrt.f32 %v592_v61  ;;  %v577_v6 = vpop.xlane.xlu1 %576  ;;  %v590_v7 = vmul.f32 0.0034722222, %v582_v1 }
 0x141   : > { %v589_v8 = vmul.f32 0.0034722222, %v577_v6 }
 0x142   : > { %v594_v9 = vadd.f32 1e-05, %v590_v7 }
 0x143   : > { %v593_v10 = vadd.f32 1e-05, %v589_v8 }
 0x144   : > { %5558 = vrsqrt.f32 %v594_v9  ;;  %v587_v12 = vpop.xlane.xlu1 %586 }
 0x145   : > { %5560 = vrsqrt.f32 %v593_v10  ;;  %v591_v13 = vmul.f32 0.0034722222, %v587_v12 }
 0x147   : > { %v595_v14 = vadd.f32 1e-05, %v591_v13 }
 0x149   : > { %5562 = vrsqrt.f32 %v595_v14  ;;  %v5426_v14 = vld [vmem:[%s7249_s4 + $0x84] ss:$8 sps:$4 sm:$0xff]  }
 0x14a   : > { %v5557_v18 = vpop.eup %5556  ;;  %1137 = vmatprep.subr.bf16.mxu1 %v5426_v14 }
 0x14b   : > { %v601_v20 = vmul.f32 %v5557_v18, %v5969_v47  ;;  %v600_v22 = vmul.f32 %v5557_v18, %v5966_v46  ;;  %v602_v58 = vmul.f32 %v5557_v18, %v5972_v48 }
 0x14d   : > { %v629_v27 = vmul.f32 %v620_v21, %v601_v20  ;;  %v628_v28 = vmul.f32 %v616_v23, %v600_v22 }
 0x14e   : > { %v5559_v24 = vpop.eup %5558 }
 0x14f   : > { %v5561_v26 = vpop.eup %5560  ;;  %v607_v30 = vmul.f32 %v5559_v24, %v5978_v50  ;;  %v657_v46 = vadd.f32 %v648_v25, %v629_v27  ;;  %v656_v35 = vadd.f32 %v644_v29, %v628_v28  ;;  %v606_v41 = vmul.f32 %v5559_v24, %v5975_v49  ;;  %v5437_v28 = vld [vmem:[%s7250_s5 + $0x24] ss:$8 sps:$4 sm:$0xff]  }
 0x150   : > { %v604_v31 = vmul.f32 %v5561_v26, %v5999_v63  ;;  %v603_v47 = vmul.f32 %v5561_v26, %v5996_v62  ;;  %v5396_v62 = vld [vmem:[%s7248_s3 + $0x100] ss:$8 sps:$4 sm:$0xff]   ;;  %v605_v55 = vmul.f32 %v5561_v26, %v6002_v0  ;;  %v608_v8 = vmul.f32 %v5559_v24, %v5981_v51  ;;  %v5434_v24 = vld [vmem:[%s7250_s5 + $0x14] ss:$8 sps:$4 sm:$0xff]   ;;  %v5432_v26 = vld [vmem:[%s7250_s5 + $0x10] ss:$8 sps:$4 sm:$0xff]  }
 0x151   : > { %v635_v36 = vmul.f32 %v620_v21, %v607_v30  ;;  %v5428_v51 = vld [vmem:[%s7249_s4 + $0x80] ss:$8 sps:$4 sm:$0xff]  }
 0x152   : > { %v632_v32 = vmul.f32 %v620_v21, %v604_v31  ;;  %v631_v33 = vmul.f32 %v616_v23, %v603_v47  ;;  %1138 = vmatpush1.bf16.msra.mxu1 %v5428_v51 }
 0x153   : > { %v5563_v34 = vpop.eup %5562  ;;  %v663_v45 = vadd.f32 %v648_v25, %v635_v36  ;;  %v5446_v36 = vld [vmem:[%s7250_s5 + $0x54] ss:$8 sps:$4 sm:$0xff]  }
 0x154   : > { %v660_v37 = vadd.f32 %v648_v25, %v632_v32  ;;  %v659_v38 = vadd.f32 %v644_v29, %v631_v33  ;;  %v610_v39 = vmul.f32 %v5563_v34, %v6008_v3  ;;  %v609_v40 = vmul.f32 %v5563_v34, %v6005_v2  ;;  %v5435_v32 = vld [vmem:[%s7250_s5 + $0x20] ss:$8 sps:$4 sm:$0xff]   ;;  %v5440_v33 = vld [vmem:[%s7250_s5 + $0x34] ss:$8 sps:$4 sm:$0xff]  }
 0x155   : > { %v6150_v3 = vsub.s32 2, %v614_v11  ;;  %v634_v2 = vmul.f32 %v616_v23, %v606_v41  ;;  %v611_v7 = vmul.f32 %v5563_v34, %v6011_v4  ;;  %v5431_v4 = vld [vmem:[%s7250_s5 + $0x4] ss:$8 sps:$4 sm:$0xff]   ;;  %v5438_v34 = vld [vmem:[%s7250_s5 + $0x30] ss:$8 sps:$4 sm:$0xff]  }
 0x156   : > { %v669_v42 = vpack.c.bf16 %v660_v37, %v657_v46  ;;  %v668_v50 = vpack.c.bf16 %v659_v38, %v656_v35  ;;  %v638_v43 = vmul.f32 %v620_v21, %v610_v39  ;;  %v637_v63 = vmul.f32 %v616_v23, %v609_v40  ;;  %1286 = vmatprep.subr.bf16.mxu1 %v5431_v4  ;;  %v5429_v23 = vld [vmem:[%s7250_s5] ss:$8 sps:$4 sm:$0xff]   ;;  %v5443_v46 = vld [vmem:[%s7250_s5 + $0x44] ss:$8 sps:$4 sm:$0xff]   ;;  %v5444_v37 = vld [vmem:[%s7250_s5 + $0x50] ss:$8 sps:$4 sm:$0xff]  }
 0x157   : > { %v624_v56 = vrot.slane %v516_v17, %v6150_v3  ;;  %v662_v57 = vadd.f32 %v644_v29, %v634_v2  ;;  %v652_v61 = vrot.slane %v517_v19, %v6150_v3  ;;  %v5441_v35 = vld [vmem:[%s7250_s5 + $0x40] ss:$8 sps:$4 sm:$0xff]   ;;  %v5449_v38 = vld [vmem:[%s7250_s5 + $0x64] ss:$8 sps:$4 sm:$0xff]   ;;  %v5452_v40 = vld [vmem:[%s7250_s5 + $0x74] ss:$8 sps:$4 sm:$0xff]  }
 0x158   : > { %928 = vmatprep.mubr.bf16.mxu0 %v669_v42  ;;  %v666_v52 = vadd.f32 %v648_v25, %v638_v43  ;;  %v665_v54 = vadd.f32 %v644_v29, %v637_v63  ;;  %v5447_v39 = vld [vmem:[%s7250_s5 + $0x60] ss:$8 sps:$4 sm:$0xff]   ;;  %v5450_v41 = vld [vmem:[%s7250_s5 + $0x70] ss:$8 sps:$4 sm:$0xff]   ;;  %v5455_v42 = vld [vmem:[%s7250_s5 + $0x84] ss:$8 sps:$4 sm:$0xff]  }
 0x159   : > { %929 = vmatmul.mubr.bf16.vlgmr.msra.gmra.mrb[0].mxu0 %v668_v50  ;;  %v633_v60 = vmul.f32 %v624_v56, %v605_v55  ;;  %v630_v1 = vmul.f32 %v624_v56, %v602_v58  ;;  %v639_v10 = vmul.f32 %v624_v56, %v611_v7  ;;  %v636_v48 = vmul.f32 %v624_v56, %v608_v8  ;;  %v5453_v50 = vld [vmem:[%s7250_s5 + $0x80] ss:$8 sps:$4 sm:$0xff]   ;;  %v5458_v43 = vld [vmem:[%s7251_s6 + $0x4] ss:$8 sps:$4 sm:$0xff]   ;;  %v5461_v63 = vld [vmem:[%s7251_s6 + $0x14] ss:$8 sps:$4 sm:$0xff]  }
 0x15a   : > { %v672_v49 = vpack.c.bf16 %v666_v52, %v663_v45  ;;  %950 = vmatpush1.bf16.msra.mxu0 %v5396_v62  ;;  %v671_v59 = vpack.c.bf16 %v665_v54, %v662_v57  ;;  %v5456_v62 = vld [vmem:[%s7251_s6] ss:$8 sps:$4 sm:$0xff]   ;;  %v5464_v45 = vld [vmem:[%s7251_s6 + $0x24] ss:$8 sps:$4 sm:$0xff]   ;;  %v5467_v2 = vld [vmem:[%s7251_s6 + $0x34] ss:$8 sps:$4 sm:$0xff]  }
 0x15b   : > { %951 = vmatprep.subr.bf16.mxu0 %v5401_v44  ;;  %v661_v6 = vadd.f32 %v652_v61, %v633_v60  ;;  %v658_v0 = vadd.f32 %v652_v61, %v630_v1  ;;  %v667_v11 = vadd.f32 %v652_v61, %v639_v10  ;;  %v664_v12 = vadd.f32 %v652_v61, %v636_v48  ;;  %v5459_v44 = vld [vmem:[%s7251_s6 + $0x10] ss:$8 sps:$4 sm:$0xff]   ;;  %v5462_v52 = vld [vmem:[%s7251_s6 + $0x20] ss:$8 sps:$4 sm:$0xff]   ;;  %v5473_v55 = vld [vmem:[%s7251_s6 + $0x54] ss:$8 sps:$4 sm:$0xff]  }
 0x15c   : > { %938 = vmatprep.mubr.bf16.mxu0 %v672_v49  ;;  %v5465_v49 = vld [vmem:[%s7251_s6 + $0x30] ss:$8 sps:$4 sm:$0xff]   ;;  %v5468_v54 = vld [vmem:[%s7251_s6 + $0x40] ss:$8 sps:$4 sm:$0xff]   ;;  %v5476_v57 = vld [vmem:[%s7251_s6 + $0x64] ss:$8 sps:$4 sm:$0xff]  }
 0x15d   : > { %v670_v9 = vpack.c.bf16 %v661_v6, %v658_v0  ;;  %v673_v13 = vpack.c.bf16 %v667_v11, %v664_v12  ;;  %v5471_v56 = vld [vmem:[%s7251_s6 + $0x50] ss:$8 sps:$4 sm:$0xff]   ;;  %v5474_v58 = vld [vmem:[%s7251_s6 + $0x60] ss:$8 sps:$4 sm:$0xff]   ;;  %v5482_v61 = vld [vmem:[%s7251_s6 + $0x84] ss:$8 sps:$4 sm:$0xff]  }
 0x15e   : > { %952 = vmatpush1.bf16.msra.mxu0 %v5399_v53  ;;  %v5470_v53 = vld [vmem:[%s7251_s6 + $0x44] ss:$8 sps:$4 sm:$0xff]   ;;  %v5477_v60 = vld [vmem:[%s7251_s6 + $0x70] ss:$8 sps:$4 sm:$0xff]   ;;  %v5480_v1 = vld [vmem:[%s7251_s6 + $0x80] ss:$8 sps:$4 sm:$0xff]  }
 0x15f   : > { %v7263_v6 = vmov 0.0  }
 0x160   : > { %5029 = vmatprep.subr.bf16.mxu0 %v7263_v6 }
 0x161   : > { %939 = vmatmul.mubr.bf16.gmra.mrb[4].mxu0 %v671_v59  ;;  %v5479_v59 = vld [vmem:[%s7251_s6 + $0x74] ss:$8 sps:$4 sm:$0xff]  }
 0x162   : > { %981 = vmatprep.mubr.bf16.mxu0 %v7261_v5 }
 0x169   : > { %4758 = vmatmul.mubr.msk.bf16.vlgmr.msra.gmra.mrb[0].mxu0 %vm519_vm0, %v670_v9 }
 0x16a   : > { %991 = vmatprep.mubr.bf16.mxu0 %v7261_v5 }
 0x171   : > { %4759 = vmatmul.mubr.msk.bf16.gmra.mrb[4].mxu0 %vm519_vm0, %v673_v13 }
 0x172   : > { %5031 = vmatprep.mubr.msk.bf16.mxu0 %vm5746_vm2, %v7263_v6 }
 0x23c   : > { %v983_v17 = vpop.f32.mrb[0].mxu0 }
 0x23d   : > { %v985_v18 = vpop.f32.mrb[1].mxu0 }
 0x23e   : > { %v987_v19 = vpop.f32.mrb[2].mxu0 }
 0x23f   : > { %v6174_v20 = vpack.c.bf16 %v987_v19, %v983_v17  ;;  %v989_v21 = vpop.f32.mrb[3].mxu0 }
 0x240   : > { %v1003_v22 = vpack.c.bf16 %v989_v21, %v985_v18 }
 0x242   : > { %4778 = vmatprep.mubr.msk.bf16.mxu1 %vm1114_vm1, %v1003_v22 }
 0x243   : > { %1154 = vmatmul.mubr.bf16.vlgmr.msra.gmra.mrb[0].mxu1 %v6174_v20 }
 0x244   : > { %1287 = vmatpush1.bf16.msra.mxu1 %v5429_v23  ;;  %v993_v25 = vpop.f32.mrb[4].mxu0 }
 0x245   : > { %v995_v27 = vpop.f32.mrb[5].mxu0  ;;  %1288 = vmatprep.subr.bf16.mxu1 %v5434_v24 }
 0x246   : > { %v997_v29 = vpop.f32.mrb[6].mxu0 }
 0x247   : > { %v6190_v30 = vpack.c.bf16 %v997_v29, %v993_v25  ;;  %v999_v31 = vpop.f32.mrb[7].mxu0 }
 0x248   : > { %v6192_v47 = vpack.c.bf16 %v999_v31, %v995_v27  ;;  %1289 = vmatpush1.bf16.msra.mxu1 %v5432_v26 }
 0x249   : > { %1290 = vmatprep.subr.bf16.mxu1 %v5437_v28 }
 0x24a   : > { %4779 = vmatprep.mubr.msk.bf16.mxu1 %vm1114_vm1, %v6192_v47 }
 0x24b   : > { %1164 = vmatmul.mubr.bf16.gmra.mrb[4].mxu1 %v6190_v30 }
 0x24c   : > { %1291 = vmatpush1.bf16.msra.mxu1 %v5435_v32  ;;  %4798 = vmatprep.mubr.msk.bf16.mxu1 %vm1114_vm1, %v1003_v22 }
 0x24d   : > { %1292 = vmatprep.subr.bf16.mxu1 %v5440_v33 }
 0x250   : > { %1293 = vmatpush1.bf16.msra.mxu1 %v5438_v34 }
 0x251   : > { %1294 = vmatprep.subr.bf16.mxu1 %v5443_v46 }
 0x254   : > { %1295 = vmatpush1.bf16.msra.mxu1 %v5441_v35 }
 0x255   : > { %1296 = vmatprep.subr.bf16.mxu1 %v5446_v36 }
 0x258   : > { %1297 = vmatpush1.bf16.msra.mxu1 %v5444_v37 }
 0x259   : > { %1298 = vmatprep.subr.bf16.mxu1 %v5449_v38 }
 0x25c   : > { %1299 = vmatpush1.bf16.msra.mxu1 %v5447_v39 }
 0x25d   : > { %1300 = vmatprep.subr.bf16.mxu1 %v5452_v40 }
 0x260   : > { %1301 = vmatpush1.bf16.msra.mxu1 %v5450_v41 }
 0x261   : > { %1302 = vmatprep.subr.bf16.mxu1 %v5455_v42 }
 0x264   : > { %1303 = vmatpush1.bf16.msra.mxu1 %v5453_v50 }
 0x265   : > { %1451 = vmatprep.subr.bf16.mxu1 %v5458_v43 }
 0x267   : > { %1319 = vmatmul.mubr.bf16.vlgmr.msra.gmra.mrb[8].mxu1 %v6174_v20 }
 0x268   : > { %4799 = vmatprep.mubr.msk.bf16.mxu1 %vm1114_vm1, %v6192_v47  ;;  %1452 = vmatpush1.bf16.msra.mxu1 %v5456_v62 }
 0x269   : > { %1453 = vmatprep.subr.bf16.mxu1 %v5461_v63 }
 0x26c   : > { %1454 = vmatpush1.bf16.msra.mxu1 %v5459_v44 }
 0x26d   : > { %1455 = vmatprep.subr.bf16.mxu1 %v5464_v45 }
 0x26f   : > { %1329 = vmatmul.mubr.bf16.gmra.mrb[12].mxu1 %v6190_v30 }
 0x270   : > { %1456 = vmatpush1.bf16.msra.mxu1 %v5462_v52  ;;  %4818 = vmatprep.mubr.msk.bf16.mxu1 %vm1114_vm1, %v1003_v22 }
 0x271   : > { %1457 = vmatprep.subr.bf16.mxu1 %v5467_v2 }
 0x274   : > { %1458 = vmatpush1.bf16.msra.mxu1 %v5465_v49 }
 0x275   : > { %1459 = vmatprep.subr.bf16.mxu1 %v5470_v53 }
 0x278   : > { %1460 = vmatpush1.bf16.msra.mxu1 %v5468_v54 }
 0x279   : > { %1461 = vmatprep.subr.bf16.mxu1 %v5473_v55 }
 0x27c   : > { %1462 = vmatpush1.bf16.msra.mxu1 %v5471_v56 }
 0x27d   : > { %1463 = vmatprep.subr.bf16.mxu1 %v5476_v57 }
 0x280   : > { %1464 = vmatpush1.bf16.msra.mxu1 %v5474_v58 }
 0x281   : > { %1465 = vmatprep.subr.bf16.mxu1 %v5479_v59 }
 0x284   : > { %1466 = vmatpush1.bf16.msra.mxu1 %v5477_v60 }
 0x285   : > { %1467 = vmatprep.subr.bf16.mxu1 %v5482_v61 }
 0x288   : > { %1468 = vmatpush1.bf16.msra.mxu1 %v5480_v1 }
 0x289   : > { %5053 = vmatprep.subr.bf16.mxu1 %v7263_v6 }
 0x28b   : > { %1484 = vmatmul.mubr.bf16.vlgmr.msra.gmra.mrb[16].mxu1 %v6174_v20 }
 0x28c   : > { %4819 = vmatprep.mubr.msk.bf16.mxu1 %vm1114_vm1, %v6192_v47 }
 0x293   : > { %1494 = vmatmul.mubr.bf16.gmra.mrb[20].mxu1 %v6190_v30 }
 0x294   : > { %5055 = vmatprep.mubr.msk.bf16.mxu1 %vm5746_vm2, %v7263_v6 }
 0x316   : > { %v1155_v7 = vpop.f32.mrb[0].mxu1 }
 0x317   : > { %v6306_v0 = vpop.f32.mrb[1].mxu1 }
 0x318   : > { %v1159_v8 = vpop.f32.mrb[2].mxu1 }
 0x319   : > { %v6308_v9 = vpack.c.bf16 %v1159_v8, %v1155_v7  ;;  %v6310_v10 = vpop.f32.mrb[3].mxu1 }
 0x31a   : > { %v1175_v48 = vpack.c.bf16 %v6310_v10, %v6306_v0 }
 0x31e   : > { %v1165_v11 = vpop.f32.mrb[4].mxu1 }
 0x31f   : > { %v6314_v12 = vpop.f32.mrb[5].mxu1 }
 0x320   : > { %v1169_v13 = vpop.f32.mrb[6].mxu1 }
 0x321   : > { %v6316_v14 = vpack.c.bf16 %v1169_v13, %v1165_v11  ;;  %v6318_v51 = vpop.f32.mrb[7].mxu1 }
 0x322   : > { %v7268_v10 = vpack.c.bf16 %v6318_v51, %v6314_v12 }
 0x33a   : > { %v1320_v17 = vpop.f32.mrb[8].mxu1 }
 0x33b   : > { %v6322_v18 = vpop.f32.mrb[9].mxu1 }
 0x33c   : > { %v1324_v19 = vpop.f32.mrb[10].mxu1 }
 0x33d   : > { %v6324_v20 = vpack.c.bf16 %v1324_v19, %v1320_v17  ;;  %v6326_v21 = vpop.f32.mrb[11].mxu1 }
 0x33e   : > { %v1340_v22 = vpack.c.bf16 %v6326_v21, %v6322_v18 }
 0x33f   : > { %v1513_v23 = vsel %vm1508_vm3, %v6324_v20, 0 }
 0x340   : > { %5030 = vmatpush3.bf16.xpose.msra.mxu0 %v1513_v23 }
 0x341   : > { %5035 = vmatprep.subr.bf16.mxu0 %v7263_v6 }
 0x342   : > { %v1330_v24 = vpop.f32.mrb[12].mxu1 }
 0x343   : > { %v6333_v25 = vpop.f32.mrb[13].mxu1 }
 0x344   : > { %v1334_v26 = vpop.f32.mrb[14].mxu1 }
 0x345   : > { %v6335_v27 = vpack.c.bf16 %v1334_v26, %v1330_v24  ;;  %v6337_v28 = vpop.f32.mrb[15].mxu1 }
 0x347   : > { %5032 = vmatmul.mubr.msk.bf16.vlgmr.msra.gmra.mrb[8].mxu0 %vm1508_vm3, %v6308_v9  ;;  %v1560_v30 = vsel %vm1508_vm3, %v6335_v27, 0 }
 0x348   : > { %5036 = vmatpush3.bf16.xpose.msra.mxu0 %v1560_v30  ;;  %5037 = vmatprep.mubr.msk.bf16.mxu0 %vm5746_vm2, %v7263_v6 }
 0x349   : > { %5041 = vmatprep.subr.bf16.mxu0 %v7263_v6 }
 0x34f   : > { %5038 = vmatmul.mubr.msk.bf16.vlgmr.msra.gmra.mrb[12].mxu0 %vm1508_vm3, %v6316_v14 }
 0x350   : > { %5043 = vmatprep.mubr.msk.bf16.mxu0 %vm5746_vm2, %v7263_v6 }
 0x35e   : > { %v1485_v31 = vpop.f32.mrb[16].mxu1 }
 0x35f   : > { %v6352_v47 = vpop.f32.mrb[17].mxu1 }
 0x360   : > { %v1489_v32 = vpop.f32.mrb[18].mxu1 }
 0x361   : > { %v6354_v33 = vpack.c.bf16 %v1489_v32, %v1485_v31  ;;  %v6356_v34 = vpop.f32.mrb[19].mxu1 }
 0x363   : > { %5042 = vmatpush3.bf16.msra.mxu0 %v6354_v33 }
 0x364   : > { %5047 = vmatprep.subr.bf16.mxu0 %v7263_v6 }
 0x366   : > { %v1495_v35 = vpop.f32.mrb[20].mxu1 }
 0x367   : > { %v6362_v36 = vpop.f32.mrb[21].mxu1 }
 0x368   : > { %v1499_v37 = vpop.f32.mrb[22].mxu1 }
 0x369   : > { %v6364_v38 = vpack.c.bf16 %v1499_v37, %v1495_v35  ;;  %v6366_v39 = vpop.f32.mrb[23].mxu1 }
 0x41a   : > { %v1549_v41 = vpop.f32.mrb[8].mxu0 }
 0x41b   : > { %v5033_v42 = vpop.f32.mrb[9].mxu0  ;;  %v1603_v50 = vsel %vm1114_vm1, %v1549_v41, -inf }
 0x41c   : > { %1604 = vmax.xlane.f32.xlu0 %v1603_v50  ;;  %v1552_v43 = vpop.f32.mrb[10].mxu0 }
 0x41d   : > { %v5034_v62 = vpop.f32.mrb[11].mxu0  ;;  %v1606_v63 = vsel %vm1114_vm1, %v1552_v43, -inf }
 0x41e   : > { %1607 = vmax.xlane.f32.xlu1 %v1606_v63 }
 0x422   : > { %v1596_v44 = vpop.f32.mrb[12].mxu0 }
 0x423   : > { %v5039_v45 = vpop.f32.mrb[13].mxu0  ;;  %v1609_v52 = vsel %vm1114_vm1, %v1596_v44, -inf }
 0x424   : > { %1610 = vmax.xlane.f32.xlu0 %v1609_v52  ;;  %v1599_v2 = vpop.f32.mrb[14].mxu0 }
 0x425   : > { %v5040_v49 = vpop.f32.mrb[15].mxu0  ;;  %v1612_v53 = vsel %vm1114_vm1, %v1599_v2, -inf }
 0x426   : > { %1613 = vmax.xlane.f32.xlu1 %v1612_v53 }
 0x4a9   : > { %v1605_v54 = vpop.xlane.xlu0 %1604 }
 0x4aa   : > { %v1615_v55 = vsub.f32 %v1549_v41, %v1605_v54 }
 0x4ab   : > { %v1608_v56 = vpop.xlane.xlu1 %1607 }
 0x4ac   : > { %v1619_v57 = vmul.f32 1.442695, %v1615_v55  ;;  %v1616_v58 = vsub.f32 %v1552_v43, %v1608_v56 }
 0x4ae   : > { %5564 = vpow2.f32 %v1619_v57  ;;  %v1621_v59 = vmul.f32 1.442695, %v1616_v58 }
 0x4b0   : > { %5566 = vpow2.f32 %v1621_v59 }
 0x4b1   : > { %v1611_v60 = vpop.xlane.xlu0 %1610 }
 0x4b2   : > { %v1617_v61 = vsub.f32 %v1596_v44, %v1611_v60 }
 0x4b3   : > { %v1614_v23 = vpop.xlane.xlu1 %1613 }
 0x4b4   : > { %v1623_v1 = vmul.f32 1.442695, %v1617_v61  ;;  %v1618_v24 = vsub.f32 %v1599_v2, %v1614_v23 }
 0x4b6   : > { %5568 = vpow2.f32 %v1623_v1  ;;  %v1625_v26 = vmul.f32 1.442695, %v1618_v24 }
 0x4b8   : > { %v5565_v7 = vpop.eup %5564  ;;  %5570 = vpow2.f32 %v1625_v26 }
 0x4b9   : > { %v1627_v8 = vsel %vm1114_vm1, %v5565_v7, 0.0 }
 0x4ba   : > { %v5567_v11 = vpop.eup %5566  ;;  %1628 = vadd.xlane.f32.xlu0 %v1627_v8 }
 0x4bb   : > { %v1630_v13 = vsel %vm1114_vm1, %v5567_v11, 0.0 }
 0x4bc   : > { %1631 = vadd.xlane.f32.xlu1 %v1630_v13 }
 0x4c0   : > { %v5569_v17 = vpop.eup %5568 }
 0x4c1   : > { %v1633_v19 = vsel %vm1114_vm1, %v5569_v17, 0.0 }
 0x4c2   : > { %1634 = vadd.xlane.f32.xlu0 %v1633_v19  ;;  %v5571_v30 = vpop.eup %5570 }
 0x4c3   : > { %v1636_v31 = vsel %vm1114_vm1, %v5571_v30, 0.0 }
 0x4cd   : > { %1738 = vrot.lane.b32.xlu1 %v6308_v9, %s5747_s19 }
 0x4d8   : > { %1741 = vrot.lane.b32.xlu0 %v6324_v20, %s5747_s19 }
 0x4f1   : > { %1637 = vadd.xlane.f32.xlu1 %v1636_v31 }
 0x502   : > { %1794 = vrot.lane.b32.xlu1 %v6335_v27, %s5747_s19 }
 0x506   : > { %1791 = vrot.lane.b32.xlu1 %v6316_v14, %s5747_s19 }
 0x547   : > { %v1629_v32 = vpop.xlane.xlu0 %1628 }
 0x548   : > { %5572 = vrcp.f32 %v1629_v32 }
 0x549   : > { %v1632_v35 = vpop.xlane.xlu1 %1631 }
 0x54a   : > { %5574 = vrcp.f32 %v1632_v35 }
 0x54d   : > { %v1739_v45 = vpop.permute.xlu1 %1738 }
 0x54f   : > { %v1635_v37 = vpop.xlane.xlu0 %1634 }
 0x550   : > { %5576 = vrcp.f32 %v1635_v37 }
 0x552   : > { %v5573_v41 = vpop.eup %5572 }
 0x553   : > { %v1742_v42 = vpop.permute.xlu0 %1741  ;;  %v1640_v62 = vmul.f32 %v5573_v41, %v5565_v7 }
 0x554   : > { %v5575_v50 = vpop.eup %5574  ;;  %v1747_v43 = vsel %vm1508_vm3, %v1742_v42, 0 }
 0x555   : > { %v1642_v63 = vmul.f32 %v5575_v50, %v5567_v11  ;;  %5054 = vmatpush3.bf16.xpose.msra.mxu1 %v1747_v43 }
 0x556   : > { %5065 = vmatprep.subr.bf16.mxu1 %v7263_v6 }
 0x557   : > { %v1647_v44 = vpack.c.bf16 %v1642_v63, %v1640_v62 }
 0x559   : > { %5044 = vmatmul.mubr.msk.bf16.vlgmr.msra.gmra.mrb[16].mxu0 %vm1114_vm1, %v1647_v44 }
 0x55a   : > { %5048 = vmatpush3.bf16.msra.mxu0 %v6364_v38  ;;  %5049 = vmatprep.mubr.msk.bf16.mxu0 %vm5746_vm2, %v7263_v6  ;;  %v5577_v2 = vpop.eup %5576 }
 0x55b   : > { %5059 = vmatprep.subr.bf16.mxu0 %v7263_v6  ;;  %v1644_v53 = vmul.f32 %v5577_v2, %v5569_v17 }
 0x55c   : > { %5056 = vmatmul.mubr.msk.bf16.vlgmr.msra.gmra.mrb[24].mxu1 %vm1508_vm3, %v1739_v45 }
 0x55d   : > { %5067 = vmatprep.mubr.msk.bf16.mxu1 %vm5746_vm2, %v7263_v6 }
 0x57e   : > { %v1638_v52 = vpop.xlane.xlu1 %1637 }
 0x57f   : > { %5578 = vrcp.f32 %v1638_v52 }
 0x582   : > { %v1795_v55 = vpop.permute.xlu1 %1794 }
 0x583   : > { %v1800_v57 = vsel %vm1508_vm3, %v1795_v55, 0 }
 0x586   : > { %v1792_v58 = vpop.permute.xlu1 %1791 }
 0x589   : > { %v5579_v49 = vpop.eup %5578 }
 0x58a   : > { %v1646_v54 = vmul.f32 %v5579_v49, %v5571_v30 }
 0x58c   : > { %v1648_v56 = vpack.c.bf16 %v1646_v54, %v1644_v53 }
 0x58e   : > { %5050 = vmatmul.mubr.msk.bf16.vlgmr.msra.gmra.mrb[20].mxu0 %vm1114_vm1, %v1648_v56 }
 0x58f   : > { %5060 = vmatpush3.bf16.xpose.msra.mxu0 %v1800_v57  ;;  %5061 = vmatprep.mubr.msk.bf16.mxu0 %vm5746_vm2, %v7263_v6 }
 0x590   : > { %5071 = vmatprep.subr.bf16.mxu0 %v7263_v6 }
 0x596   : > { %5062 = vmatmul.mubr.msk.bf16.vlgmr.msra.gmra.mrb[24].mxu0 %vm1508_vm3, %v1792_v58 }
 0x597   : > { %5073 = vmatprep.mubr.msk.bf16.mxu0 %vm5746_vm2, %v7263_v6 }
 0x62c   : > { %v6404_v59 = vpop.f32.mrb[16].mxu0 }
 0x62d   : > { %v5045_v60 = vpop.f32.mrb[17].mxu0 }
 0x62e   : > { %v6406_v61 = vpop.f32.mrb[18].mxu0 }
 0x62f   : > { %v5046_v1 = vpop.f32.mrb[19].mxu0  ;;  %v1783_v7 = vpop.f32.mrb[24].mxu1 }
 0x630   : > { %v5057_v8 = vpop.f32.mrb[25].mxu1  ;;  %v1843_v11 = vsel %vm1114_vm1, %v1783_v7, -inf }
 0x631   : > { %1844 = vmax.xlane.f32.xlu0 %v1843_v11  ;;  %v1786_v13 = vpop.f32.mrb[26].mxu1 }
 0x632   : > { %v5058_v17 = vpop.f32.mrb[27].mxu1  ;;  %v1846_v19 = vsel %vm1114_vm1, %v1786_v13, -inf }
 0x633   : > { %1847 = vmax.xlane.f32.xlu1 %v1846_v19 }
 0x661   : > { %v6410_v23 = vpop.f32.mrb[20].mxu0 }
 0x662   : > { %v5051_v24 = vpop.f32.mrb[21].mxu0 }
 0x663   : > { %v6412_v26 = vpop.f32.mrb[22].mxu0 }
 0x664   : > { %v5052_v30 = vpop.f32.mrb[23].mxu0 }
 0x669   : > { %v1836_v31 = vpop.f32.mrb[24].mxu0 }
 0x66a   : > { %v5063_v32 = vpop.f32.mrb[25].mxu0  ;;  %v1849_v35 = vsel %vm1114_vm1, %v1836_v31, -inf }
 0x66b   : > { %v1839_v37 = vpop.f32.mrb[26].mxu0  ;;  %1850 = vmax.xlane.f32.xlu0 %v1849_v35 }
 0x66c   : > { %v5064_v41 = vpop.f32.mrb[27].mxu0  ;;  %v1852_v42 = vsel %vm1114_vm1, %v1839_v37, -inf }
 0x66f   : > { %1853 = vmax.xlane.f32.xlu0 %v1852_v42 }
 0x6be   : > { %v1845_v50 = vpop.xlane.xlu0 %1844 }
 0x6bf   : > { %v1855_v43 = vsub.f32 %v1783_v7, %v1845_v50 }
 0x6c0   : > { %v1848_v62 = vpop.xlane.xlu1 %1847 }
 0x6c1   : > { %v1859_v63 = vmul.f32 1.442695, %v1855_v43  ;;  %v1856_v44 = vsub.f32 %v1786_v13, %v1848_v62 }
 0x6c3   : > { %5580 = vpow2.f32 %v1859_v63  ;;  %v1861_v45 = vmul.f32 1.442695, %v1856_v44 }
 0x6c5   : > { %5582 = vpow2.f32 %v1861_v45 }
 0x6cd   : > { %v5581_v52 = vpop.eup %5580 }
 0x6ce   : > { %v1867_v2 = vsel %vm1114_vm1, %v5581_v52, 0.0 }
 0x6cf   : > { %v5583_v49 = vpop.eup %5582  ;;  %1868 = vadd.xlane.f32.xlu0 %v1867_v2 }
 0x6d0   : > { %v1870_v53 = vsel %vm1114_vm1, %v5583_v49, 0.0 }
 0x6d1   : > { %1871 = vadd.xlane.f32.xlu1 %v1870_v53 }
 0x6e2   : > { %1938 = vrot.lane.b32.xlu1 %v6364_v38, %s5747_s19 }
 0x6e5   : > { %1890 = vrot.lane.b32.xlu0 %v6354_v33, %s5747_s19  ;;  %s7266_s19 = smov 108  }
 0x6e6   : > { %1987 = vrot.lane.b32.xlu1 %v6324_v20, %s5748_s22 }
 0x6f8   : > { %v1851_v54 = vpop.xlane.xlu0 %1850 }
 0x6f9   : > { %v1857_v55 = vsub.f32 %v1836_v31, %v1851_v54 }
 0x6fb   : > { %v1863_v56 = vmul.f32 1.442695, %v1857_v55 }
 0x6fc   : > { %v1854_v57 = vpop.xlane.xlu0 %1853 }
 0x6fd   : > { %5584 = vpow2.f32 %v1863_v56  ;;  %v1858_v58 = vsub.f32 %v1839_v37, %v1854_v57 }
 0x6ff   : > { %v1865_v60 = vmul.f32 1.442695, %v1858_v58 }
 0x701   : > { %5586 = vpow2.f32 %v1865_v60 }
 0x707   : > { %v5585_v1 = vpop.eup %5584 }
 0x708   : > { %v1873_v7 = vsel %vm1114_vm1, %v5585_v1, 0.0 }
 0x709   : > { %1874 = vadd.xlane.f32.xlu0 %v1873_v7 }
 0x70b   : > { %v5587_v8 = vpop.eup %5586 }
 0x70c   : > { %v1876_v11 = vsel %vm1114_vm1, %v5587_v8, 0.0 }
 0x70d   : > { %1877 = vadd.xlane.f32.xlu1 %v1876_v11 }
 0x71e   : > { %1985 = vrot.lane.b32.xlu1 %v6308_v9, %s5748_s22 }
 0x71f   : > { %2038 = vrot.lane.b32.xlu0 %v6335_v27, %s5748_s22 }
 0x722   : > { %2036 = vrot.lane.b32.xlu1 %v6316_v14, %s5748_s22 }
 0x75c   : > { %v1869_v13 = vpop.xlane.xlu0 %1868 }
 0x75d   : > { %5588 = vrcp.f32 %v1869_v13 }
 0x75e   : > { %v1872_v17 = vpop.xlane.xlu1 %1871 }
 0x75f   : > { %5590 = vrcp.f32 %v1872_v17 }
 0x760   : > { %v1891_v19 = vpop.permute.xlu0 %1890 }
 0x761   : > { %5066 = vmatpush3.bf16.msra.mxu1 %v1891_v19 }
 0x762   : > { %v1939_v24 = vpop.permute.xlu1 %1938  ;;  %5077 = vmatprep.subr.bf16.mxu1 %v7263_v6 }
 0x763   : > { %5072 = vmatpush3.bf16.msra.mxu0 %v1939_v24 }
 0x764   : > { %5083 = vmatprep.subr.bf16.mxu0 %v7263_v6 }
 0x766   : > { %v1988_v37 = vpop.permute.xlu1 %1987 }
 0x767   : > { %v5589_v30 = vpop.eup %5588  ;;  %v1993_v42 = vsel %vm1508_vm3, %v1988_v37, 0 }
 0x768   : > { %v1880_v32 = vmul.f32 %v5589_v30, %v5581_v52 }
 0x769   : > { %v5591_v31 = vpop.eup %5590 }
 0x76a   : > { %v1882_v35 = vmul.f32 %v5591_v31, %v5583_v49 }
 0x76c   : > { %v1887_v41 = vpack.c.bf16 %v1882_v35, %v1880_v32 }
 0x76e   : > { %5068 = vmatmul.mubr.msk.bf16.vlgmr.msra.gmra.mrb[28].mxu1 %vm1114_vm1, %v1887_v41 }
 0x76f   : > { %5078 = vmatpush3.bf16.xpose.msra.mxu1 %v1993_v42  ;;  %5079 = vmatprep.mubr.msk.bf16.mxu1 %vm5746_vm2, %v7263_v6 }
 0x770   : > { %5089 = vmatprep.subr.bf16.mxu1 %v7263_v6 }
 0x796   : > { %v1875_v50 = vpop.xlane.xlu0 %1874 }
 0x797   : > { %5592 = vrcp.f32 %v1875_v50 }
 0x79a   : > { %v1878_v43 = vpop.xlane.xlu1 %1877  ;;  %v2039_v2 = vpop.permute.xlu0 %2038 }
 0x79b   : > { %5594 = vrcp.f32 %v1878_v43  ;;  %v2044_v53 = vsel %vm1508_vm3, %v2039_v2, 0 }
 0x79e   : > { %v1986_v62 = vpop.permute.xlu1 %1985 }
 0x79f   : > { %5080 = vmatmul.mubr.msk.bf16.vlgmr.msra.gmra.mrb[32].mxu1 %vm1508_vm3, %v1986_v62 }
 0x7a0   : > { %5091 = vmatprep.mubr.msk.bf16.mxu1 %vm5746_vm2, %v7263_v6 }
 0x7a1   : > { %v5593_v63 = vpop.eup %5592 }
 0x7a2   : > { %v1884_v45 = vmul.f32 %v5593_v63, %v5585_v1  ;;  %v2037_v54 = vpop.permute.xlu1 %2036 }
 0x7a5   : > { %v5595_v44 = vpop.eup %5594 }
 0x7a6   : > { %v1886_v52 = vmul.f32 %v5595_v44, %v5587_v8 }
 0x7a8   : > { %v1888_v49 = vpack.c.bf16 %v1886_v52, %v1884_v45 }
 0x7aa   : > { %5074 = vmatmul.mubr.msk.bf16.vlgmr.msra.gmra.mrb[28].mxu0 %vm1114_vm1, %v1888_v49 }
 0x7ab   : > { %5084 = vmatpush3.bf16.xpose.msra.mxu0 %v2044_v53  ;;  %5085 = vmatprep.mubr.msk.bf16.mxu0 %vm5746_vm2, %v7263_v6 }
 0x7ac   : > { %5095 = vmatprep.subr.bf16.mxu0 %v7263_v6 }
 0x7b2   : > { %5086 = vmatmul.mubr.msk.bf16.vlgmr.msra.gmra.mrb[32].mxu0 %vm1508_vm3, %v2037_v54 }
 0x7b3   : > { %5097 = vmatprep.mubr.msk.bf16.mxu0 %vm5746_vm2, %v7263_v6 }
 0x841   : > { %v6450_v55 = vpop.f32.mrb[28].mxu1 }
 0x842   : > { %v5069_v56 = vpop.f32.mrb[29].mxu1 }
 0x843   : > { %v6452_v57 = vpop.f32.mrb[30].mxu1 }
 0x844   : > { %v5070_v60 = vpop.f32.mrb[31].mxu1 }
 0x872   : > { %v2029_v1 = vpop.f32.mrb[32].mxu1 }
 0x873   : > { %v5081_v7 = vpop.f32.mrb[33].mxu1  ;;  %v2087_v8 = vsel %vm1114_vm1, %v2029_v1, -inf }
 0x874   : > { %2088 = vmax.xlane.f32.xlu0 %v2087_v8  ;;  %v2032_v11 = vpop.f32.mrb[34].mxu1 }
 0x875   : > { %v5082_v13 = vpop.f32.mrb[35].mxu1  ;;  %v2090_v17 = vsel %vm1114_vm1, %v2032_v11, -inf }
 0x876   : > { %2091 = vmax.xlane.f32.xlu1 %v2090_v17 }
 0x87d   : > { %v6458_v19 = vpop.f32.mrb[28].mxu0 }
 0x87e   : > { %v5075_v24 = vpop.f32.mrb[29].mxu0 }
 0x87f   : > { %v6460_v30 = vpop.f32.mrb[30].mxu0 }
 0x880   : > { %v5076_v32 = vpop.f32.mrb[31].mxu0 }
 0x885   : > { %v2080_v35 = vpop.f32.mrb[32].mxu0 }
 0x886   : > { %v5087_v37 = vpop.f32.mrb[33].mxu0  ;;  %v2093_v41 = vsel %vm1114_vm1, %v2080_v35, -inf }
 0x887   : > { %v2083_v42 = vpop.f32.mrb[34].mxu0  ;;  %2094 = vmax.xlane.f32.xlu0 %v2093_v41 }
 0x888   : > { %v5088_v50 = vpop.f32.mrb[35].mxu0  ;;  %v2096_v43 = vsel %vm1114_vm1, %v2083_v42, -inf }
 0x88b   : > { %2097 = vmax.xlane.f32.xlu0 %v2096_v43 }
 0x901   : > { %v2089_v62 = vpop.xlane.xlu0 %2088 }
 0x902   : > { %v2099_v63 = vsub.f32 %v2029_v1, %v2089_v62 }
 0x903   : > { %v2092_v44 = vpop.xlane.xlu1 %2091 }
 0x904   : > { %v2103_v45 = vmul.f32 1.442695, %v2099_v63  ;;  %v2100_v52 = vsub.f32 %v2032_v11, %v2092_v44 }
 0x906   : > { %5596 = vpow2.f32 %v2103_v45  ;;  %v2105_v2 = vmul.f32 1.442695, %v2100_v52 }
 0x908   : > { %5598 = vpow2.f32 %v2105_v2 }
 0x910   : > { %v5597_v49 = vpop.eup %5596 }
 0x911   : > { %v2111_v53 = vsel %vm1114_vm1, %v5597_v49, 0.0 }
 0x912   : > { %v5599_v54 = vpop.eup %5598  ;;  %2112 = vadd.xlane.f32.xlu0 %v2111_v53 }
 0x913   : > { %v2114_v56 = vsel %vm1114_vm1, %v5599_v54, 0.0 }
 0x914   : > { %2115 = vadd.xlane.f32.xlu1 %v2114_v56  ;;  %v2095_v60 = vpop.xlane.xlu0 %2094 }
 0x915   : > { %v2101_v1 = vsub.f32 %v2080_v35, %v2095_v60 }
 0x917   : > { %v2107_v8 = vmul.f32 1.442695, %v2101_v1 }
 0x918   : > { %v2098_v7 = vpop.xlane.xlu0 %2097 }
 0x919   : > { %v2102_v11 = vsub.f32 %v2083_v42, %v2098_v7  ;;  %5600 = vpow2.f32 %v2107_v8 }
 0x91b   : > { %v2109_v13 = vmul.f32 1.442695, %v2102_v11 }
 0x91d   : > { %5602 = vpow2.f32 %v2109_v13 }
 0x923   : > { %v5601_v17 = vpop.eup %5600 }
 0x924   : > { %v2117_v24 = vsel %vm1114_vm1, %v5601_v17, 0.0 }
 0x925   : > { %2180 = vrot.lane.b32.xlu1 %v6364_v38, %s5748_s22 }
 0x927   : > { %v5603_v32 = vpop.eup %5602 }
 0x928   : > { %2133 = vrot.lane.b32.xlu0 %v6354_v33, %s5748_s22  ;;  %v2120_v37 = vsel %vm1114_vm1, %v5603_v32, 0.0  ;;  %s5759_s22 = smov 90  }
 0x929   : > { %2229 = vrot.lane.b32.xlu1 %v6324_v20, %s5749_s23 }
 0x947   : > { %2118 = vadd.xlane.f32.xlu0 %v2117_v24 }
 0x94d   : > { %2121 = vadd.xlane.f32.xlu1 %v2120_v37 }
 0x95d   : > { %2280 = vrot.lane.b32.xlu0 %v6335_v27, %s5749_s23 }
 0x95e   : > { %2227 = vrot.lane.b32.xlu1 %v6308_v9, %s5749_s23 }
 0x962   : > { %2278 = vrot.lane.b32.xlu1 %v6316_v14, %s5749_s23 }
 0x99f   : > { %v2113_v35 = vpop.xlane.xlu0 %2112 }
 0x9a0   : > { %5604 = vrcp.f32 %v2113_v35 }
 0x9a1   : > { %v2116_v41 = vpop.xlane.xlu1 %2115 }
 0x9a2   : > { %5606 = vrcp.f32 %v2116_v41 }
 0x9a3   : > { %v2134_v42 = vpop.permute.xlu0 %2133 }
 0x9a4   : > { %5090 = vmatpush3.bf16.msra.mxu1 %v2134_v42 }
 0x9a5   : > { %v2181_v50 = vpop.permute.xlu1 %2180  ;;  %5101 = vmatprep.subr.bf16.mxu1 %v7263_v6 }
 0x9a6   : > { %5096 = vmatpush3.bf16.msra.mxu0 %v2181_v50 }
 0x9a7   : > { %5107 = vmatprep.subr.bf16.mxu0 %v7263_v6 }
 0x9a9   : > { %v2230_v45 = vpop.permute.xlu1 %2229 }
 0x9aa   : > { %v5605_v43 = vpop.eup %5604  ;;  %v2235_v2 = vsel %vm1508_vm3, %v2230_v45, 0 }
 0x9ab   : > { %v2124_v63 = vmul.f32 %v5605_v43, %v5597_v49 }
 0x9ac   : > { %v5607_v62 = vpop.eup %5606 }
 0x9ad   : > { %v2126_v44 = vmul.f32 %v5607_v62, %v5599_v54 }
 0x9af   : > { %v2131_v52 = vpack.c.bf16 %v2126_v44, %v2124_v63 }
 0x9b1   : > { %5092 = vmatmul.mubr.msk.bf16.vlgmr.msra.gmra.mrb[36].mxu1 %vm1114_vm1, %v2131_v52 }
 0x9b2   : > { %5102 = vmatpush3.bf16.xpose.msra.mxu1 %v2235_v2  ;;  %5103 = vmatprep.mubr.msk.bf16.mxu1 %vm5746_vm2, %v7263_v6 }
 0x9b3   : > { %5113 = vmatprep.subr.bf16.mxu1 %v7263_v6 }
 0x9d4   : > { %v2119_v53 = vpop.xlane.xlu0 %2118 }
 0x9d5   : > { %5608 = vrcp.f32 %v2119_v53 }
 0x9d8   : > { %v2281_v8 = vpop.permute.xlu0 %2280 }
 0x9d9   : > { %v2286_v13 = vsel %vm1508_vm3, %v2281_v8, 0 }
 0x9da   : > { %v2122_v56 = vpop.xlane.xlu1 %2121 }
 0x9db   : > { %5610 = vrcp.f32 %v2122_v56 }
 0x9de   : > { %v2228_v60 = vpop.permute.xlu1 %2227 }
 0x9df   : > { %5104 = vmatmul.mubr.msk.bf16.vlgmr.msra.gmra.mrb[40].mxu1 %vm1508_vm3, %v2228_v60  ;;  %v5609_v49 = vpop.eup %5608 }
 0x9e0   : > { %5115 = vmatprep.mubr.msk.bf16.mxu1 %vm5746_vm2, %v7263_v6  ;;  %v2128_v1 = vmul.f32 %v5609_v49, %v5601_v17 }
 0x9e2   : > { %v2279_v24 = vpop.permute.xlu1 %2278 }
 0x9e5   : > { %v5611_v54 = vpop.eup %5610 }
 0x9e6   : > { %v2130_v7 = vmul.f32 %v5611_v54, %v5603_v32 }
 0x9e8   : > { %v2132_v11 = vpack.c.bf16 %v2130_v7, %v2128_v1 }
 0x9ea   : > { %5098 = vmatmul.mubr.msk.bf16.vlgmr.msra.gmra.mrb[36].mxu0 %vm1114_vm1, %v2132_v11 }
 0x9eb   : > { %5108 = vmatpush3.bf16.xpose.msra.mxu0 %v2286_v13  ;;  %5109 = vmatprep.mubr.msk.bf16.mxu0 %vm5746_vm2, %v7263_v6 }
 0x9ec   : > { %5119 = vmatprep.subr.bf16.mxu0 %v7263_v6 }
 0x9f2   : > { %5110 = vmatmul.mubr.msk.bf16.vlgmr.msra.gmra.mrb[40].mxu0 %vm1508_vm3, %v2279_v24 }
 0x9f3   : > { %5121 = vmatprep.mubr.msk.bf16.mxu0 %vm5746_vm2, %v7263_v6 }
 0xa84   : > { %v6500_v17 = vpop.f32.mrb[36].mxu1 }
 0xa85   : > { %v5093_v32 = vpop.f32.mrb[37].mxu1 }
 0xa86   : > { %v6502_v37 = vpop.f32.mrb[38].mxu1 }
 0xa87   : > { %v5094_v41 = vpop.f32.mrb[39].mxu1 }
 0xab2   : > { %v2271_v42 = vpop.f32.mrb[40].mxu1 }
 0xab3   : > { %v5105_v50 = vpop.f32.mrb[41].mxu1  ;;  %v2329_v43 = vsel %vm1114_vm1, %v2271_v42, -inf }
 0xab4   : > { %2330 = vmax.xlane.f32.xlu0 %v2329_v43  ;;  %v2274_v62 = vpop.f32.mrb[42].mxu1 }
 0xab5   : > { %v5106_v63 = vpop.f32.mrb[43].mxu1  ;;  %v2332_v44 = vsel %vm1114_vm1, %v2274_v62, -inf }
 0xab6   : > { %2333 = vmax.xlane.f32.xlu1 %v2332_v44 }
 0xabd   : > { %v6508_v45 = vpop.f32.mrb[36].mxu0 }
 0xabe   : > { %v5099_v52 = vpop.f32.mrb[37].mxu0 }
 0xabf   : > { %v6510_v2 = vpop.f32.mrb[38].mxu0 }
 0xac0   : > { %v5100_v56 = vpop.f32.mrb[39].mxu0 }
 0xac5   : > { %v2322_v60 = vpop.f32.mrb[40].mxu0 }
 0xac6   : > { %v5111_v49 = vpop.f32.mrb[41].mxu0  ;;  %v2335_v54 = vsel %vm1114_vm1, %v2322_v60, -inf }
 0xac7   : > { %v2325_v1 = vpop.f32.mrb[42].mxu0  ;;  %2336 = vmax.xlane.f32.xlu0 %v2335_v54 }
 0xac8   : > { %v5112_v7 = vpop.f32.mrb[43].mxu0  ;;  %v2338_v8 = vsel %vm1114_vm1, %v2325_v1, -inf }
 0xacb   : > { %2339 = vmax.xlane.f32.xlu0 %v2338_v8 }
 0xb41   : > { %v2331_v11 = vpop.xlane.xlu0 %2330 }
 0xb42   : > { %v2341_v13 = vsub.f32 %v2271_v42, %v2331_v11 }
 0xb43   : > { %v2334_v24 = vpop.xlane.xlu1 %2333 }
 0xb44   : > { %v2345_v32 = vmul.f32 1.442695, %v2341_v13  ;;  %v2342_v41 = vsub.f32 %v2274_v62, %v2334_v24 }
 0xb46   : > { %5612 = vpow2.f32 %v2345_v32  ;;  %v2347_v50 = vmul.f32 1.442695, %v2342_v41 }
 0xb48   : > { %5614 = vpow2.f32 %v2347_v50 }
 0xb50   : > { %v5613_v43 = vpop.eup %5612 }
 0xb51   : > { %v2353_v63 = vsel %vm1114_vm1, %v5613_v43, 0.0 }
 0xb52   : > { %v5615_v44 = vpop.eup %5614  ;;  %2354 = vadd.xlane.f32.xlu0 %v2353_v63 }
 0xb53   : > { %v2356_v52 = vsel %vm1114_vm1, %v5615_v44, 0.0 }
 0xb54   : > { %2357 = vadd.xlane.f32.xlu1 %v2356_v52  ;;  %v2337_v42 = vpop.xlane.xlu0 %2336 }
 0xb55   : > { %v2343_v62 = vsub.f32 %v2322_v60, %v2337_v42 }
 0xb57   : > { %v2349_v49 = vmul.f32 1.442695, %v2343_v62 }
 0xb58   : > { %v2340_v56 = vpop.xlane.xlu0 %2339 }
 0xb59   : > { %v2344_v54 = vsub.f32 %v2325_v1, %v2340_v56  ;;  %5616 = vpow2.f32 %v2349_v49 }
 0xb5b   : > { %v2351_v7 = vmul.f32 1.442695, %v2344_v54 }
 0xb5d   : > { %5618 = vpow2.f32 %v2351_v7 }
 0xb63   : > { %v5617_v8 = vpop.eup %5616 }
 0xb64   : > { %v2359_v11 = vsel %vm1114_vm1, %v5617_v8, 0.0 }
 0xb65   : > { %2422 = vrot.lane.b32.xlu1 %v6364_v38, %s5749_s23 }
 0xb67   : > { %v5619_v13 = vpop.eup %5618 }
 0xb68   : > { %2375 = vrot.lane.b32.xlu0 %v6354_v33, %s5749_s23  ;;  %v2362_v24 = vsel %vm1114_vm1, %v5619_v13, 0.0 }
 0xb69   : > { %2471 = vrot.lane.b32.xlu1 %v6324_v20, %s5750_s25 }
 0xb87   : > { %2360 = vadd.xlane.f32.xlu0 %v2359_v11 }
 0xb8d   : > { %2363 = vadd.xlane.f32.xlu1 %v2362_v24 }
 0xb9d   : > { %2522 = vrot.lane.b32.xlu0 %v6335_v27, %s5750_s25 }
 0xb9e   : > { %2469 = vrot.lane.b32.xlu1 %v6308_v9, %s5750_s25 }
 0xba2   : > { %2520 = vrot.lane.b32.xlu1 %v6316_v14, %s5750_s25 }
 0xbdf   : > { %v2355_v60 = vpop.xlane.xlu0 %2354 }
 0xbe0   : > { %5620 = vrcp.f32 %v2355_v60 }
 0xbe1   : > { %v2358_v1 = vpop.xlane.xlu1 %2357 }
 0xbe2   : > { %5622 = vrcp.f32 %v2358_v1 }
 0xbe3   : > { %v2376_v32 = vpop.permute.xlu0 %2375 }
 0xbe4   : > { %5114 = vmatpush3.bf16.msra.mxu1 %v2376_v32 }
 0xbe5   : > { %v2423_v41 = vpop.permute.xlu1 %2422  ;;  %5125 = vmatprep.subr.bf16.mxu1 %v7263_v6 }
 0xbe6   : > { %5120 = vmatpush3.bf16.msra.mxu0 %v2423_v41 }
 0xbe7   : > { %5131 = vmatprep.subr.bf16.mxu0 %v7263_v6 }
 0xbe9   : > { %v2472_v62 = vpop.permute.xlu1 %2471 }
 0xbea   : > { %v5621_v50 = vpop.eup %5620  ;;  %v2477_v49 = vsel %vm1508_vm3, %v2472_v62, 0 }
 0xbeb   : > { %v2366_v52 = vmul.f32 %v5621_v50, %v5613_v43 }
 0xbec   : > { %v5623_v63 = vpop.eup %5622 }
 0xbed   : > { %v2368_v42 = vmul.f32 %v5623_v63, %v5615_v44 }
 0xbef   : > { %v2373_v56 = vpack.c.bf16 %v2368_v42, %v2366_v52 }
 0xbf1   : > { %5116 = vmatmul.mubr.msk.bf16.vlgmr.msra.gmra.mrb[44].mxu1 %vm1114_vm1, %v2373_v56 }
 0xbf2   : > { %5126 = vmatpush3.bf16.xpose.msra.mxu1 %v2477_v49  ;;  %5127 = vmatprep.mubr.msk.bf16.mxu1 %vm5746_vm2, %v7263_v6 }
 0xbf3   : > { %5137 = vmatprep.subr.bf16.mxu1 %v7263_v6 }
 0xc14   : > { %v2361_v54 = vpop.xlane.xlu0 %2360 }
 0xc15   : > { %5624 = vrcp.f32 %v2361_v54 }
 0xc18   : > { %v2523_v1 = vpop.permute.xlu0 %2522 }
 0xc19   : > { %v2528_v41 = vsel %vm1508_vm3, %v2523_v1, 0 }
 0xc1a   : > { %v2364_v7 = vpop.xlane.xlu1 %2363 }
 0xc1b   : > { %5626 = vrcp.f32 %v2364_v7 }
 0xc1e   : > { %v2470_v11 = vpop.permute.xlu1 %2469 }
 0xc1f   : > { %5128 = vmatmul.mubr.msk.bf16.vlgmr.msra.gmra.mrb[48].mxu1 %vm1508_vm3, %v2470_v11  ;;  %v5625_v43 = vpop.eup %5624 }
 0xc20   : > { %5139 = vmatprep.mubr.msk.bf16.mxu1 %vm5746_vm2, %v7263_v6  ;;  %v2370_v24 = vmul.f32 %v5625_v43, %v5617_v8 }
 0xc22   : > { %v2521_v50 = vpop.permute.xlu1 %2520 }
 0xc25   : > { %v5627_v44 = vpop.eup %5626 }
 0xc26   : > { %v2372_v60 = vmul.f32 %v5627_v44, %v5619_v13 }
 0xc28   : > { %v2374_v32 = vpack.c.bf16 %v2372_v60, %v2370_v24 }
 0xc2a   : > { %5122 = vmatmul.mubr.msk.bf16.vlgmr.msra.gmra.mrb[44].mxu0 %vm1114_vm1, %v2374_v32 }
 0xc2b   : > { %5132 = vmatpush3.bf16.xpose.msra.mxu0 %v2528_v41  ;;  %5133 = vmatprep.mubr.msk.bf16.mxu0 %vm5746_vm2, %v7263_v6 }
 0xc2c   : > { %5143 = vmatprep.subr.bf16.mxu0 %v7263_v6 }
 0xc32   : > { %5134 = vmatmul.mubr.msk.bf16.vlgmr.msra.gmra.mrb[48].mxu0 %vm1508_vm3, %v2521_v50 }
 0xc33   : > { %5145 = vmatprep.mubr.msk.bf16.mxu0 %vm5746_vm2, %v7263_v6 }
 0xcc4   : > { %v6550_v8 = vpop.f32.mrb[44].mxu1 }
 0xcc5   : > { %v5117_v13 = vpop.f32.mrb[45].mxu1 }
 0xcc6   : > { %v6552_v63 = vpop.f32.mrb[46].mxu1 }
 0xcc7   : > { %v5118_v42 = vpop.f32.mrb[47].mxu1 }
 0xcf2   : > { %v2513_v62 = vpop.f32.mrb[48].mxu1 }
 0xcf3   : > { %v5129_v56 = vpop.f32.mrb[49].mxu1  ;;  %v2571_v49 = vsel %vm1114_vm1, %v2513_v62, -inf }
 0xcf4   : > { %2572 = vmax.xlane.f32.xlu0 %v2571_v49  ;;  %v2516_v54 = vpop.f32.mrb[50].mxu1 }
 0xcf5   : > { %v5130_v7 = vpop.f32.mrb[51].mxu1  ;;  %v2574_v11 = vsel %vm1114_vm1, %v2516_v54, -inf }
 0xcf6   : > { %2575 = vmax.xlane.f32.xlu1 %v2574_v11 }
 0xcfd   : > { %v6558_v43 = vpop.f32.mrb[44].mxu0 }
 0xcfe   : > { %v5123_v44 = vpop.f32.mrb[45].mxu0 }
 0xcff   : > { %v6560_v24 = vpop.f32.mrb[46].mxu0 }
 0xd00   : > { %v5124_v1 = vpop.f32.mrb[47].mxu0 }
 0xd05   : > { %v2564_v32 = vpop.f32.mrb[48].mxu0 }
 0xd06   : > { %v5135_v41 = vpop.f32.mrb[49].mxu0  ;;  %v2577_v50 = vsel %vm1114_vm1, %v2564_v32, -inf }
 0xd07   : > { %v2567_v13 = vpop.f32.mrb[50].mxu0  ;;  %2578 = vmax.xlane.f32.xlu0 %v2577_v50 }
 0xd08   : > { %v5136_v42 = vpop.f32.mrb[51].mxu0  ;;  %v2580_v56 = vsel %vm1114_vm1, %v2567_v13, -inf }
 0xd0b   : > { %2581 = vmax.xlane.f32.xlu0 %v2580_v56 }
 0xd81   : > { %v2573_v49 = vpop.xlane.xlu0 %2572 }
 0xd82   : > { %v2583_v7 = vsub.f32 %v2513_v62, %v2573_v49 }
 0xd83   : > { %v2576_v11 = vpop.xlane.xlu1 %2575 }
 0xd84   : > { %v2587_v44 = vmul.f32 1.442695, %v2583_v7  ;;  %v2584_v53 = vsub.f32 %v2516_v54, %v2576_v11 }
 0xd86   : > { %5628 = vpow2.f32 %v2587_v44  ;;  %v2589_v5 = vmul.f32 1.442695, %v2584_v53 }
 0xd88   : > { %5630 = vpow2.f32 %v2589_v5 }
 0xd90   : > { %v5629_v60 = vpop.eup %5628 }
 0xd91   : > { %v2595_v1 = vsel %vm1114_vm1, %v5629_v60, 0.0 }
 0xd92   : > { %v5631_v41 = vpop.eup %5630  ;;  %2596 = vadd.xlane.f32.xlu0 %v2595_v1 }
 0xd93   : > { %v2598_v31 = vsel %vm1114_vm1, %v5631_v41, 0.0 }
 0xd94   : > { %2599 = vadd.xlane.f32.xlu1 %v2598_v31  ;;  %v2579_v53 = vpop.xlane.xlu0 %2578 }
 0xd95   : > { %v2585_v5 = vsub.f32 %v2564_v32, %v2579_v53 }
 0xd97   : > { %v2591_v54 = vmul.f32 1.442695, %v2585_v5 }
 0xd98   : > { %v2582_v62 = vpop.xlane.xlu0 %2581 }
 0xd99   : > { %v2586_v50 = vsub.f32 %v2567_v13, %v2582_v62  ;;  %5632 = vpow2.f32 %v2591_v54 }
 0xd9b   : > { %v2593_v42 = vmul.f32 1.442695, %v2586_v50 }
 0xd9d   : > { %5634 = vpow2.f32 %v2593_v42 }
 0xda3   : > { %v5633_v56 = vpop.eup %5632 }
 0xda4   : > { %v2601_v31 = vsel %vm1114_vm1, %v5633_v56, 0.0 }
 0xda5   : > { %2664 = vrot.lane.b32.xlu1 %v6364_v38, %s5750_s25 }
 0xda7   : > { %v5635_v49 = vpop.eup %5634 }
 0xda8   : > { %2617 = vrot.lane.b32.xlu0 %v6354_v33, %s5750_s25  ;;  %v2604_v7 = vsel %vm1114_vm1, %v5635_v49, 0.0 }
 0xda9   : > { %2713 = vrot.lane.b32.xlu1 %v6324_v20, %s5751_s26 }
 0xdc7   : > { %2602 = vadd.xlane.f32.xlu0 %v2601_v31 }
 0xdcd   : > { %2605 = vadd.xlane.f32.xlu1 %v2604_v7 }
 0xddd   : > { %2764 = vrot.lane.b32.xlu0 %v6335_v27, %s5751_s26 }
 0xdde   : > { %2711 = vrot.lane.b32.xlu1 %v6308_v9, %s5751_s26 }
 0xde2   : > { %2762 = vrot.lane.b32.xlu1 %v6316_v14, %s5751_s26 }
 0xe1f   : > { %v2597_v32 = vpop.xlane.xlu0 %2596 }
 0xe20   : > { %5636 = vrcp.f32 %v2597_v32 }
 0xe21   : > { %v2600_v13 = vpop.xlane.xlu1 %2599 }
 0xe22   : > { %5638 = vrcp.f32 %v2600_v13 }
 0xe23   : > { %v2618_v11 = vpop.permute.xlu0 %2617 }
 0xe24   : > { %5138 = vmatpush3.bf16.msra.mxu1 %v2618_v11 }
 0xe25   : > { %v2665_v44 = vpop.permute.xlu1 %2664  ;;  %5149 = vmatprep.subr.bf16.mxu1 %v7263_v6 }
 0xe26   : > { %5144 = vmatpush3.bf16.msra.mxu0 %v2665_v44 }
 0xe27   : > { %5155 = vmatprep.subr.bf16.mxu0 %v7263_v6 }
 0xe29   : > { %v2714_v54 = vpop.permute.xlu1 %2713 }
 0xe2a   : > { %v5637_v1 = vpop.eup %5636  ;;  %v2719_v42 = vsel %vm1508_vm3, %v2714_v54, 0 }
 0xe2b   : > { %v2608_v5 = vmul.f32 %v5637_v1, %v5629_v60 }
 0xe2c   : > { %v5639_v53 = vpop.eup %5638 }
 0xe2d   : > { %v2610_v62 = vmul.f32 %v5639_v53, %v5631_v41 }
 0xe2f   : > { %v2615_v50 = vpack.c.bf16 %v2610_v62, %v2608_v5 }
 0xe31   : > { %5140 = vmatmul.mubr.msk.bf16.vlgmr.msra.gmra.mrb[52].mxu1 %vm1114_vm1, %v2615_v50 }
 0xe32   : > { %5150 = vmatpush3.bf16.xpose.msra.mxu1 %v2719_v42  ;;  %5151 = vmatprep.mubr.msk.bf16.mxu1 %vm5746_vm2, %v7263_v6 }
 0xe33   : > { %5161 = vmatprep.subr.bf16.mxu1 %v7263_v6 }
 0xe54   : > { %v2603_v31 = vpop.xlane.xlu0 %2602 }
 0xe55   : > { %5640 = vrcp.f32 %v2603_v31 }
 0xe58   : > { %v2765_v44 = vpop.permute.xlu0 %2764 }
 0xe59   : > { %v2770_v53 = vsel %vm1508_vm3, %v2765_v44, 0 }
 0xe5a   : > { %v2606_v7 = vpop.xlane.xlu1 %2605 }
 0xe5b   : > { %5642 = vrcp.f32 %v2606_v7 }
 0xe5e   : > { %v2712_v32 = vpop.permute.xlu1 %2711 }
 0xe5f   : > { %5152 = vmatmul.mubr.msk.bf16.vlgmr.msra.gmra.mrb[56].mxu1 %vm1508_vm3, %v2712_v32  ;;  %v5641_v60 = vpop.eup %5640 }
 0xe60   : > { %5163 = vmatprep.mubr.msk.bf16.mxu1 %vm5746_vm2, %v7263_v6  ;;  %v2612_v13 = vmul.f32 %v5641_v60, %v5633_v56 }
 0xe62   : > { %v2763_v5 = vpop.permute.xlu1 %2762 }
 0xe65   : > { %v5643_v41 = vpop.eup %5642 }
 0xe66   : > { %v2614_v11 = vmul.f32 %v5643_v41, %v5635_v49 }
 0xe68   : > { %v2616_v1 = vpack.c.bf16 %v2614_v11, %v2612_v13 }
 0xe6a   : > { %5146 = vmatmul.mubr.msk.bf16.vlgmr.msra.gmra.mrb[52].mxu0 %vm1114_vm1, %v2616_v1 }
 0xe6b   : > { %5156 = vmatpush3.bf16.xpose.msra.mxu0 %v2770_v53  ;;  %5157 = vmatprep.mubr.msk.bf16.mxu0 %vm5746_vm2, %v7263_v6 }
 0xe6c   : > { %5167 = vmatprep.subr.bf16.mxu0 %v7263_v6 }
 0xe72   : > { %5158 = vmatmul.mubr.msk.bf16.vlgmr.msra.gmra.mrb[56].mxu0 %vm1508_vm3, %v2763_v5 }
 0xe73   : > { %5169 = vmatprep.mubr.msk.bf16.mxu0 %vm5746_vm2, %v7263_v6 }
 0xf04   : > { %v6600_v56 = vpop.f32.mrb[52].mxu1 }
 0xf05   : > { %v5141_v49 = vpop.f32.mrb[53].mxu1 }
 0xf06   : > { %v6602_v62 = vpop.f32.mrb[54].mxu1 }
 0xf07   : > { %v5142_v50 = vpop.f32.mrb[55].mxu1 }
 0xf32   : > { %v2755_v42 = vpop.f32.mrb[56].mxu1 }
 0xf33   : > { %v5153_v31 = vpop.f32.mrb[57].mxu1  ;;  %v2813_v7 = vsel %vm1114_vm1, %v2755_v42, -inf }
 0xf34   : > { %2814 = vmax.xlane.f32.xlu0 %v2813_v7  ;;  %v2758_v32 = vpop.f32.mrb[58].mxu1 }
 0xf35   : > { %v5154_v60 = vpop.f32.mrb[59].mxu1  ;;  %v2816_v41 = vsel %vm1114_vm1, %v2758_v32, -inf }
 0xf36   : > { %2817 = vmax.xlane.f32.xlu1 %v2816_v41 }
 0xf3d   : > { %v6608_v13 = vpop.f32.mrb[52].mxu0 }
 0xf3e   : > { %v5147_v11 = vpop.f32.mrb[53].mxu0 }
 0xf3f   : > { %v6610_v44 = vpop.f32.mrb[54].mxu0 }
 0xf40   : > { %v5148_v53 = vpop.f32.mrb[55].mxu0 }
 0xf45   : > { %v2806_v5 = vpop.f32.mrb[56].mxu0 }
 0xf46   : > { %v5159_v49 = vpop.f32.mrb[57].mxu0  ;;  %v2819_v50 = vsel %vm1114_vm1, %v2806_v5, -inf }
 0xf47   : > { %v2809_v31 = vpop.f32.mrb[58].mxu0  ;;  %2820 = vmax.xlane.f32.xlu0 %v2819_v50 }
 0xf48   : > { %v5160_v7 = vpop.f32.mrb[59].mxu0  ;;  %v2822_v60 = vsel %vm1114_vm1, %v2809_v31, -inf }
 0xf4b   : > { %2823 = vmax.xlane.f32.xlu0 %v2822_v60 }
 0xfc1   : > { %v2815_v41 = vpop.xlane.xlu0 %2814 }
 0xfc2   : > { %v2825_v52 = vsub.f32 %v2755_v42, %v2815_v41 }
 0xfc3   : > { %v2818_v54 = vpop.xlane.xlu1 %2817 }
 0xfc4   : > { %v2829_v11 = vmul.f32 1.442695, %v2825_v52  ;;  %v2826_v58 = vsub.f32 %v2758_v32, %v2818_v54 }
 0xfc6   : > { %5644 = vpow2.f32 %v2829_v11  ;;  %v2831_v35 = vmul.f32 1.442695, %v2826_v58 }
 0xfc8   : > { %5646 = vpow2.f32 %v2831_v35 }
 0xfd0   : > { %v5645_v1 = vpop.eup %5644 }
 0xfd1   : > { %v2837_v53 = vsel %vm1114_vm1, %v5645_v1, 0.0 }
 0xfd2   : > { %v5647_v49 = vpop.eup %5646  ;;  %2838 = vadd.xlane.f32.xlu0 %v2837_v53 }
 0xfd3   : > { %v2840_v40 = vsel %vm1114_vm1, %v5647_v49, 0.0 }
 0xfd4   : > { %2841 = vadd.xlane.f32.xlu1 %v2840_v40  ;;  %v2821_v58 = vpop.xlane.xlu0 %2820 }
 0xfd5   : > { %v2827_v35 = vsub.f32 %v2806_v5, %v2821_v58 }
 0xfd7   : > { %v2833_v54 = vmul.f32 1.442695, %v2827_v35 }
 0xfd8   : > { %v2824_v52 = vpop.xlane.xlu0 %2823 }
 0xfd9   : > { %v2828_v42 = vsub.f32 %v2809_v31, %v2824_v52  ;;  %5648 = vpow2.f32 %v2833_v54 }
 0xfdb   : > { %v2835_v32 = vmul.f32 1.442695, %v2828_v42 }
 0xfdd   : > { %5650 = vpow2.f32 %v2835_v32 }
 0xfe3   : > { %v5649_v50 = vpop.eup %5648 }
 0xfe4   : > { %v2843_v40 = vsel %vm1114_vm1, %v5649_v50, 0.0 }
 0xfe5   : > { %2906 = vrot.lane.b32.xlu1 %v6364_v38, %s5751_s26 }
 0xfe7   : > { %v5651_v7 = vpop.eup %5650 }
 0xfe8   : > { %2859 = vrot.lane.b32.xlu0 %v6354_v33, %s5751_s26  ;;  %v2846_v60 = vsel %vm1114_vm1, %v5651_v7, 0.0  ;;  %s7284_s26 = smul.u32 24, %s7286_s20 }
 0xfe9   : > { %2955 = vrot.lane.b32.xlu1 %v6324_v20, %s5752_s27 }
0x1007   : > { %2844 = vadd.xlane.f32.xlu0 %v2843_v40 }
0x100d   : > { %2847 = vadd.xlane.f32.xlu1 %v2846_v60 }
0x101d   : > { %3006 = vrot.lane.b32.xlu0 %v6335_v27, %s5752_s27 }
0x101e   : > { %2953 = vrot.lane.b32.xlu1 %v6308_v9, %s5752_s27 }
0x1022   : > { %3004 = vrot.lane.b32.xlu1 %v6316_v14, %s5752_s27 }
0x105f   : > { %v2839_v5 = vpop.xlane.xlu0 %2838 }
0x1060   : > { %5652 = vrcp.f32 %v2839_v5 }
0x1061   : > { %v2842_v31 = vpop.xlane.xlu1 %2841 }
0x1062   : > { %5654 = vrcp.f32 %v2842_v31 }
0x1063   : > { %v2860_v41 = vpop.permute.xlu0 %2859 }
0x1064   : > { %5162 = vmatpush3.bf16.msra.mxu1 %v2860_v41 }
0x1065   : > { %v2907_v11 = vpop.permute.xlu1 %2906  ;;  %5173 = vmatprep.subr.bf16.mxu1 %v7263_v6 }
0x1066   : > { %5168 = vmatpush3.bf16.msra.mxu0 %v2907_v11 }
0x1067   : > { %5179 = vmatprep.subr.bf16.mxu0 %v7263_v6 }
0x1069   : > { %v2956_v54 = vpop.permute.xlu1 %2955 }
0x106a   : > { %v5653_v53 = vpop.eup %5652  ;;  %v2961_v32 = vsel %vm1508_vm3, %v2956_v54, 0 }
0x106b   : > { %v2850_v35 = vmul.f32 %v5653_v53, %v5645_v1 }
0x106c   : > { %v5655_v58 = vpop.eup %5654 }
0x106d   : > { %v2852_v52 = vmul.f32 %v5655_v58, %v5647_v49 }
0x106f   : > { %v2857_v42 = vpack.c.bf16 %v2852_v52, %v2850_v35 }
0x1071   : > { %5164 = vmatmul.mubr.msk.bf16.vlgmr.msra.gmra.mrb[60].mxu1 %vm1114_vm1, %v2857_v42 }
0x1072   : > { %5174 = vmatpush3.bf16.xpose.msra.mxu1 %v2961_v32  ;;  %5175 = vmatprep.mubr.msk.bf16.mxu1 %vm5746_vm2, %v7263_v6 }
0x1073   : > { %5185 = vmatprep.subr.bf16.mxu1 %v7263_v6 }
0x1094   : > { %v2845_v40 = vpop.xlane.xlu0 %2844 }
0x1095   : > { %5656 = vrcp.f32 %v2845_v40 }
0x1098   : > { %v3007_v11 = vpop.permute.xlu0 %3006 }
0x1099   : > { %v3012_v58 = vsel %vm1508_vm3, %v3007_v11, 0 }
0x109a   : > { %v2848_v60 = vpop.xlane.xlu1 %2847 }
0x109b   : > { %5658 = vrcp.f32 %v2848_v60 }
0x109e   : > { %v2954_v5 = vpop.permute.xlu1 %2953 }
0x109f   : > { %5176 = vmatmul.mubr.msk.bf16.vlgmr.msra.gmra.mrb[64].mxu1 %vm1508_vm3, %v2954_v5  ;;  %v5657_v1 = vpop.eup %5656 }
0x10a0   : > { %5187 = vmatprep.mubr.msk.bf16.mxu1 %vm5746_vm2, %v7263_v6  ;;  %v2854_v31 = vmul.f32 %v5657_v1, %v5649_v50 }
0x10a2   : > { %v3005_v35 = vpop.permute.xlu1 %3004 }
0x10a5   : > { %v5659_v49 = vpop.eup %5658 }
0x10a6   : > { %v2856_v41 = vmul.f32 %v5659_v49, %v5651_v7 }
0x10a8   : > { %v2858_v53 = vpack.c.bf16 %v2856_v41, %v2854_v31 }
0x10aa   : > { %5170 = vmatmul.mubr.msk.bf16.vlgmr.msra.gmra.mrb[60].mxu0 %vm1114_vm1, %v2858_v53 }
0x10ab   : > { %5180 = vmatpush3.bf16.xpose.msra.mxu0 %v3012_v58  ;;  %5181 = vmatprep.mubr.msk.bf16.mxu0 %vm5746_vm2, %v7263_v6 }
0x10ac   : > { %5191 = vmatprep.subr.bf16.mxu0 %v7263_v6 }
0x10b2   : > { %5182 = vmatmul.mubr.msk.bf16.vlgmr.msra.gmra.mrb[64].mxu0 %vm1508_vm3, %v3005_v35 }
0x10b3   : > { %5193 = vmatprep.mubr.msk.bf16.mxu0 %vm5746_vm2, %v7263_v6 }
0x1144   : > { %v6650_v50 = vpop.f32.mrb[60].mxu1 }
0x1145   : > { %v5165_v7 = vpop.f32.mrb[61].mxu1 }
0x1146   : > { %v6652_v52 = vpop.f32.mrb[62].mxu1 }
0x1147   : > { %v5166_v42 = vpop.f32.mrb[63].mxu1 }
0x1172   : > { %v2997_v32 = vpop.f32.mrb[64].mxu1 }
0x1173   : > { %v5177_v40 = vpop.f32.mrb[65].mxu1  ;;  %v3055_v60 = vsel %vm1114_vm1, %v2997_v32, -inf }
0x1174   : > { %3056 = vmax.xlane.f32.xlu0 %v3055_v60  ;;  %v3000_v5 = vpop.f32.mrb[66].mxu1 }
0x1175   : > { %v5178_v1 = vpop.f32.mrb[67].mxu1  ;;  %v3058_v49 = vsel %vm1114_vm1, %v3000_v5, -inf }
0x1176   : > { %3059 = vmax.xlane.f32.xlu1 %v3058_v49 }
0x117d   : > { %v6658_v31 = vpop.f32.mrb[60].mxu0 }
0x117e   : > { %v5171_v41 = vpop.f32.mrb[61].mxu0 }
0x117f   : > { %v6660_v11 = vpop.f32.mrb[62].mxu0 }
0x1180   : > { %v5172_v58 = vpop.f32.mrb[63].mxu0 }
0x1185   : > { %v3048_v35 = vpop.f32.mrb[64].mxu0 }
0x1186   : > { %v5183_v7 = vpop.f32.mrb[65].mxu0  ;;  %v3061_v42 = vsel %vm1114_vm1, %v3048_v35, -inf }
0x1187   : > { %v3051_v40 = vpop.f32.mrb[66].mxu0  ;;  %3062 = vmax.xlane.f32.xlu0 %v3061_v42 }
0x1188   : > { %v5184_v60 = vpop.f32.mrb[67].mxu0  ;;  %v3064_v1 = vsel %vm1114_vm1, %v3051_v40, -inf }
0x118b   : > { %3065 = vmax.xlane.f32.xlu0 %v3064_v1 }
0x1201   : > { %v3057_v49 = vpop.xlane.xlu0 %3056 }
0x1202   : > { %v3067_v54 = vsub.f32 %v2997_v32, %v3057_v49 }
0x1203   : > { %v3060_v46 = vpop.xlane.xlu1 %3059 }
0x1204   : > { %v3071_v41 = vmul.f32 1.442695, %v3067_v54  ;;  %v3068_v6 = vsub.f32 %v3000_v5, %v3060_v46  ;;  %v7269_v5 = vmov 0.0  }
0x1206   : > { %5660 = vpow2.f32 %v3071_v41  ;;  %v3073_v4 = vmul.f32 1.442695, %v3068_v6 }
0x1208   : > { %5662 = vpow2.f32 %v3073_v4 }
0x1210   : > { %v5661_v53 = vpop.eup %5660 }
0x1211   : > { %v3079_v58 = vsel %vm1114_vm1, %v5661_v53, 0.0 }
0x1212   : > { %v5663_v7 = vpop.eup %5662  ;;  %3080 = vadd.xlane.f32.xlu0 %v3079_v58 }
0x1213   : > { %v3082_v29 = vsel %vm1114_vm1, %v5663_v7, 0.0 }
0x1214   : > { %3083 = vadd.xlane.f32.xlu1 %v3082_v29  ;;  %v3063_v6 = vpop.xlane.xlu0 %3062 }
0x1215   : > { %v3069_v4 = vsub.f32 %v3048_v35, %v3063_v6 }
0x1217   : > { %v3075_v18 = vmul.f32 1.442695, %v3069_v4 }
0x1218   : > { %v3066_v21 = vpop.xlane.xlu0 %3065 }
0x1219   : > { %5664 = vpow2.f32 %v3075_v18 }
0x1225   : > { %3203 = vrot.lane.b32.xlu1 %v6324_v20, %s5753_s28  ;;  %v7267_v20 = vpack.c.bf16 %v6337_v28, %v6333_v25 }
0x1228   : > { %3101 = vrot.lane.b32.xlu0 %v6354_v33, %s5752_s27 }
0x1229   : > { %3205 = vrot.lane.b32.xlu1 %v1340_v22, %s5753_s28  ;;  %v3070_v22 = vsub.f32 %v3051_v40, %v3066_v21 }
0x122b   : > { %v3077_v29 = vmul.f32 1.442695, %v3070_v22 }
0x122c   : > { %3196 = vrot.lane.b32.xlu0 %v6308_v9, %s5753_s28  ;;  %v5665_v9 = vpop.eup %5664 }
0x122d   : > { %3148 = vrot.lane.b32.xlu1 %v6364_v38, %s5752_s27  ;;  %v3085_v46 = vsel %vm1114_vm1, %v5665_v9, 0.0  ;;  %5666 = vpow2.f32 %v3077_v29 }
0x1231   : > { %3198 = vrot.lane.b32.xlu1 %v1175_v48, %s5753_s28 }
0x1235   : > { %3264 = vrot.lane.b32.xlu1 %v7267_v20, %s5753_s28 }
0x1237   : > { %v5667_v54 = vpop.eup %5666 }
0x1238   : > { %v3088_v0 = vsel %vm1114_vm1, %v5667_v54, 0.0 }
0x124b   : > { %3086 = vadd.xlane.f32.xlu0 %v3085_v46 }
0x1259   : > { %3089 = vadd.xlane.f32.xlu1 %v3088_v0 }
0x1261   : > { %3262 = vrot.lane.b32.xlu0 %v6335_v27, %s5753_s28 }
0x1265   : > { %3256 = vrot.lane.b32.xlu0 %v6316_v14, %s5753_s28 }
0x126a   : > { %3258 = vrot.lane.b32.xlu1 %v7268_v10, %s5753_s28 }
0x129f   : > { %v3081_v48 = vpop.xlane.xlu0 %3080 }
0x12a0   : > { %5668 = vrcp.f32 %v3081_v48 }
0x12a1   : > { %v3084_v25 = vpop.xlane.xlu1 %3083 }
0x12a2   : > { %5670 = vrcp.f32 %v3084_v25 }
0x12a3   : > { %v3102_v28 = vpop.permute.xlu0 %3101 }
0x12a4   : > { %5186 = vmatpush3.bf16.msra.mxu1 %v3102_v28 }
0x12a5   : > { %v3204_v32 = vpop.permute.xlu1 %3203  ;;  %5197 = vmatprep.subr.bf16.mxu1 %v7269_v5 }
0x12a9   : > { %v3206_v35 = vpop.permute.xlu1 %3205 }
0x12aa   : > { %v5669_v42 = vpop.eup %5668  ;;  %v3207_v1 = vsel %vm3200_vm4, %v3204_v32, %v3206_v35 }
0x12ab   : > { %v3092_v40 = vmul.f32 %v5669_v42, %v5661_v53  ;;  %v3212_v51 = vsel %vm1508_vm3, %v3207_v1, 0  ;;  %v3197_v53 = vpop.permute.xlu0 %3196 }
0x12ac   : > { %v5671_v27 = vpop.eup %5670 }
0x12ad   : > { %v3094_v14 = vmul.f32 %v5671_v27, %v5663_v7  ;;  %v3149_v60 = vpop.permute.xlu1 %3148 }
0x12ae   : > { %5192 = vmatpush3.bf16.msra.mxu0 %v3149_v60 }
0x12af   : > { %v3099_v12 = vpack.c.bf16 %v3094_v14, %v3092_v40  ;;  %5203 = vmatprep.subr.bf16.mxu0 %v7269_v5 }
0x12b1   : > { %5188 = vmatmul.mubr.msk.bf16.vlgmr.msra.gmra.mrb[68].mxu1 %vm1114_vm1, %v3099_v12  ;;  %v3199_v49 = vpop.permute.xlu1 %3198 }
0x12b2   : > { %5198 = vmatpush3.bf16.xpose.msra.mxu1 %v3212_v51  ;;  %5199 = vmatprep.mubr.msk.bf16.mxu1 %vm5746_vm2, %v7269_v5  ;;  %v3201_v41 = vsel %vm3200_vm4, %v3197_v53, %v3199_v49 }
0x12b3   : > { %5209 = vmatprep.subr.bf16.mxu1 %v7269_v5 }
0x12b5   : > { %v3265_v58 = vpop.permute.xlu1 %3264 }
0x12b9   : > { %5200 = vmatmul.mubr.msk.bf16.vlgmr.msra.gmra.mrb[72].mxu1 %vm1508_vm3, %v3201_v41 }
0x12ba   : > { %5211 = vmatprep.mubr.msk.bf16.mxu1 %vm5746_vm2, %v7269_v5 }
0x12d8   : > { %v3087_v7 = vpop.xlane.xlu0 %3086 }
0x12d9   : > { %5672 = vrcp.f32 %v3087_v7 }
0x12dc   : > { %v3263_v20 = vpop.permute.xlu0 %3262 }
0x12dd   : > { %v3266_v29 = vsel %vm3200_vm4, %v3263_v20, %v3265_v58 }
0x12de   : > { %v3271_v0 = vsel %vm1508_vm3, %v3266_v29, 0 }
0x12e0   : > { %v3257_v48 = vpop.permute.xlu0 %3256 }
0x12e3   : > { %v5673_v4 = vpop.eup %5672 }
0x12e4   : > { %v3096_v21 = vmul.f32 %v5673_v4, %v5665_v9 }
0x12e6   : > { %v3090_v6 = vpop.xlane.xlu1 %3089 }
0x12e7   : > { %5674 = vrcp.f32 %v3090_v6 }
0x12ea   : > { %v3259_v10 = vpop.permute.xlu1 %3258 }
0x12eb   : > { %v3260_v25 = vsel %vm3200_vm4, %v3257_v48, %v3259_v10 }
0x12f1   : > { %v5675_v18 = vpop.eup %5674 }
0x12f2   : > { %v3098_v22 = vmul.f32 %v5675_v18, %v5667_v54 }
0x12f4   : > { %v3100_v46 = vpack.c.bf16 %v3098_v22, %v3096_v21 }
0x12f6   : > { %5194 = vmatmul.mubr.msk.bf16.vlgmr.msra.gmra.mrb[68].mxu0 %vm1114_vm1, %v3100_v46 }
0x12f7   : > { %5204 = vmatpush3.bf16.xpose.msra.mxu0 %v3271_v0  ;;  %5205 = vmatprep.mubr.msk.bf16.mxu0 %vm5746_vm2, %v7269_v5 }
0x12f8   : > { %5215 = vmatprep.subr.bf16.mxu0 %v7269_v5 }
0x12fe   : > { %5206 = vmatmul.mubr.msk.bf16.vlgmr.msra.gmra.mrb[72].mxu0 %vm1508_vm3, %v3260_v25 }
0x12ff   : > { %5217 = vmatprep.mubr.msk.bf16.mxu0 %vm5746_vm2, %v7269_v5 }
0x1384   : > { %v6720_v9 = vpop.f32.mrb[68].mxu1 }
0x1385   : > { %v5189_v54 = vpop.f32.mrb[69].mxu1 }
0x1386   : > { %v6722_v28 = vpop.f32.mrb[70].mxu1 }
0x1387   : > { %v5303_v32 = vpack.i.bf16 %v6722_v28, %v6720_v9  ;;  %v5190_v35 = vpop.f32.mrb[71].mxu1 }
0x1388   : > { %v7270_v35 = vpack.c.bf16 %v6356_v34, %v6352_v47  ;;  %v7271_v47 = vpack.c.bf16 %v6366_v39, %v6362_v36  ;;  %v7272_v34 = vpack.i.bf16 %v6502_v37, %v6500_v17  ;;  %v7274_v36 = vpack.i.bf16 %v6602_v62, %v6600_v56 }
0x1389   : > { %v7276_v39 = vpack.i.bf16 %v6652_v52, %v6650_v50  ;;  %v7279_v17 = vpack.i.bf16 %v6660_v11, %v6658_v31 }
0x138c   : > { %v3248_v42 = vpop.f32.mrb[72].mxu1 }
0x138d   : > { %v5201_v27 = vpop.f32.mrb[73].mxu1  ;;  %v3314_v40 = vsel %vm1114_vm1, %v3248_v42, -inf }
0x138e   : > { %3315 = vmax.xlane.f32.xlu0 %v3314_v40  ;;  %v3251_v14 = vpop.f32.mrb[74].mxu1 }
0x138f   : > { %v5202_v60 = vpop.f32.mrb[75].mxu1  ;;  %v3317_v1 = vsel %vm1114_vm1, %v3251_v14, -inf }
0x1390   : > { %3318 = vmax.xlane.f32.xlu1 %v3317_v1 }
0x13c9   : > { %v6728_v5 = vpop.f32.mrb[68].mxu0 }
0x13ca   : > { %v5195_v12 = vpop.f32.mrb[69].mxu0 }
0x13cb   : > { %v6730_v51 = vpop.f32.mrb[70].mxu0 }
0x13cc   : > { %v5338_v49 = vpack.i.bf16 %v6730_v51, %v6728_v5  ;;  %v5196_v53 = vpop.f32.mrb[71].mxu0 }
0x13d1   : > { %v3307_v41 = vpop.f32.mrb[72].mxu0 }
0x13d2   : > { %v5207_v58 = vpop.f32.mrb[73].mxu0  ;;  %v3320_v7 = vsel %vm1114_vm1, %v3307_v41, -inf }
0x13d3   : > { %3321 = vmax.xlane.f32.xlu0 %v3320_v7  ;;  %v3310_v6 = vpop.f32.mrb[74].mxu0 }
0x13d4   : > { %v5208_v4 = vpop.f32.mrb[75].mxu0  ;;  %v3323_v20 = vsel %vm1114_vm1, %v3310_v6, -inf }
0x13d7   : > { %3324 = vmax.xlane.f32.xlu0 %v3323_v20 }
0x141b   : > { %v3316_v18 = vpop.xlane.xlu0 %3315 }
0x141c   : > { %v3326_v21 = vsub.f32 %v3248_v42, %v3316_v18 }
0x141d   : > { %v3319_v22 = vpop.xlane.xlu1 %3318 }
0x141e   : > { %v3330_v29 = vmul.f32 1.442695, %v3326_v21  ;;  %v3327_v46 = vsub.f32 %v3251_v14, %v3319_v22  ;;  %v5483_v21 = vld [vmem:[%s7252_s7] ss:$12 sps:$4 sm:$0xff]   ;;  %v5485_v22 = vld [vmem:[%s7252_s7 + $0x4] ss:$12 sps:$4 sm:$0xff]  }
0x1420   : > { %5676 = vpow2.f32 %v3330_v29  ;;  %v3332_v0 = vmul.f32 1.442695, %v3327_v46  ;;  %v5486_v29 = vld [vmem:[%s7252_s7 + $0x8] ss:$12 sps:$4 sm:$0xff]  }
0x1421   : > { %v5489_v46 = vld [vmem:[%s7252_s7 + $0x1c] ss:$12 sps:$4 sm:$0xff]  }
0x1422   : > { %5678 = vpow2.f32 %v3332_v0  ;;  %v5490_v0 = vld [vmem:[%s7252_s7 + $0x20] ss:$12 sps:$4 sm:$0xff]  }
0x142a   : > { %v5677_v10 = vpop.eup %5676 }
0x142b   : > { %v3338_v48 = vsel %vm1114_vm1, %v5677_v10, 0.0 }
0x142c   : > { %v5679_v25 = vpop.eup %5678  ;;  %3339 = vadd.xlane.f32.xlu0 %v3338_v48  ;;  %v5493_v48 = vld [vmem:[%s7252_s7 + $0x34] ss:$12 sps:$4 sm:$0xff]  }
0x142d   : > { %v3341_v54 = vsel %vm1114_vm1, %v5679_v25, 0.0 }
0x142e   : > { %3342 = vadd.xlane.f32.xlu1 %v3341_v54  ;;  %v5491_v54 = vld [vmem:[%s7252_s7 + $0x30] ss:$12 sps:$4 sm:$0xff]  }
0x143f   : > { %3363 = vrot.lane.b32.xlu1 %v7270_v35, %s5753_s28  ;;  %v5497_v35 = vld [vmem:[%s7252_s7 + $0x4c] ss:$12 sps:$4 sm:$0xff]  }
0x1443   : > { %3412 = vrot.lane.b32.xlu1 %v6364_v38, %s5753_s28  ;;  %v7273_v38 = vpack.i.bf16 %v6452_v57, %v6450_v55  ;;  %v7277_v55 = vpack.i.bf16 %v6460_v30, %v6458_v19  ;;  %v7278_v57 = vpack.i.bf16 %v6560_v24, %v6558_v43 }
0x1460   : > { %v3322_v42 = vpop.xlane.xlu0 %3321 }
0x1461   : > { %v3328_v27 = vsub.f32 %v3307_v41, %v3322_v42  ;;  %v5498_v42 = vld [vmem:[%s7252_s7 + $0x50] ss:$12 sps:$4 sm:$0xff]  }
0x1463   : > { %v3334_v40 = vmul.f32 1.442695, %v3328_v27  ;;  %v5495_v27 = vld [vmem:[%s7252_s7 + $0x48] ss:$12 sps:$4 sm:$0xff]  }
0x1464   : > { %v3325_v14 = vpop.xlane.xlu0 %3324 }
0x1465   : > { %5680 = vpow2.f32 %v3334_v40  ;;  %v3329_v60 = vsub.f32 %v3310_v6, %v3325_v14  ;;  %v5501_v40 = vld [vmem:[%s7252_s7 + $0x64] ss:$12 sps:$4 sm:$0xff]   ;;  %v5502_v14 = vld [vmem:[%s7252_s7 + $0x68] ss:$12 sps:$4 sm:$0xff]  }
0x1467   : > { %v3336_v1 = vmul.f32 1.442695, %v3329_v60  ;;  %v5499_v60 = vld [vmem:[%s7252_s7 + $0x60] ss:$12 sps:$4 sm:$0xff]  }
0x1469   : > { %5682 = vpow2.f32 %v3336_v1  ;;  %v5505_v1 = vld [vmem:[%s7252_s7 + $0x7c] ss:$12 sps:$4 sm:$0xff]  }
0x146f   : > { %v5681_v12 = vpop.eup %5680 }
0x1470   : > { %v3344_v53 = vsel %vm1114_vm1, %v5681_v12, 0.0 }
0x1471   : > { %3345 = vadd.xlane.f32.xlu0 %v3344_v53  ;;  %v5503_v53 = vld [vmem:[%s7252_s7 + $0x78] ss:$12 sps:$4 sm:$0xff]  }
0x1473   : > { %v5683_v58 = vpop.eup %5682 }
0x1474   : > { %v3347_v7 = vsel %vm1114_vm1, %v5683_v58, 0.0 }
0x1475   : > { %3348 = vadd.xlane.f32.xlu1 %v3347_v7  ;;  %v5510_v7 = vld [vmem:[%s7252_s7 + $0x98] ss:$12 sps:$4 sm:$0xff]  }
0x1486   : > { %3414 = vrot.lane.b32.xlu1 %v7271_v47, %s5753_s28  ;;  %v5507_v47 = vld [vmem:[%s7252_s7 + $0x90] ss:$12 sps:$4 sm:$0xff]  }
0x1487   : > { %3361 = vrot.lane.b32.xlu0 %v6354_v33, %s5753_s28  ;;  %v7275_v33 = vpack.i.bf16 %v6552_v63, %v6550_v8  ;;  %s5760_s28 = smov 126  }
0x148a   : > { %5284 = vrot.lane.b32.xlu1 %v7272_v34, %s5754_s29  ;;  %v5513_v34 = vld [vmem:[%s7252_s7 + $0xac] ss:$12 sps:$4 sm:$0xff]  }
0x148b   : > { %5279 = vrot.lane.b32.xlu0 %v7273_v38, %s5755_s30  ;;  %v5514_v38 = vld [vmem:[%s7252_s7 + $0xb0] ss:$12 sps:$4 sm:$0xff]  }
0x148e   : > { %5294 = vrot.lane.b32.xlu1 %v7274_v36, %s5756_s16  ;;  %v5511_v36 = vld [vmem:[%s7252_s7 + $0xa8] ss:$12 sps:$4 sm:$0xff]  }
0x148f   : > { %5289 = vrot.lane.b32.xlu0 %v7275_v33, %s5757_s17  ;;  %v5517_v33 = vld [vmem:[%s7252_s7 + $0xc4] ss:$12 sps:$4 sm:$0xff]  }
0x1492   : > { %5304 = vrot.lane.b32.xlu1 %v5303_v32, %s7266_s19  ;;  %v7280_v32 = vmov 0  }
0x1493   : > { %5299 = vrot.lane.b32.xlu0 %v7276_v39, %s5759_s22  ;;  %v5515_v39 = vld [vmem:[%s7252_s7 + $0xc0] ss:$12 sps:$4 sm:$0xff]  }
0x1496   : > { %5314 = vrot.lane.b32.xlu1 %v7277_v55, %s5755_s30  ;;  %v5518_v55 = vld [vmem:[%s7252_s7 + $0xc8] ss:$12 sps:$4 sm:$0xff]   ;;  %s7283_s30 = smov 108  }
0x149a   : > { %5324 = vrot.lane.b32.xlu1 %v7278_v57, %s5757_s17 }
0x149e   : > { %5334 = vrot.lane.b32.xlu1 %v7279_v17, %s5759_s22 }
0x14b9   : > { %v3340_v8 = vpop.xlane.xlu0 %3339 }
0x14bb   : > { %v3343_v37 = vpop.xlane.xlu1 %3342 }
0x14bc   : > { %5684 = vrcp.f32 %v3343_v37 }
0x14bd   : > { %5686 = vrcp.f32 %v3340_v8 }
0x14bf   : > { %v3364_v63 = vpop.permute.xlu1 %3363 }
0x14c3   : > { %v3413_v62 = vpop.permute.xlu1 %3412 }
0x14c6   : > { %v5685_v56 = vpop.eup %5684 }
0x14c7   : > { %v5687_v52 = vpop.eup %5686  ;;  %v3353_v9 = vmul.f32 %v5685_v56, %v5679_v25  ;;  %v5494_v25 = vld [vmem:[%s7252_s7 + $0x38] ss:$12 sps:$4 sm:$0xff]   ;;  %v7281_v56 = vpack.i.bf16 %v6510_v2, %v6508_v45 }
0x14c8   : > { %v3351_v28 = vmul.f32 %v5687_v52, %v5677_v10  ;;  %v5487_v10 = vld [vmem:[%s7252_s7 + $0x18] ss:$12 sps:$4 sm:$0xff]   ;;  %v7282_v52 = vpack.i.bf16 %v6610_v44, %v6608_v13 }
0x14ca   : > { %v3358_v24 = vpack.c.bf16 %v3353_v9, %v3351_v28 }
0x14fe   : > { %v3346_v50 = vpop.xlane.xlu0 %3345 }
0x14ff   : > { %5688 = vrcp.f32 %v3346_v50 }
0x1502   : > { %v3362_v19 = vpop.permute.xlu0 %3361  ;;  %v3349_v30 = vpop.xlane.xlu1 %3348 }
0x1503   : > { %v3365_v43 = vsel %vm3200_vm4, %v3362_v19, %v3364_v63  ;;  %5690 = vrcp.f32 %v3349_v30 }
0x1504   : > { %5210 = vmatpush3.bf16.msra.mxu1 %v3365_v43 }
0x1505   : > { %3815 = vmatprep.subr.bf16.mxu1 %v5485_v22 }
0x1506   : > { %v3415_v31 = vpop.permute.xlu1 %3414  ;;  %v5280_v43 = vpop.permute.xlu0 %5279 }
0x1507   : > { %v3416_v11 = vsel %vm3200_vm4, %v3413_v62, %v3415_v31  ;;  %5212 = vmatmul.mubr.msk.bf16.vlgmr.msra.gmra.mrb[76].mxu1 %vm1114_vm1, %v3358_v24  ;;  %v5282_v24 = vunpack.i.h.bf16 %v5280_v43  ;;  %v5281_v31 = vunpack.i.l.bf16 %v5280_v43 }
0x1508   : > { %5216 = vmatpush3.bf16.msra.mxu0 %v3416_v11  ;;  %3816 = vmatpush1.bf16.msra.mxu1 %v5483_v21 }
0x1509   : > { %3868 = vmatprep.subr.bf16.mxu0 %v7280_v32  ;;  %v5689_v41 = vpop.eup %5688  ;;  %3817 = vmatprep.subr.bf16.mxu1 %v5489_v46  ;;  %v3575_v13 = vsel %vm1508_vm3, %v6406_v61, %v5282_v24  ;;  %v3574_v44 = vsel %vm1508_vm3, %v6404_v59, %v5281_v31 }
0x150a   : > { %v3355_v4 = vmul.f32 %v5689_v41, %v5681_v12  ;;  %v5506_v12 = vld [vmem:[%s7252_s7 + $0x80] ss:$12 sps:$4 sm:$0xff]   ;;  %v5285_v28 = vpop.permute.xlu1 %5284  ;;  %v5290_v2 = vpop.permute.xlu0 %5289 }
0x150b   : > { %v5287_v41 = vunpack.i.h.bf16 %v5285_v28  ;;  %v5291_v5 = vunpack.i.l.bf16 %v5290_v2 }
0x150c   : > { %3818 = vmatpush1.bf16.msra.mxu1 %v5487_v10 }
0x150d   : > { %v5691_v6 = vpop.eup %5690  ;;  %3819 = vmatprep.subr.bf16.mxu1 %v5493_v48  ;;  %v3580_v51 = vsel %vm3578_vm5, %v3575_v13, %v5287_v41 }
0x150e   : > { %v3357_v20 = vmul.f32 %v5691_v6, %v5683_v58  ;;  %v5509_v58 = vld [vmem:[%s7252_s7 + $0x94] ss:$12 sps:$4 sm:$0xff]   ;;  %v5295_v45 = vpop.permute.xlu1 %5294  ;;  %v5286_v6 = vunpack.i.l.bf16 %v5285_v28 }
0x150f   : > { %v5296_v21 = vunpack.i.l.bf16 %v5295_v45 }
0x1510   : > { %v3359_v18 = vpack.c.bf16 %v3357_v20, %v3355_v4  ;;  %3820 = vmatpush1.bf16.msra.mxu1 %v5491_v54  ;;  %v5292_v4 = vunpack.i.h.bf16 %v5290_v2  ;;  %v5300_v20 = vpop.permute.xlu0 %5299 }
0x1511   : > { %3821 = vmatprep.subr.bf16.mxu1 %v5497_v35  ;;  %v5301_v46 = vunpack.i.l.bf16 %v5300_v20 }
0x1512   : > { %5218 = vmatmul.mubr.msk.bf16.vlgmr.msra.gmra.mrb[76].mxu0 %vm1114_vm1, %v3359_v18  ;;  %v5305_v11 = vpop.permute.xlu1 %5304  ;;  %v5297_v18 = vunpack.i.h.bf16 %v5295_v45  ;;  %v3585_v61 = vsel %vm3583_vm6, %v3580_v51, %v5292_v4 }
0x1513   : > { %3869 = vmatpush1.bf16.msra.mxu0 %v5486_v29  ;;  %v5302_v29 = vunpack.i.h.bf16 %v5300_v20  ;;  %v5307_v48 = vunpack.i.h.bf16 %v5305_v11 }
0x1514   : > { %3870 = vmatprep.subr.bf16.mxu0 %v7280_v32  ;;  %3822 = vmatpush1.bf16.msra.mxu1 %v5495_v27  ;;  %v3590_v10 = vsel %vm3588_vm7, %v3585_v61, %v5297_v18 }
0x1515   : > { %3823 = vmatprep.subr.bf16.mxu1 %v5501_v40 }
0x1516   : > { %v5315_v22 = vpop.permute.xlu1 %5314 }
0x1517   : > { %3871 = vmatpush1.bf16.msra.mxu0 %v5490_v0 }
0x1518   : > { %3872 = vmatprep.subr.bf16.mxu0 %v7280_v32  ;;  %3824 = vmatpush1.bf16.msra.mxu1 %v5499_v60 }
0x1519   : > { %3825 = vmatprep.subr.bf16.mxu1 %v5505_v1 }
0x151a   : > { %v5325_v27 = vpop.permute.xlu1 %5324 }
0x151b   : > { %3873 = vmatpush1.bf16.msra.mxu0 %v5494_v25  ;;  %v5306_v25 = vunpack.i.l.bf16 %v5305_v11 }
0x151c   : > { %3874 = vmatprep.subr.bf16.mxu0 %v7280_v32  ;;  %3826 = vmatpush1.bf16.msra.mxu1 %v5503_v53  ;;  %v5316_v53 = vunpack.i.l.bf16 %v5315_v22 }
0x151d   : > { %3827 = vmatprep.subr.bf16.mxu1 %v5509_v58 }
0x151f   : > { %3875 = vmatpush1.bf16.msra.mxu0 %v5498_v42  ;;  %v3595_v42 = vsel %vm3593_vm8, %v3590_v10, %v5302_v29 }
0x1520   : > { %3876 = vmatprep.subr.bf16.mxu0 %v7280_v32  ;;  %3828 = vmatpush1.bf16.msra.mxu1 %v5507_v47  ;;  %v3600_v1 = vsel %vm3598_vm9, %v3595_v42, %v5307_v48  ;;  %v5725_v42 = vld [vmem:[%s5857_s24 + $0x10] sm:$0xff] }
0x1521   : > { %3829 = vmatprep.subr.bf16.mxu1 %v5513_v34 }
0x1523   : > { %3877 = vmatpush1.bf16.msra.mxu0 %v5502_v14 }
0x1524   : > { %3878 = vmatprep.subr.bf16.mxu0 %v7280_v32  ;;  %3830 = vmatpush1.bf16.msra.mxu1 %v5511_v36 }
0x1525   : > { %3831 = vmatprep.subr.bf16.mxu1 %v5517_v33 }
0x1527   : > { %3879 = vmatpush1.bf16.msra.mxu0 %v5506_v12  ;;  %v5317_v12 = vunpack.i.h.bf16 %v5315_v22 }
0x1528   : > { %3880 = vmatprep.subr.bf16.mxu0 %v7280_v32  ;;  %3832 = vmatpush1.bf16.msra.mxu1 %v5515_v39 }
0x1529   : > { %v3577_v39 = vsel %vm1508_vm3, %v6412_v26, %v5317_v12  ;;  %v5726_v12 = vld [vmem:[%s5857_s24 + $0x8] sm:$0xff] }
0x152b   : > { %3881 = vmatpush1.bf16.msra.mxu0 %v5510_v7 }
0x152c   : > { %3882 = vmatprep.subr.bf16.mxu0 %v7280_v32 }
0x152f   : > { %3883 = vmatpush1.bf16.msra.mxu0 %v5514_v38 }
0x1530   : > { %3884 = vmatprep.subr.bf16.mxu0 %v7280_v32 }
0x1533   : > { %3885 = vmatpush1.bf16.msra.mxu0 %v5518_v55  ;;  %v3576_v55 = vsel %vm1508_vm3, %v6410_v23, %v5316_v53 }
0x15da   : > { %v3404_v57 = vpop.f32.mrb[76].mxu1 }
0x15db   : > { %v5213_v17 = vpop.f32.mrb[77].mxu1 }
0x15dc   : > { %v3407_v37 = vpop.f32.mrb[78].mxu1 }
0x15dd   : > { %v5308_v8 = vpack.i.bf16 %v3407_v37, %v3404_v57  ;;  %v5214_v63 = vpop.f32.mrb[79].mxu1  ;;  %v5335_v57 = vpop.permute.xlu1 %5334 }
0x15de   : > { %v5326_v63 = vunpack.i.l.bf16 %v5325_v27  ;;  %v5336_v28 = vunpack.i.l.bf16 %v5335_v57 }
0x15df   : > { %5309 = vrot.lane.b32.xlu0 %v5308_v8, %s5760_s28  ;;  %v5327_v8 = vunpack.i.h.bf16 %v5325_v27 }
0x15e3   : > { %5319 = vrot.lane.b32.xlu0 %v7281_v56, %s5754_s29 }
0x15e5   : > { %v3455_v62 = vpop.f32.mrb[76].mxu0 }
0x15e6   : > { %v5219_v50 = vpop.f32.mrb[77].mxu0 }
0x15e7   : > { %5329 = vrot.lane.b32.xlu0 %v7282_v52, %s5756_s16  ;;  %v3458_v9 = vpop.f32.mrb[78].mxu0 }
0x15e8   : > { %v5343_v19 = vpack.i.bf16 %v3458_v9, %v3455_v62  ;;  %v5220_v30 = vpop.f32.mrb[79].mxu0 }
0x15e9   : > { %v5337_v30 = vunpack.i.h.bf16 %v5335_v57 }
0x15ea   : > { %5344 = vrot.lane.b32.xlu1 %v5343_v19, %s5760_s28 }
0x15eb   : > { %5339 = vrot.lane.b32.xlu0 %v5338_v49, %s7283_s30  ;;  %v3579_v49 = vsel %vm3578_vm5, %v3574_v44, %v5286_v6  ;;  %s7211_s30 = scalar_lea.vmem %s7260_s15, %s7284_s26 }
0x15ec   : > { %v3584_v0 = vsel %vm3583_vm6, %v3579_v49, %v5291_v5  ;;  %v3648_v49 = vld [vmem:[%s7253_s8] sm:$0x7] }
0x15ed   : > { %v3589_v59 = vsel %vm3588_vm7, %v3584_v0, %v5296_v21  ;;  %v3653_v20 = vrot.slane %v3648_v49, %v6124_v16  ;;  %v3661_v18 = vrot.slane %v3648_v49, %v6150_v3  ;;  %v3657_v21 = vrot.slane %v3648_v49, %v6122_v15 }
0x15ee   : > { %v3594_v35 = vsel %vm3593_vm8, %v3589_v59, %v5301_v46 }
0x15ef   : > { %v3599_v60 = vsel %vm3598_vm9, %v3594_v35, %v5306_v25 }
0x1651   : > { %v5310_v54 = vpop.permute.xlu0 %5309 }
0x1652   : > { %v5312_v40 = vunpack.i.h.bf16 %v5310_v54  ;;  %v5311_v14 = vunpack.i.l.bf16 %v5310_v54  ;;  %v5724_v54 = vld [vmem:[%s5857_s24] sm:$0xff] }
0x1654   : > { %v3604_v58 = vsel %vm3603_vm10, %v3599_v60, %v5311_v14  ;;  %v3605_v7 = vsel %vm3603_vm10, %v3600_v1, %v5312_v40  ;;  %v3609_v47 = vpack.c.bf16 %v5312_v40, %v5311_v14 }
0x1655   : > { %v3608_v34 = vpack.c.bf16 %v3605_v7, %v3604_v58  ;;  %v5320_v38 = vpop.permute.xlu0 %5319  ;;  %v5727_v7 = vld [vmem:[%s5857_s24 + $0x18] sm:$0xff] }
0x1656   : > { %v5322_v36 = vunpack.i.h.bf16 %v5320_v38  ;;  %v5321_v33 = vunpack.i.l.bf16 %v5320_v38  ;;  %4879 = vmatprep.mubr.msk.bf16.mxu1 %vm1114_vm1, %v3609_v47  ;;  %4881 = vmatprep.mubr.msk.bf16.mxu0 %vm1114_vm1, %v3609_v47 }
0x1657   : > { %3848 = vmatmul.mubr.bf16.vlgmr.msra.gmra.mrb[80].mxu1 %v3608_v34  ;;  %3901 = vmatmul.mubr.bf16.vlgmr.msra.gmra.mrb[80].mxu0 %v3608_v34  ;;  %v5728_v34 = vld [vmem:[%s5857_s24 + $0x28] sm:$0xff] }
0x1658   : > { %v3581_v17 = vsel %vm3578_vm5, %v3576_v55, %v5321_v33  ;;  %v3582_v37 = vsel %vm3578_vm5, %v3577_v39, %v5322_v36  ;;  %v5729_v36 = vld [vmem:[%s5857_s24 + $0x20] sm:$0xff] }
0x1659   : > { %v5330_v56 = vpop.permute.xlu0 %5329  ;;  %v3586_v52 = vsel %vm3583_vm6, %v3581_v17, %v5326_v63  ;;  %v3587_v9 = vsel %vm3583_vm6, %v3582_v37, %v5327_v8 }
0x165a   : > { %v5332_v62 = vunpack.i.h.bf16 %v5330_v56  ;;  %v5331_v50 = vunpack.i.l.bf16 %v5330_v56 }
0x165c   : > { %v3591_v26 = vsel %vm3588_vm7, %v3586_v52, %v5331_v50  ;;  %v3592_v23 = vsel %vm3588_vm7, %v3587_v9, %v5332_v62  ;;  %v5345_v19 = vpop.permute.xlu1 %5344 }
0x165d   : > { %v5347_v43 = vunpack.i.h.bf16 %v5345_v19  ;;  %v5346_v45 = vunpack.i.l.bf16 %v5345_v19  ;;  %v5340_v2 = vpop.permute.xlu0 %5339  ;;  %v3596_v41 = vsel %vm3593_vm8, %v3591_v26, %v5336_v28  ;;  %v3597_v6 = vsel %vm3593_vm8, %v3592_v23, %v5337_v30  ;;  %v5730_v30 = vld [vmem:[%s5857_s24 + $0x30] sm:$0xff] }
0x165e   : > { %v5342_v24 = vunpack.i.h.bf16 %v5340_v2  ;;  %v5341_v31 = vunpack.i.l.bf16 %v5340_v2 }
0x165f   : > { %v3611_v11 = vpack.c.bf16 %v5347_v43, %v5346_v45 }
0x1660   : > { %v3601_v13 = vsel %vm3598_vm9, %v3596_v41, %v5341_v31  ;;  %v3602_v44 = vsel %vm3598_vm9, %v3597_v6, %v5342_v24  ;;  %v5732_v41 = vld [vmem:[%s5857_s24 + $0x38] sm:$0xff] }
0x1661   : > { %4880 = vmatprep.mubr.msk.bf16.mxu1 %vm1114_vm1, %v3611_v11  ;;  %4882 = vmatprep.mubr.msk.bf16.mxu0 %vm1114_vm1, %v3611_v11  ;;  %v3606_v4 = vsel %vm3603_vm10, %v3601_v13, %v5346_v45  ;;  %v3607_v5 = vsel %vm3603_vm10, %v3602_v44, %v5347_v43  ;;  %v5731_v43 = vld [vmem:[%s5857_s24 + $0x40] sm:$0xff]  ;;  %v5733_v44 = vld [vmem:[%s5857_s24 + $0x48] sm:$0xff] }
0x1662   : > { %v3610_v51 = vpack.c.bf16 %v3607_v5, %v3606_v4  ;;  %v5734_v5 = vld [vmem:[%s5857_s24 + $0x50] sm:$0xff] }
0x1664   : > { %3858 = vmatmul.mubr.bf16.gmra.mrb[84].mxu1 %v3610_v51  ;;  %3909 = vmatmul.mubr.bf16.gmra.mrb[84].mxu0 %v3610_v51 }
0x172a   : > { %v3849_v22 = vpop.f32.mrb[80].mxu1  ;;  %v3902_v29 = vpop.f32.mrb[80].mxu0 }
0x172b   : > { %v3850_v46 = vadd.f32 %v3849_v22, %v3653_v20  ;;  %v3903_v0 = vadd.f32 %v3902_v29, %v3661_v18  ;;  %v3851_v61 = vpop.f32.mrb[81].mxu1  ;;  %v3904_v59 = vpop.f32.mrb[81].mxu0  ;;  %v5735_v22 = vld [vmem:[%s5857_s24 + $0x58] sm:$0xff] }
0x172c   : > { %v3852_v10 = vadd.f32 %v3851_v61, %v3657_v21  ;;  %v3853_v48 = vpop.f32.mrb[82].mxu1  ;;  %v3905_v25 = vpop.f32.mrb[82].mxu0  ;;  %v5519_v61 = vld [vmem:[%s7256_s11 + $0x40] sm:$0xff]  }
0x172d   : > { %v6931_v35 = vadd.f32 %v5724_v54, %v3850_v46  ;;  %v6934_v27 = vadd.f32 %v5725_v42, %v3903_v0  ;;  %v3854_v40 = vadd.f32 %v3853_v48, %v3653_v20  ;;  %v3906_v14 = vadd.f32 %v3905_v25, %v3661_v18  ;;  %v3855_v60 = vpop.f32.mrb[83].mxu1  ;;  %v3907_v1 = vpop.f32.mrb[83].mxu0  ;;  %v5520_v59 = vld [vmem:[%s7256_s11] sm:$0xff]   ;;  %4990 = vmatprep.subr.bf16.mxu1 %v5519_v61  ;;  %v5522_v48 = vld [vmem:[%s7256_s11 + $0x8] sm:$0xff]   ;;  %v5523_v61 = vld [vmem:[%s7256_s11 + $0x50] sm:$0xff]  }
0x172e   : > { %v6937_v53 = vadd.f32 %v5726_v12, %v3852_v10  ;;  %v3856_v58 = vadd.f32 %v3855_v60, %v3657_v21  ;;  %v5521_v10 = vld [vmem:[%s7256_s11 + $0x48] sm:$0xff]   ;;  %4991 = vmatpush3.bf16.msra.mxu1 %v5520_v59  ;;  %v5524_v59 = vld [vmem:[%s7256_s11 + $0x10] sm:$0xff]  }
0x172f   : > { %v6940_v47 = vadd.f32 %v5727_v7, %v3854_v40  ;;  %v6943_v38 = vadd.f32 %v5728_v34, %v3906_v14  ;;  %v3932_v55 = vsel %vm519_vm0, %v6934_v27, 0.0  ;;  %4992 = vmatprep.subr.bf16.mxu1 %v5521_v10  ;;  %v5525_v10 = vld [vmem:[%s7256_s11 + $0x58] sm:$0xff]  }
0x1730   : > { %v6946_v33 = vadd.f32 %v5729_v36, %v3856_v58  ;;  %v3931_v39 = vadd.f32 %v6937_v53, %v6931_v35 }
0x1731   : > { %v3937_v37 = vsel %vm519_vm0, %v6943_v38, 0.0 }
0x1732   : > { %v3933_v57 = vadd.f32 %v3932_v55, %v3931_v39  ;;  %v3936_v17 = vadd.f32 %v6946_v33, %v6940_v47  ;;  %4993 = vmatpush3.bf16.msra.mxu1 %v5522_v48  ;;  %v5526_v48 = vld [vmem:[%s7256_s11 + $0x18] sm:$0xff]  }
0x1733   : > { %4994 = vmatprep.subr.bf16.mxu1 %v5523_v61 }
0x1734   : > { %3934 = vadd.xlane.f32.xlu0 %v3933_v57  ;;  %v3938_v8 = vadd.f32 %v3937_v37, %v3936_v17 }
0x1736   : > { %3939 = vadd.xlane.f32.xlu1 %v3938_v8  ;;  %4995 = vmatpush3.bf16.msra.mxu1 %v5524_v59 }
0x1737   : > { %v3859_v63 = vpop.f32.mrb[84].mxu1  ;;  %v3910_v56 = vpop.f32.mrb[84].mxu0  ;;  %4996 = vmatprep.subr.bf16.mxu1 %v5525_v10 }
0x1738   : > { %v3860_v62 = vadd.f32 %v3859_v63, %v3653_v20  ;;  %v3911_v50 = vadd.f32 %v3910_v56, %v3661_v18  ;;  %v3861_v52 = vpop.f32.mrb[85].mxu1  ;;  %v3912_v9 = vpop.f32.mrb[85].mxu0 }
0x1739   : > { %v3862_v26 = vadd.f32 %v3861_v52, %v3657_v21  ;;  %v3863_v23 = vpop.f32.mrb[86].mxu1  ;;  %v3913_v19 = vpop.f32.mrb[86].mxu0 }
0x173a   : > { %v6957_v28 = vadd.f32 %v5730_v30, %v3860_v62  ;;  %v6960_v45 = vadd.f32 %v5731_v43, %v3911_v50  ;;  %v3864_v2 = vadd.f32 %v3863_v23, %v3653_v20  ;;  %v3914_v24 = vadd.f32 %v3913_v19, %v3661_v18  ;;  %v3865_v31 = vpop.f32.mrb[87].mxu1  ;;  %v3915_v11 = vpop.f32.mrb[87].mxu0  ;;  %4997 = vmatpush3.bf16.msra.mxu1 %v5526_v48 }
0x173b   : > { %v6963_v6 = vadd.f32 %v5732_v41, %v3862_v26  ;;  %v3866_v13 = vadd.f32 %v3865_v31, %v3657_v21 }
0x173c   : > { %v6966_v4 = vadd.f32 %v5733_v44, %v3864_v2  ;;  %v6974_v29 = vadd.f32 %v5735_v22, %v3914_v24  ;;  %v3942_v20 = vsel %vm519_vm0, %v6960_v45, 0.0 }
0x173d   : > { %v6969_v51 = vadd.f32 %v5734_v5, %v3866_v13  ;;  %v3941_v49 = vadd.f32 %v6963_v6, %v6957_v28 }
0x173e   : > { %v3947_v21 = vsel %vm519_vm0, %v6974_v29, 0.0 }
0x173f   : > { %v3943_v18 = vadd.f32 %v3942_v20, %v3941_v49  ;;  %v3946_v46 = vadd.f32 %v6969_v51, %v6966_v4 }
0x1741   : > { %3944 = vadd.xlane.f32.xlu0 %v3943_v18  ;;  %v3948_v0 = vadd.f32 %v3947_v21, %v3946_v46 }
0x1745   : > { %3949 = vadd.xlane.f32.xlu0 %v3948_v0 }
0x17c1   : > { %v3935_v25 = vpop.xlane.xlu0 %3934 }
0x17c2   : > { %v3951_v54 = vmul.f32 0.0034722222, %v3935_v25  ;;  %v5527_v25 = vld [vmem:[%s7256_s11 + $0x60] sm:$0xff]  }
0x17c3   : > { %v3940_v42 = vpop.xlane.xlu1 %3939  ;;  %4998 = vmatprep.subr.bf16.mxu1 %v5527_v25 }
0x17c4   : > { %v6995_v40 = vsub.f32 %v6931_v35, %v3951_v54  ;;  %v6998_v14 = vsub.f32 %v6937_v53, %v3951_v54  ;;  %v7001_v60 = vsub.f32 %v6934_v27, %v3951_v54  ;;  %v3952_v1 = vmul.f32 0.0034722222, %v3940_v42  ;;  %v5528_v54 = vld [vmem:[%s7256_s11 + $0x20] sm:$0xff]   ;;  %v5529_v42 = vld [vmem:[%s7256_s11 + $0x68] sm:$0xff]  }
0x17c5   : > { %4999 = vmatpush3.bf16.msra.mxu1 %v5528_v54 }
0x17c6   : > { %v3967_v12 = vmul.f32 %v6995_v40, %v6995_v40  ;;  %v3968_v58 = vmul.f32 %v6998_v14, %v6998_v14  ;;  %v7008_v7 = vsub.f32 %v6940_v47, %v3952_v1  ;;  %v7011_v34 = vsub.f32 %v6946_v33, %v3952_v1  ;;  %5000 = vmatprep.subr.bf16.mxu1 %v5529_v42 }
0x17c7   : > { %v7014_v36 = vsub.f32 %v6943_v38, %v3952_v1  ;;  %v3969_v39 = vmul.f32 %v7001_v60, %v7001_v60  ;;  %v5530_v1 = vld [vmem:[%s7256_s11 + $0x28] sm:$0xff]  }
0x17c8   : > { %v3970_v55 = vmul.f32 %v7008_v7, %v7008_v7  ;;  %v3971_v57 = vmul.f32 %v7011_v34, %v7011_v34  ;;  %v3979_v17 = vadd.f32 %v3968_v58, %v3967_v12  ;;  %v5531_v12 = vld [vmem:[%s7256_s11 + $0x70] sm:$0xff]  }
0x17c9   : > { %v3980_v37 = vsel %vm519_vm0, %v3969_v39, 0.0  ;;  %v3972_v8 = vmul.f32 %v7014_v36, %v7014_v36  ;;  %5001 = vmatpush3.bf16.msra.mxu1 %v5530_v1  ;;  %v5532_v58 = vld [vmem:[%s7256_s11 + $0x30] sm:$0xff]   ;;  %v5533_v39 = vld [vmem:[%s7256_s11 + $0x78] sm:$0xff]  }
0x17ca   : > { %v3981_v63 = vadd.f32 %v3980_v37, %v3979_v17  ;;  %v3984_v56 = vadd.f32 %v3971_v57, %v3970_v55  ;;  %5002 = vmatprep.subr.bf16.mxu1 %v5531_v12  ;;  %v5534_v55 = vld [vmem:[%s7256_s11 + $0x38] sm:$0xff]   ;;  %v5535_v57 = vld [vmem:[%s7256_s11 + $0x80] sm:$0xff]   ;;  %v5536_v17 = vld [vmem:[%s7256_s11 + $0x88] sm:$0xff]  }
0x17cb   : > { %v3985_v62 = vsel %vm519_vm0, %v3972_v8, 0.0  ;;  %5221 = vmatprep.subr.bf16.mxu0 %v5535_v57 }
0x17cc   : > { %3982 = vadd.xlane.f32.xlu0 %v3981_v63  ;;  %v3986_v50 = vadd.f32 %v3985_v62, %v3984_v56  ;;  %5222 = vmatpush3.bf16.msra.mxu0 %v5535_v57 }
0x17cd   : > { %5003 = vmatpush3.bf16.msra.mxu1 %v5532_v58  ;;  %5223 = vmatprep.subr.bf16.mxu0 %v5536_v17 }
0x17ce   : > { %3987 = vadd.xlane.f32.xlu1 %v3986_v50  ;;  %v3945_v52 = vpop.xlane.xlu0 %3944  ;;  %5004 = vmatprep.subr.bf16.mxu1 %v5533_v39 }
0x17cf   : > { %v3953_v9 = vmul.f32 0.0034722222, %v3945_v52  ;;  %v3929_v52 = vld [vmem:[%s7254_s9] sm:$0x7] }
0x17d0   : > { %5224 = vmatpush3.bf16.msra.mxu0 %v5536_v17 }
0x17d1   : > { %v7027_v26 = vsub.f32 %v6957_v28, %v3953_v9  ;;  %v7030_v23 = vsub.f32 %v6963_v6, %v3953_v9  ;;  %v7033_v19 = vsub.f32 %v6960_v45, %v3953_v9  ;;  %5005 = vmatpush3.bf16.msra.mxu1 %v5534_v55 }
0x17d2   : > { %v3950_v30 = vpop.xlane.xlu0 %3949 }
0x17d3   : > { %v3973_v43 = vmul.f32 %v7027_v26, %v7027_v26  ;;  %v3974_v2 = vmul.f32 %v7030_v23, %v7030_v23  ;;  %v3954_v24 = vmul.f32 0.0034722222, %v3950_v30  ;;  %v3975_v31 = vmul.f32 %v7033_v19, %v7033_v19 }
0x17d5   : > { %v7042_v11 = vsub.f32 %v6966_v4, %v3954_v24  ;;  %v7045_v41 = vsub.f32 %v6969_v51, %v3954_v24  ;;  %v7048_v13 = vsub.f32 %v6974_v29, %v3954_v24  ;;  %v3989_v44 = vadd.f32 %v3974_v2, %v3973_v43  ;;  %v3930_v43 = vld [vmem:[%s7255_s10] sm:$0x7] }
0x17d6   : > { %v3990_v5 = vsel %vm519_vm0, %v3975_v31, 0.0  ;;  %v4031_v2 = vrot.slane %v3929_v52, %v6122_v15  ;;  %v4027_v31 = vrot.slane %v3929_v52, %v6124_v16  ;;  %v4063_v61 = vrot.slane %v3930_v43, %v6150_v3 }
0x17d7   : > { %v3976_v49 = vmul.f32 %v7042_v11, %v7042_v11  ;;  %v3977_v22 = vmul.f32 %v7045_v41, %v7045_v41  ;;  %v3991_v20 = vadd.f32 %v3990_v5, %v3989_v44  ;;  %v3978_v18 = vmul.f32 %v7048_v13, %v7048_v13 }
0x17d8   : > { %v4035_v44 = vrot.slane %v3929_v52, %v6150_v3 }
0x17d9   : > { %3992 = vadd.xlane.f32.xlu0 %v3991_v20  ;;  %v3994_v46 = vadd.f32 %v3977_v22, %v3976_v49  ;;  %v3995_v21 = vsel %vm519_vm0, %v3978_v18, 0.0 }
0x17db   : > { %v3996_v0 = vadd.f32 %v3995_v21, %v3994_v46  ;;  %v4055_v21 = vrot.slane %v3930_v43, %v6124_v16 }
0x17dd   : > { %3997 = vadd.xlane.f32.xlu1 %v3996_v0  ;;  %v4059_v0 = vrot.slane %v3930_v43, %v6122_v15 }
0x1859   : > { %v3983_v37 = vpop.xlane.xlu0 %3982 }
0x185a   : > { %v3999_v8 = vmul.f32 0.0034722222, %v3983_v37 }
0x185b   : > { %v3988_v63 = vpop.xlane.xlu1 %3987 }
0x185c   : > { %v4003_v56 = vadd.f32 1e-05, %v3999_v8  ;;  %v4000_v62 = vmul.f32 0.0034722222, %v3988_v63 }
0x185e   : > { %5692 = vrsqrt.f32 %v4003_v56  ;;  %v4004_v50 = vadd.f32 1e-05, %v4000_v62 }
0x1860   : > { %5694 = vrsqrt.f32 %v4004_v50 }
0x1866   : > { %v3993_v9 = vpop.xlane.xlu0 %3992 }
0x1867   : > { %v4001_v30 = vmul.f32 0.0034722222, %v3993_v9 }
0x1868   : > { %v5693_v24 = vpop.eup %5692 }
0x1869   : > { %v4005_v5 = vadd.f32 1e-05, %v4001_v30  ;;  %v4012_v49 = vmul.f32 %v5693_v24, %v6998_v14  ;;  %v4013_v22 = vmul.f32 %v5693_v24, %v7001_v60  ;;  %v4011_v20 = vmul.f32 %v5693_v24, %v6995_v40 }
0x186a   : > { %v5695_v18 = vpop.eup %5694  ;;  %v3998_v46 = vpop.xlane.xlu1 %3997 }
0x186b   : > { %5696 = vrsqrt.f32 %v4005_v5  ;;  %v4002_v59 = vmul.f32 0.0034722222, %v3998_v46  ;;  %v4015_v10 = vmul.f32 %v5695_v18, %v7011_v34  ;;  %v4040_v48 = vmul.f32 %v4031_v2, %v4012_v49 }
0x186c   : > { %v4016_v25 = vmul.f32 %v5695_v18, %v7014_v36  ;;  %v4041_v14 = vmul.f32 %v4035_v44, %v4013_v22  ;;  %v4014_v60 = vmul.f32 %v5695_v18, %v7008_v7  ;;  %v4039_v54 = vmul.f32 %v4027_v31, %v4011_v20 }
0x186d   : > { %v4006_v40 = vadd.f32 1e-05, %v4002_v59  ;;  %v4043_v42 = vmul.f32 %v4031_v2, %v4015_v10  ;;  %v4068_v58 = vadd.f32 %v4059_v0, %v4040_v48 }
0x186e   : > { %v4044_v1 = vmul.f32 %v4035_v44, %v4016_v25  ;;  %v4042_v12 = vmul.f32 %v4027_v31, %v4014_v60  ;;  %v4069_v55 = vadd.f32 %v4063_v61, %v4041_v14  ;;  %v4067_v17 = vadd.f32 %v4055_v21, %v4039_v54  ;;  %v5548_v14 = vld [vmem:[%s7258_s13 + $0x48] ss:$12 sps:$4 sm:$0xff]   ;;  %v5551_v60 = vld [vmem:[%s7258_s13 + $0x38] ss:$12 sps:$4 sm:$0xff]  }
0x186f   : > { %5698 = vrsqrt.f32 %v4006_v40  ;;  %v4071_v39 = vadd.f32 %v4059_v0, %v4043_v42  ;;  %v4422_v54 = vld [vmem:[%s7258_s13 + $0x60] sm:$0xff] }
0x1870   : > { %v4072_v57 = vadd.f32 %v4063_v61, %v4044_v1  ;;  %v4070_v37 = vadd.f32 %v4055_v21, %v4042_v12  ;;  %v4917_v40 = vcombine.high %v4422_v54, %v4422_v54  ;;  %v4916_v42 = vcombine.low %v4422_v54, %v4422_v54  ;;  %v5554_v1 = vld [vmem:[%s7258_s13 + $0x50] ss:$12 sps:$4 sm:$0xff]  }
0x1871   : > { %v4080_v8 = vpack.c.bf16 %v4071_v39, %v4068_v58  ;;  %v5555_v58 = vld [vmem:[%s7258_s13 + $0x68] ss:$0 sps:$4 sm:$0xff]  }
0x1872   : > { %v4081_v34 = vpack.c.bf16 %v4072_v57, %v4069_v55  ;;  %v4079_v63 = vpack.c.bf16 %v4070_v37, %v4067_v17  ;;  %v4521_v12 = vsel %vm4519_vm11, %v4916_v42, 0  ;;  %v4527_v39 = vsel %vm4519_vm11, %v5555_v58, 0 }
0x1873   : > { %4274 = vmatprep.mubr.bf16.mxu1 %v4080_v8 }
0x1874   : > { %5225 = vmatprep.mubr.msk.bf16.mxu0 %vm519_vm0, %v4081_v34  ;;  %4275 = vmatmul.mubr.bf16.vlgmr.msra.gmra.mrb[88].mxu1 %v4079_v63  ;;  %v4883_v63 = vld [vmem:[%s7257_s12] ss:$0 sm:$0xff] }
0x1875   : > { %v5697_v7 = vpop.eup %5696 }
0x1876   : > { %v4018_v36 = vmul.f32 %v5697_v7, %v7030_v23  ;;  %v4019_v56 = vmul.f32 %v5697_v7, %v7033_v19  ;;  %v4017_v62 = vmul.f32 %v5697_v7, %v7027_v26 }
0x1878   : > { %v4046_v9 = vmul.f32 %v4031_v2, %v4018_v36  ;;  %v4047_v43 = vmul.f32 %v4035_v44, %v4019_v56  ;;  %v4045_v5 = vmul.f32 %v4027_v31, %v4017_v62 }
0x1879   : > { %v5699_v50 = vpop.eup %5698 }
0x187a   : > { %v4021_v52 = vmul.f32 %v5699_v50, %v7045_v41  ;;  %v4022_v30 = vmul.f32 %v5699_v50, %v7048_v13  ;;  %v4020_v24 = vmul.f32 %v5699_v50, %v7042_v11  ;;  %v4074_v18 = vadd.f32 %v4059_v0, %v4046_v9  ;;  %v5539_v11 = vld [vmem:[%s7258_s13 + $0x4] ss:$12 sps:$4 sm:$0xff]   ;;  %v5537_v41 = vld [vmem:[%s7258_s13] ss:$12 sps:$4 sm:$0xff]   ;;  %v5542_v13 = vld [vmem:[%s7258_s13 + $0x1c] ss:$12 sps:$4 sm:$0xff]  }
0x187b   : > { %v4075_v23 = vadd.f32 %v4063_v61, %v4047_v43  ;;  %v4073_v19 = vadd.f32 %v4055_v21, %v4045_v5  ;;  %4529 = vmatprep.subr.bf16.mxu0 %v5539_v11 }
0x187c   : > { %v4049_v49 = vmul.f32 %v4031_v2, %v4021_v52  ;;  %v4050_v22 = vmul.f32 %v4035_v44, %v4022_v30  ;;  %v4048_v20 = vmul.f32 %v4027_v31, %v4020_v24  ;;  %v5540_v2 = vld [vmem:[%s7258_s13 + $0x18] ss:$12 sps:$4 sm:$0xff]   ;;  %v5543_v31 = vld [vmem:[%s7258_s13 + $0x8] ss:$12 sps:$4 sm:$0xff]  }
0x187d   : > { %5229 = vmatprep.subr.bf16.mxu1 %v5543_v31  ;;  %v5546_v44 = vld [vmem:[%s7258_s13 + $0x34] ss:$12 sps:$4 sm:$0xff]  }
0x187e   : > { %v4077_v46 = vadd.f32 %v4059_v0, %v4049_v49  ;;  %v4078_v59 = vadd.f32 %v4063_v61, %v4050_v22  ;;  %v4076_v10 = vadd.f32 %v4055_v21, %v4048_v20  ;;  %5230 = vmatpush3.bf16.msra.mxu1 %v5543_v31  ;;  %v5544_v21 = vld [vmem:[%s7258_s13 + $0x30] ss:$12 sps:$4 sm:$0xff]   ;;  %v5547_v0 = vld [vmem:[%s7258_s13 + $0x20] ss:$12 sps:$4 sm:$0xff]  }
0x187f   : > { %5231 = vmatprep.subr.bf16.mxu1 %v5547_v0  ;;  %v5550_v61 = vld [vmem:[%s7258_s13 + $0x4c] ss:$12 sps:$4 sm:$0xff]  }
0x1880   : > { %v4083_v26 = vpack.c.bf16 %v4077_v46, %v4074_v18  ;;  %v4084_v48 = vpack.c.bf16 %v4078_v59, %v4075_v23  ;;  %v4082_v25 = vpack.c.bf16 %v4076_v10, %v4073_v19 }
0x1882   : > { %4282 = vmatprep.mubr.bf16.mxu1 %v4083_v26  ;;  %5226 = vmatmul.mubr.msk.bf16.vlgmr.msra.gmra.mrb[88].mxu0 %vm519_vm0, %v4084_v48 }
0x1883   : > { %4283 = vmatmul.mubr.bf16.gmra.mrb[92].mxu1 %v4082_v25  ;;  %4561 = vmatprep.mubr.bf16.mxu0 %v7280_v32 }
0x1884   : > { %4530 = vmatpush1.bf16.msra.mxu0 %v5537_v41  ;;  %5232 = vmatpush3.bf16.msra.mxu1 %v5547_v0 }
0x1885   : > { %4531 = vmatprep.subr.bf16.mxu0 %v5542_v13  ;;  %5233 = vmatprep.subr.bf16.mxu1 %v5551_v60 }
0x1888   : > { %4532 = vmatpush1.bf16.msra.mxu0 %v5540_v2  ;;  %5234 = vmatpush3.bf16.msra.mxu1 %v5551_v60 }
0x1889   : > { %4533 = vmatprep.subr.bf16.mxu0 %v5546_v44  ;;  %5235 = vmatprep.subr.bf16.mxu1 %v5554_v1 }
0x188c   : > { %4534 = vmatpush1.bf16.msra.mxu0 %v5544_v21  ;;  %5236 = vmatpush3.bf16.msra.mxu1 %v5554_v1 }
0x188d   : > { %4535 = vmatprep.subr.bf16.mxu0 %v5550_v61  ;;  %5251 = vmatprep.subr.msk.bf16.mxu1 %vm4519_vm11, %v5555_v58 }
0x1890   : > { %4536 = vmatpush1.bf16.msra.mxu0 %v5548_v14  ;;  %5238 = vmatpush3.bf16.msra.mxu1 %v4527_v39 }
0x1891   : > { %4919 = vmatprep.subr.msk.bf16.mxu0 %vm4519_vm11, %v4917_v40 }
0x1894   : > { %4538 = vmatpush1.bf16.msra.mxu0 %v4521_v12 }
0x1947   : > { %v5006_v55 = vpop.f32.mrb[88].mxu1 }
0x1948   : > { %v5007_v57 = vpop.f32.mrb[89].mxu1 }
0x1949   : > { %v5008_v17 = vadd.f32 %v5007_v57, %v5006_v55  ;;  %v5009_v37 = vpop.f32.mrb[90].mxu1 }
0x194a   : > { %v5010_v8 = vpop.f32.mrb[91].mxu1 }
0x194b   : > { %v5011_v34 = vadd.f32 %v5010_v8, %v5009_v37  ;;  %v4277_v36 = vadd.f32 %v5008_v17, %v4883_v63 }
0x194d   : > { %v4280_v30 = vadd.f32 %v5011_v34, %v4883_v63 }
0x1955   : > { %v5227_v7 = vpop.f32.mrb[88].mxu0 }
0x1956   : > { %v5012_v56 = vpop.f32.mrb[92].mxu1  ;;  %v4325_v62 = vpop.f32.mrb[89].mxu0 }
0x1957   : > { %v7172_v50 = vadd.f32 %v4325_v62, %v4277_v36  ;;  %v5013_v52 = vpop.f32.mrb[93].mxu1  ;;  %v5228_v9 = vpop.f32.mrb[90].mxu0 }
0x1958   : > { %v5014_v43 = vadd.f32 %v5013_v52, %v5012_v56  ;;  %v5015_v24 = vpop.f32.mrb[94].mxu1  ;;  %v4328_v5 = vpop.f32.mrb[91].mxu0 }
0x1959   : > { %v4344_v49 = vmin.f32 %v7172_v50, 20.0  ;;  %v7175_v22 = vadd.f32 %v4328_v5, %v4280_v30  ;;  %v5016_v20 = vpop.f32.mrb[95].mxu1  ;;  %vm4340_vm12 = vcmp.gt.f32.partialorder %v7172_v50, 20.0 }
0x195a   : > { %v4285_v18 = vadd.f32 %v5014_v43, %v4883_v63  ;;  %v5017_v46 = vadd.f32 %v5016_v20, %v5015_v24 }
0x195b   : > { %v4348_v23 = vmul.f32 1.442695, %v4344_v49  ;;  %v4345_v59 = vmin.f32 %v7175_v22, 20.0  ;;  %vm4341_vm15 = vcmp.gt.f32.partialorder %v7175_v22, 20.0 }
0x195c   : > { %v7178_v19 = vadd.f32 %v5227_v7, %v4285_v18  ;;  %v4288_v10 = vadd.f32 %v5017_v46, %v4883_v63 }
0x195d   : > { %5700 = vpow2.f32 %v4348_v23  ;;  %v4350_v26 = vmul.f32 1.442695, %v4345_v59 }
0x195e   : > { %v4346_v48 = vmin.f32 %v7178_v19, 20.0  ;;  %v7181_v25 = vadd.f32 %v5228_v9, %v4288_v10  ;;  %vm4342_vm2 = vcmp.gt.f32.partialorder %v7178_v19, 20.0 }
0x195f   : > { %5702 = vpow2.f32 %v4350_v26 }
0x1960   : > { %v4352_v11 = vmul.f32 1.442695, %v4346_v48  ;;  %v4347_v41 = vmin.f32 %v7181_v25, 20.0  ;;  %vm4343_vm4 = vcmp.gt.f32.partialorder %v7181_v25, 20.0 }
0x1962   : > { %5704 = vpow2.f32 %v4352_v11  ;;  %v4354_v13 = vmul.f32 1.442695, %v4347_v41 }
0x1964   : > { %5706 = vpow2.f32 %v4354_v13 }
0x1967   : > { %v5701_v2 = vpop.eup %5700 }
0x1968   : > { %v4356_v31 = vadd.f32 1.0, %v5701_v2  ;;  %v4359_v61 = vmul.f32 -0.5, %v5701_v2  ;;  %v4362_v1 = vand.u32 2147483647, %v5701_v2 }
0x1969   : > { %v5703_v44 = vpop.eup %5702 }
0x196a   : > { %5708 = vlog2.f32 %v4356_v31  ;;  %v4365_v21 = vadd.f32 1.0, %v5703_v44  ;;  %v4368_v54 = vmul.f32 -0.5, %v5703_v44  ;;  %v4360_v42 = vadd.f32 1.0, %v4359_v61 }
0x196b   : > { %v4371_v55 = vand.u32 2147483647, %v5703_v44  ;;  %vm4363_vm13 = vcmp.lt.f32.partialorder %v4362_v1, 0.0004427343 }
0x196c   : > { %v5705_v0 = vpop.eup %5704  ;;  %5710 = vlog2.f32 %v4365_v21  ;;  %v4369_v58 = vadd.f32 1.0, %v4368_v54  ;;  %v4361_v17 = vmul.f32 %v5701_v2, %v4360_v42 }
0x196d   : > { %v4374_v14 = vadd.f32 1.0, %v5705_v0  ;;  %v4377_v12 = vmul.f32 -0.5, %v5705_v0  ;;  %v4380_v7 = vand.u32 2147483647, %v5705_v0  ;;  %vm4372_vm14 = vcmp.lt.f32.partialorder %v4371_v55, 0.0004427343 }
0x196e   : > { %v5707_v60 = vpop.eup %5706  ;;  %v4370_v56 = vmul.f32 %v5703_v44, %v4369_v58 }
0x196f   : > { %5712 = vlog2.f32 %v4374_v14  ;;  %v4383_v40 = vadd.f32 1.0, %v5707_v60  ;;  %v4386_v37 = vmul.f32 -0.5, %v5707_v60  ;;  %v4378_v34 = vadd.f32 1.0, %v4377_v12 }
0x1970   : > { %v4389_v49 = vand.u32 2147483647, %v5707_v60  ;;  %vm4381_vm1 = vcmp.lt.f32.partialorder %v4380_v7, 0.0004427343 }
0x1971   : > { %5714 = vlog2.f32 %v4383_v40  ;;  %v4387_v30 = vadd.f32 1.0, %v4386_v37  ;;  %v4379_v24 = vmul.f32 %v5705_v0, %v4378_v34 }
0x1972   : > { %vm4390_vm3 = vcmp.lt.f32.partialorder %v4389_v49, 0.0004427343 }
0x1973   : > { %v4388_v59 = vmul.f32 %v5707_v60, %v4387_v30 }
0x1974   : > { %v5709_v39 = vpop.eup %5708 }
0x1975   : > { %v4358_v57 = vmul.f32 0.6931472, %v5709_v39 }
0x1976   : > { %v5711_v8 = vpop.eup %5710 }
0x1977   : > { %v4364_v63 = vsel %vm4363_vm13, %v4361_v17, %v4358_v57  ;;  %v4367_v36 = vmul.f32 0.6931472, %v5711_v8 }
0x1978   : > { %v4392_v62 = vsel %vm4340_vm12, %v7172_v50, %v4364_v63 }
0x1979   : > { %v5713_v52 = vpop.eup %5712  ;;  %5716 = vtanh.f32 %v4392_v62  ;;  %v4373_v9 = vsel %vm4372_vm14, %v4370_v56, %v4367_v36 }
0x197a   : > { %v4376_v43 = vmul.f32 0.6931472, %v5713_v52  ;;  %v4393_v5 = vsel %vm4341_vm15, %v7175_v22, %v4373_v9 }
0x197b   : > { %5718 = vtanh.f32 %v4393_v5  ;;  %v5715_v20 = vpop.eup %5714 }
0x197c   : > { %v4382_v18 = vsel %vm4381_vm1, %v4379_v24, %v4376_v43  ;;  %v4385_v23 = vmul.f32 0.6931472, %v5715_v20 }
0x197d   : > { %v4394_v46 = vsel %vm4342_vm2, %v7178_v19, %v4382_v18 }
0x197e   : > { %5720 = vtanh.f32 %v4394_v46  ;;  %v4391_v10 = vsel %vm4390_vm3, %v4388_v59, %v4385_v23 }
0x197f   : > { %v4395_v26 = vsel %vm4343_vm4, %v7181_v25, %v4391_v10 }
0x1980   : > { %5722 = vtanh.f32 %v4395_v26 }
0x1983   : > { %v5717_v48 = vpop.eup %5716 }
0x1984   : > { %v4400_v41 = vmul.f32 %v5717_v48, %v7172_v50  ;;  %v4424_v50 = vld [vmem:[%s7259_s14] sm:$0x7] }
0x1985   : > { %v5719_v11 = vpop.eup %5718  ;;  %v4433_v14 = vrot.slane %v4424_v50, %v6122_v15  ;;  %v4437_v15 = vrot.slane %v4424_v50, %v6150_v3 }
0x1986   : > { %v4401_v13 = vmul.f32 %v5719_v11, %v7175_v22  ;;  %v4429_v22 = vrot.slane %v4424_v50, %v6124_v16 }
0x1988   : > { %v4404_v2 = vpack.c.bf16 %v4401_v13, %v4400_v41  ;;  %v5721_v31 = vpop.eup %5720 }
0x1989   : > { %v4402_v21 = vmul.f32 %v5721_v31, %v7178_v19 }
0x198a   : > { %4920 = vmatmul.mubr.msk.bf16.vlgmr.msra.gmra.mrb[92].mxu0 %vm3588_vm7, %v4404_v2  ;;  %5239 = vmatprep.mubr.msk.bf16.mxu1 %vm3588_vm7, %v4404_v2  ;;  %v5723_v44 = vpop.eup %5722 }
0x198b   : > { %4571 = vmatprep.mubr.bf16.mxu0 %v7280_v32  ;;  %v4403_v0 = vmul.f32 %v5723_v44, %v7181_v25 }
0x198d   : > { %v4405_v61 = vpack.c.bf16 %v4403_v0, %v4402_v21 }
0x198f   : > { %5240 = vmatmul.mubr.msk.bf16.vlgmr.msra.gmra.mrb[96].mxu1 %vm3588_vm7, %v4405_v61 }
0x1992   : > { %4921 = vmatmul.mubr.msk.bf16.gmra.mrb[96].mxu0 %vm3588_vm7, %v4405_v61 }
0x1a5d   : > { %v4563_v60 = vpop.f32.mrb[92].mxu0 }
0x1a5e   : > { %v4564_v54 = vadd.f32 %v4563_v60, %v4429_v22  ;;  %v4565_v32 = vpop.f32.mrb[93].mxu0 }
0x1a5f   : > { %v4566_v19 = vadd.f32 %v4565_v32, %v4433_v14  ;;  %v4567_v25 = vpop.f32.mrb[94].mxu0 }
0x1a60   : > { %v4631_v40 = vadd.f32 %v4564_v54, %v6931_v35  ;;  %v4568_v16 = vadd.f32 %v4567_v25, %v4429_v22  ;;  %v4569_v42 = vpop.f32.mrb[95].mxu0 }
0x1a61   : > { %v4632_v1 = vadd.f32 %v4566_v19, %v6937_v53  ;;  %v4570_v12 = vadd.f32 %v4569_v42, %v4433_v14 }
0x1a62   : > { %4643 = vst [vmem:[%s7211_s30] sm:$0xff] %v4631_v40  ;;  %v4634_v58 = vadd.f32 %v4568_v16, %v6940_v47  ;;  %v5241_v55 = vpop.f32.mrb[96].mxu1 }
0x1a63   : > { %4644 = vst [vmem:[%s7211_s30 + $0x8] sm:$0xff] %v4632_v1  ;;  %v4635_v39 = vadd.f32 %v4570_v12, %v6946_v33  ;;  %v4625_v57 = vadd.f32 %v5241_v55, %v4437_v15  ;;  %v4616_v17 = vpop.f32.mrb[97].mxu1 }
0x1a64   : > { %4646 = vst [vmem:[%s7211_s30 + $0x18] sm:$0xff] %v4634_v58  ;;  %v4617_v35 = vadd.f32 %v4616_v17, %v4437_v15  ;;  %v5242_v37 = vpop.f32.mrb[98].mxu1 }
0x1a65   : > { %4647 = vst [vmem:[%s7211_s30 + $0x20] sm:$0xff] %v4635_v39  ;;  %v4573_v8 = vpop.f32.mrb[96].mxu0  ;;  %v4639_v3 = vadd.f32 %v4625_v57, %v6960_v45  ;;  %v4628_v53 = vadd.f32 %v5242_v37, %v4437_v15  ;;  %v4619_v63 = vpop.f32.mrb[99].mxu1 }
0x1a66   : > { %v4574_v34 = vadd.f32 %v4573_v8, %v4429_v22  ;;  %v4575_v47 = vpop.f32.mrb[97].mxu0  ;;  %v4633_v33 = vadd.f32 %v4617_v35, %v6934_v27  ;;  %v4620_v7 = vadd.f32 %v4619_v63, %v4437_v15 }
0x1a67   : > { %v4576_v36 = vadd.f32 %v4575_v47, %v4433_v14  ;;  %v4577_v56 = vpop.f32.mrb[98].mxu0  ;;  %4651 = vst.msk [vmem:[%s7211_s30 + $0x40] sm:$0xff] %vm519_vm0, %v4639_v3  ;;  %v4642_v62 = vadd.f32 %v4628_v53, %v6974_v29 }
0x1a68   : > { %v4637_v45 = vadd.f32 %v4574_v34, %v6957_v28  ;;  %v4578_v52 = vadd.f32 %v4577_v56, %v4429_v22  ;;  %v4579_v9 = vpop.f32.mrb[99].mxu0  ;;  %4645 = vst.msk [vmem:[%s7211_s30 + $0x10] sm:$0xff] %vm519_vm0, %v4633_v33  ;;  %v4636_v30 = vadd.f32 %v4620_v7, %v6943_v38 }
0x1a69   : > { %v4638_v27 = vadd.f32 %v4576_v36, %v6963_v6  ;;  %v4580_v43 = vadd.f32 %v4579_v9, %v4433_v14  ;;  %4654 = vst.msk [vmem:[%s7211_s30 + $0x58] sm:$0xff] %vm519_vm0, %v4642_v62 }
0x1a6a   : > { %4649 = vst [vmem:[%s7211_s30 + $0x30] sm:$0xff] %v4637_v45  ;;  %v4640_v24 = vadd.f32 %v4578_v52, %v6966_v4  ;;  %4648 = vst.msk [vmem:[%s7211_s30 + $0x28] sm:$0xff] %vm519_vm0, %v4636_v30 }
0x1a6b   : > { %4650 = vst [vmem:[%s7211_s30 + $0x38] sm:$0xff] %v4638_v27  ;;  %v4641_v29 = vadd.f32 %v4580_v43, %v6969_v51 }
0x1a6c   : > { %4652 = vst [vmem:[%s7211_s30 + $0x48] sm:$0xff] %v4640_v24 }
0x1a6d   : > { %4653 = vst [vmem:[%s7211_s30 + $0x50] sm:$0xff] %v4641_v29 }
0x1a6e PF: > { %s25_s18 = sadd.s32 1, %s5742_s18  }
0x1a6f   : > { %p22_p4 = scmp.ge.s32.totalorder %s25_s18, 6  }
0x1a71   :  { %24 = sbr.rel (!%p22_p4) target bundleno = 1 (0x1), region = 110 }

</bundles_post_ra>
